<compile_context>
chip_gen: v7x
topology: tpu7x:2x2x1
jax: 0.10.0
libtpu: 0.0.40
codegen_flags: <defaults>
</compile_context>

<pallas_src>
import math

import jax
import jax.numpy as jnp
from jax import lax
from jax.experimental import pallas as pl
from jax.experimental.pallas import tpu as pltpu


def _nb_forward_kernel(tokens_ref, r_ref, prior_ref, out_ref, acc_ref):
    """tokens_ref: (S, TB) int32 VMEM   -- resident across the V grid axis
       r_ref:      (TV, 1) f32  VMEM    -- streamed V tile of the log-ratio vector
       prior_ref:  (1, 1)  f32  SMEM    -- log(n_pos / n_neg)
       out_ref:    (1, TB) f32  VMEM    -- lane-dense scores for this B tile
       acc_ref:    (1, TB) f32  VMEM scratch (persists across the V axis)
    """
    k = pl.program_id(1)
    S, TB = tokens_ref.shape
    TV = r_ref.shape[0]

    @pl.when(k == 0)
    def _():
        acc_ref[...] = jnp.zeros_like(acc_ref)

    # Hoisted once per grid step (JAX does not CSE broadcast_in_dim in loops).
    vocab_ids = k * TV + lax.broadcasted_iota(jnp.int32, (TV, TB), 0)   # (TV, TB)
    r_b = jnp.broadcast_to(r_ref[...], (TV, TB))                        # (TV, TB)

    def body(j, acc):
        tok = tokens_ref[pl.ds(j, 1), :]                       # (1, TB) sublane row read
        contrib = jnp.where(vocab_ids == tok, r_b, 0.0)        # VPU select, r fused in
        return acc + jnp.sum(contrib, axis=0, keepdims=True)   # sublane reduce -> (1, TB)

    acc_ref[...] += lax.fori_loop(
        0, S, body, jnp.zeros((1, TB), jnp.float32), unroll=True)

    @pl.when(k == pl.num_programs(1) - 1)
    def _():
        out_ref[...] = acc_ref[...] + prior_ref[0, 0]


def multinomial_nb_forward(tokens, r, log_prior, *, tile_b=128, tile_v=512):
    """tokens: (B, S) int token indices in [0, V); r: (V,) float32; log_prior: float.
    Returns (B,) float32 scores, matching MultinomialNB.forward in 'bag' mode."""
    B, S = tokens.shape
    V = r.shape[0]
    tile_v = min(tile_v, V)

    b_pad = ((B + tile_b - 1) // tile_b) * tile_b
    v_pad = ((V + tile_v - 1) // tile_v) * tile_v

    # (S, B) layout: per-token step is a sublane row read, batch on lanes.
    tokens_t = tokens.astype(jnp.int32).T                                   # (S, B)
    if b_pad != B:
        # Pad token value v_pad never matches any vocab id -> contributes zero.
        tokens_t = jnp.concatenate(
            [tokens_t, jnp.full((S, b_pad - B), v_pad, dtype=jnp.int32)], axis=1)

    r_col = r.astype(jnp.float32).reshape(V, 1)                             # (V, 1)
    if v_pad != V:
        r_col = jnp.concatenate(
            [r_col, jnp.zeros((v_pad - V, 1), jnp.float32)], axis=0)

    prior = jnp.full((1, 1), log_prior, dtype=jnp.float32)

    grid = (b_pad // tile_b, v_pad // tile_v)   # (parallel B tiles, reduction V tiles)

    out = pl.pallas_call(
        _nb_forward_kernel,
        out_shape=jax.ShapeDtypeStruct((1, b_pad), jnp.float32),
        grid=grid,
        in_specs=[
            pl.BlockSpec((S, tile_b), lambda i, k: (0, i)),     # token tile, resident over k
            pl.BlockSpec((tile_v, 1), lambda i, k: (k, 0)),     # r tile, streamed over k
            pl.BlockSpec(memory_space=pltpu.SMEM),              # scalar prior
        ],
        out_specs=pl.BlockSpec((1, tile_b), lambda i, k: (0, i)),
        scratch_shapes=[pltpu.VMEM((1, tile_b), jnp.float32)],
        compiler_params=pltpu.CompilerParams(
            dimension_semantics=("parallel", "arbitrary")),
    )(tokens_t, r_col, prior)
    return out[0, :B]


if __name__ == "__main__":
    key = jax.random.PRNGKey(0)
    k_tok, k_p, k_q = jax.random.split(key, 3)

    # Small shapes consistent with the module: batch of 200 sequences of length
    # 16, vocab 512.  B=200 exercises the batch-padding path (-> 256 = 2 tiles
    # of 128) and tile_v=256 exercises the V reduction axis (2 tiles).
    B, S, V = 200, 16, 512

    # Deterministic "trained" parameters (shapes as defined by __init__/train):
    p = 1.0 + jax.random.uniform(k_p, (V,), dtype=jnp.float32) * 5.0
    q = 1.0 + jax.random.uniform(k_q, (V,), dtype=jnp.float32) * 5.0
    r = jnp.log((p / p.sum()) / (q / q.sum()))               # (V,) float32
    n_positive, n_negative = 6, 4
    log_prior = math.log(n_positive / n_negative)

    # Batch of token indices (B, S).
    tokens = jax.random.randint(k_tok, (B, S), 0, V, dtype=jnp.int32)

    out = multinomial_nb_forward(tokens, r, log_prior, tile_b=128, tile_v=256)
    out = jax.block_until_ready(out)

    # Pure-JAX reference: scores[i] = sum_j r[tokens[i, j]] + prior.
    ref = jnp.sum(r[tokens], axis=1) + log_prior
    assert out.shape == (B,)
    assert jnp.allclose(out, ref, atol=1e-4, rtol=1e-4)

    print("KERNEL_OK")
</pallas_src>

<mosaic_0001>
module attributes {stable_mosaic.version = 11 : i64} {
  func.func @_nb_forward_kernel(%arg0: i32, %arg1: i32, %arg2: memref<16x128xi32, #tpu.memory_space<vmem>>, %arg3: memref<256x1xf32, #tpu.memory_space<vmem>>, %arg4: memref<1x1xf32, #tpu.memory_space<smem>>, %arg5: memref<1x128xf32, #tpu.memory_space<vmem>>, %arg6: memref<1x128xf32, #tpu.memory_space<vmem>>) attributes {dimension_semantics = [#tpu.dimension_semantics<parallel>, #tpu.dimension_semantics<arbitrary>], iteration_bounds = array<i64: 2, 2>, scalar_prefetch = 0 : i64, scratch_operands = 1 : i64, tpu.core_type = #tpu.core_type<tc>, window_params = [{transform_indices = @transform_0, window_bounds = array<i64: 16, 128>}, {transform_indices = @transform_1, window_bounds = array<i64: 256, 1>}, {transform_indices = @transform_2, window_bounds = array<i64: 1, 1>}, {transform_indices = @transform_3, window_bounds = array<i64: 1, 128>}]} {
    %c0_i32 = arith.constant 0 : i32
    %0 = arith.cmpi eq, %arg1, %c0_i32 : i32
    %1 = arith.extui %0 : i1 to i32
    %c0_i32_0 = arith.constant 0 : i32
    %2 = arith.cmpi ne, %1, %c0_i32_0 : i32
    scf.if %2 {
      %cst_57 = arith.constant 0.000000e+00 : f32
      %161 = vector.broadcast %cst_57 : f32 to vector<1x128xf32>
      %c0_58 = arith.constant 0 : index
      %c0_59 = arith.constant 0 : index
      %162 = vector.load %arg6[%c0_58, %c0_59] : memref<1x128xf32, #tpu.memory_space<vmem>>, vector<1x128xf32>
      tpu.vector_store %arg6[%c0_58, %c0_59], %161 {strides = array<i32>} : memref<1x128xf32, #tpu.memory_space<vmem>>, vector<1x128xf32>,
    } else {
    }
    %c256_i32 = arith.constant 256 : i32
    %3 = arith.muli %arg1, %c256_i32 : i32
    %4 = tpu.iota {dimensions = array<i32: 0>} : vector<256x128xi32>
    %5 = vector.broadcast %3 : i32 to vector<256x128xi32>
    %6 = arith.addi %5, %4 : vector<256x128xi32>
    %c0 = arith.constant 0 : index
    %c0_1 = arith.constant 0 : index
    %7 = vector.load %arg3[%c0, %c0_1] : memref<256x1xf32, #tpu.memory_space<vmem>>, vector<256x1xf32>
    %8 = vector.shape_cast %7 : vector<256x1xf32> to vector<256x1xf32>
    %9 = vector.broadcast %8 : vector<256x1xf32> to vector<256x128xf32>
    %c0_2 = arith.constant 0 : index
    %c0_3 = arith.constant 0 : index
    %10 = vector.load %arg6[%c0_2, %c0_3] : memref<1x128xf32, #tpu.memory_space<vmem>>, vector<1x128xf32>
    %cst = arith.constant 0.000000e+00 : f32
    %11 = vector.broadcast %cst : f32 to vector<1x128xf32>
    %c0_i32_4 = arith.constant 0 : i32
    %12 = arith.index_cast %c0_i32_4 : i32 to index
    %c0_5 = arith.constant 0 : index
    %13 = vector.load %arg2[%12, %c0_5] : memref<16x128xi32, #tpu.memory_space<vmem>>, vector<1x128xi32>
    %14 = vector.broadcast %13 : vector<1x128xi32> to vector<256x128xi32>
    %15 = arith.cmpi eq, %6, %14 : vector<256x128xi32>
    %cst_6 = arith.constant 0.000000e+00 : f32
    %16 = vector.broadcast %cst_6 : f32 to vector<256x128xf32>
    %17 = arith.select %15, %9, %16 : vector<256x128xi1>, vector<256x128xf32>
    %cst_7 = arith.constant dense<0.000000e+00> : vector<128xf32>
    %18 = vector.multi_reduction <add>, %17, %cst_7 [0] : vector<256x128xf32> to vector<128xf32>
    %19 = vector.shape_cast %18 : vector<128xf32> to vector<1x128xf32>
    %20 = arith.addf %11, %19 : vector<1x128xf32>
    %c1_i32 = arith.constant 1 : i32
    %21 = arith.index_cast %c1_i32 : i32 to index
    %c0_8 = arith.constant 0 : index
    %22 = vector.load %arg2[%21, %c0_8] : memref<16x128xi32, #tpu.memory_space<vmem>>, vector<1x128xi32>
    %23 = vector.broadcast %22 : vector<1x128xi32> to vector<256x128xi32>
    %24 = arith.cmpi eq, %6, %23 : vector<256x128xi32>
    %cst_9 = arith.constant 0.000000e+00 : f32
    %25 = vector.broadcast %cst_9 : f32 to vector<256x128xf32>
    %26 = arith.select %24, %9, %25 : vector<256x128xi1>, vector<256x128xf32>
    %cst_10 = arith.constant dense<0.000000e+00> : vector<128xf32>
    %27 = vector.multi_reduction <add>, %26, %cst_10 [0] : vector<256x128xf32> to vector<128xf32>
    %28 = vector.shape_cast %27 : vector<128xf32> to vector<1x128xf32>
    %29 = arith.addf %20, %28 : vector<1x128xf32>
    %c2_i32 = arith.constant 2 : i32
    %30 = arith.index_cast %c2_i32 : i32 to index
    %c0_11 = arith.constant 0 : index
    %31 = vector.load %arg2[%30, %c0_11] : memref<16x128xi32, #tpu.memory_space<vmem>>, vector<1x128xi32>
    %32 = vector.broadcast %31 : vector<1x128xi32> to vector<256x128xi32>
    %33 = arith.cmpi eq, %6, %32 : vector<256x128xi32>
    %cst_12 = arith.constant 0.000000e+00 : f32
    %34 = vector.broadcast %cst_12 : f32 to vector<256x128xf32>
    %35 = arith.select %33, %9, %34 : vector<256x128xi1>, vector<256x128xf32>
    %cst_13 = arith.constant dense<0.000000e+00> : vector<128xf32>
    %36 = vector.multi_reduction <add>, %35, %cst_13 [0] : vector<256x128xf32> to vector<128xf32>
    %37 = vector.shape_cast %36 : vector<128xf32> to vector<1x128xf32>
    %38 = arith.addf %29, %37 : vector<1x128xf32>
    %c3_i32 = arith.constant 3 : i32
    %39 = arith.index_cast %c3_i32 : i32 to index
    %c0_14 = arith.constant 0 : index
    %40 = vector.load %arg2[%39, %c0_14] : memref<16x128xi32, #tpu.memory_space<vmem>>, vector<1x128xi32>
    %41 = vector.broadcast %40 : vector<1x128xi32> to vector<256x128xi32>
    %42 = arith.cmpi eq, %6, %41 : vector<256x128xi32>
    %cst_15 = arith.constant 0.000000e+00 : f32
    %43 = vector.broadcast %cst_15 : f32 to vector<256x128xf32>
    %44 = arith.select %42, %9, %43 : vector<256x128xi1>, vector<256x128xf32>
    %cst_16 = arith.constant dense<0.000000e+00> : vector<128xf32>
    %45 = vector.multi_reduction <add>, %44, %cst_16 [0] : vector<256x128xf32> to vector<128xf32>
    %46 = vector.shape_cast %45 : vector<128xf32> to vector<1x128xf32>
    %47 = arith.addf %38, %46 : vector<1x128xf32>
    %c4_i32 = arith.constant 4 : i32
    %48 = arith.index_cast %c4_i32 : i32 to index
    %c0_17 = arith.constant 0 : index
    %49 = vector.load %arg2[%48, %c0_17] : memref<16x128xi32, #tpu.memory_space<vmem>>, vector<1x128xi32>
    %50 = vector.broadcast %49 : vector<1x128xi32> to vector<256x128xi32>
    %51 = arith.cmpi eq, %6, %50 : vector<256x128xi32>
    %cst_18 = arith.constant 0.000000e+00 : f32
    %52 = vector.broadcast %cst_18 : f32 to vector<256x128xf32>
    %53 = arith.select %51, %9, %52 : vector<256x128xi1>, vector<256x128xf32>
    %cst_19 = arith.constant dense<0.000000e+00> : vector<128xf32>
    %54 = vector.multi_reduction <add>, %53, %cst_19 [0] : vector<256x128xf32> to vector<128xf32>
    %55 = vector.shape_cast %54 : vector<128xf32> to vector<1x128xf32>
    %56 = arith.addf %47, %55 : vector<1x128xf32>
    %c5_i32 = arith.constant 5 : i32
    %57 = arith.index_cast %c5_i32 : i32 to index
    %c0_20 = arith.constant 0 : index
    %58 = vector.load %arg2[%57, %c0_20] : memref<16x128xi32, #tpu.memory_space<vmem>>, vector<1x128xi32>
    %59 = vector.broadcast %58 : vector<1x128xi32> to vector<256x128xi32>
    %60 = arith.cmpi eq, %6, %59 : vector<256x128xi32>
    %cst_21 = arith.constant 0.000000e+00 : f32
    %61 = vector.broadcast %cst_21 : f32 to vector<256x128xf32>
    %62 = arith.select %60, %9, %61 : vector<256x128xi1>, vector<256x128xf32>
    %cst_22 = arith.constant dense<0.000000e+00> : vector<128xf32>
    %63 = vector.multi_reduction <add>, %62, %cst_22 [0] : vector<256x128xf32> to vector<128xf32>
    %64 = vector.shape_cast %63 : vector<128xf32> to vector<1x128xf32>
    %65 = arith.addf %56, %64 : vector<1x128xf32>
    %c6_i32 = arith.constant 6 : i32
    %66 = arith.index_cast %c6_i32 : i32 to index
    %c0_23 = arith.constant 0 : index
    %67 = vector.load %arg2[%66, %c0_23] : memref<16x128xi32, #tpu.memory_space<vmem>>, vector<1x128xi32>
    %68 = vector.broadcast %67 : vector<1x128xi32> to vector<256x128xi32>
    %69 = arith.cmpi eq, %6, %68 : vector<256x128xi32>
    %cst_24 = arith.constant 0.000000e+00 : f32
    %70 = vector.broadcast %cst_24 : f32 to vector<256x128xf32>
    %71 = arith.select %69, %9, %70 : vector<256x128xi1>, vector<256x128xf32>
    %cst_25 = arith.constant dense<0.000000e+00> : vector<128xf32>
    %72 = vector.multi_reduction <add>, %71, %cst_25 [0] : vector<256x128xf32> to vector<128xf32>
    %73 = vector.shape_cast %72 : vector<128xf32> to vector<1x128xf32>
    %74 = arith.addf %65, %73 : vector<1x128xf32>
    %c7_i32 = arith.constant 7 : i32
    %75 = arith.index_cast %c7_i32 : i32 to index
    %c0_26 = arith.constant 0 : index
    %76 = vector.load %arg2[%75, %c0_26] : memref<16x128xi32, #tpu.memory_space<vmem>>, vector<1x128xi32>
    %77 = vector.broadcast %76 : vector<1x128xi32> to vector<256x128xi32>
    %78 = arith.cmpi eq, %6, %77 : vector<256x128xi32>
    %cst_27 = arith.constant 0.000000e+00 : f32
    %79 = vector.broadcast %cst_27 : f32 to vector<256x128xf32>
    %80 = arith.select %78, %9, %79 : vector<256x128xi1>, vector<256x128xf32>
    %cst_28 = arith.constant dense<0.000000e+00> : vector<128xf32>
    %81 = vector.multi_reduction <add>, %80, %cst_28 [0] : vector<256x128xf32> to vector<128xf32>
    %82 = vector.shape_cast %81 : vector<128xf32> to vector<1x128xf32>
    %83 = arith.addf %74, %82 : vector<1x128xf32>
    %c8_i32 = arith.constant 8 : i32
    %84 = arith.index_cast %c8_i32 : i32 to index
    %c0_29 = arith.constant 0 : index
    %85 = vector.load %arg2[%84, %c0_29] : memref<16x128xi32, #tpu.memory_space<vmem>>, vector<1x128xi32>
    %86 = vector.broadcast %85 : vector<1x128xi32> to vector<256x128xi32>
    %87 = arith.cmpi eq, %6, %86 : vector<256x128xi32>
    %cst_30 = arith.constant 0.000000e+00 : f32
    %88 = vector.broadcast %cst_30 : f32 to vector<256x128xf32>
    %89 = arith.select %87, %9, %88 : vector<256x128xi1>, vector<256x128xf32>
    %cst_31 = arith.constant dense<0.000000e+00> : vector<128xf32>
    %90 = vector.multi_reduction <add>, %89, %cst_31 [0] : vector<256x128xf32> to vector<128xf32>
    %91 = vector.shape_cast %90 : vector<128xf32> to vector<1x128xf32>
    %92 = arith.addf %83, %91 : vector<1x128xf32>
    %c9_i32 = arith.constant 9 : i32
    %93 = arith.index_cast %c9_i32 : i32 to index
    %c0_32 = arith.constant 0 : index
    %94 = vector.load %arg2[%93, %c0_32] : memref<16x128xi32, #tpu.memory_space<vmem>>, vector<1x128xi32>
    %95 = vector.broadcast %94 : vector<1x128xi32> to vector<256x128xi32>
    %96 = arith.cmpi eq, %6, %95 : vector<256x128xi32>
    %cst_33 = arith.constant 0.000000e+00 : f32
    %97 = vector.broadcast %cst_33 : f32 to vector<256x128xf32>
    %98 = arith.select %96, %9, %97 : vector<256x128xi1>, vector<256x128xf32>
    %cst_34 = arith.constant dense<0.000000e+00> : vector<128xf32>
    %99 = vector.multi_reduction <add>, %98, %cst_34 [0] : vector<256x128xf32> to vector<128xf32>
    %100 = vector.shape_cast %99 : vector<128xf32> to vector<1x128xf32>
    %101 = arith.addf %92, %100 : vector<1x128xf32>
    %c10_i32 = arith.constant 10 : i32
    %102 = arith.index_cast %c10_i32 : i32 to index
    %c0_35 = arith.constant 0 : index
    %103 = vector.load %arg2[%102, %c0_35] : memref<16x128xi32, #tpu.memory_space<vmem>>, vector<1x128xi32>
    %104 = vector.broadcast %103 : vector<1x128xi32> to vector<256x128xi32>
    %105 = arith.cmpi eq, %6, %104 : vector<256x128xi32>
    %cst_36 = arith.constant 0.000000e+00 : f32
    %106 = vector.broadcast %cst_36 : f32 to vector<256x128xf32>
    %107 = arith.select %105, %9, %106 : vector<256x128xi1>, vector<256x128xf32>
    %cst_37 = arith.constant dense<0.000000e+00> : vector<128xf32>
    %108 = vector.multi_reduction <add>, %107, %cst_37 [0] : vector<256x128xf32> to vector<128xf32>
    %109 = vector.shape_cast %108 : vector<128xf32> to vector<1x128xf32>
    %110 = arith.addf %101, %109 : vector<1x128xf32>
    %c11_i32 = arith.constant 11 : i32
    %111 = arith.index_cast %c11_i32 : i32 to index
    %c0_38 = arith.constant 0 : index
    %112 = vector.load %arg2[%111, %c0_38] : memref<16x128xi32, #tpu.memory_space<vmem>>, vector<1x128xi32>
    %113 = vector.broadcast %112 : vector<1x128xi32> to vector<256x128xi32>
    %114 = arith.cmpi eq, %6, %113 : vector<256x128xi32>
    %cst_39 = arith.constant 0.000000e+00 : f32
    %115 = vector.broadcast %cst_39 : f32 to vector<256x128xf32>
    %116 = arith.select %114, %9, %115 : vector<256x128xi1>, vector<256x128xf32>
    %cst_40 = arith.constant dense<0.000000e+00> : vector<128xf32>
    %117 = vector.multi_reduction <add>, %116, %cst_40 [0] : vector<256x128xf32> to vector<128xf32>
    %118 = vector.shape_cast %117 : vector<128xf32> to vector<1x128xf32>
    %119 = arith.addf %110, %118 : vector<1x128xf32>
    %c12_i32 = arith.constant 12 : i32
    %120 = arith.index_cast %c12_i32 : i32 to index
    %c0_41 = arith.constant 0 : index
    %121 = vector.load %arg2[%120, %c0_41] : memref<16x128xi32, #tpu.memory_space<vmem>>, vector<1x128xi32>
    %122 = vector.broadcast %121 : vector<1x128xi32> to vector<256x128xi32>
    %123 = arith.cmpi eq, %6, %122 : vector<256x128xi32>
    %cst_42 = arith.constant 0.000000e+00 : f32
    %124 = vector.broadcast %cst_42 : f32 to vector<256x128xf32>
    %125 = arith.select %123, %9, %124 : vector<256x128xi1>, vector<256x128xf32>
    %cst_43 = arith.constant dense<0.000000e+00> : vector<128xf32>
    %126 = vector.multi_reduction <add>, %125, %cst_43 [0] : vector<256x128xf32> to vector<128xf32>
    %127 = vector.shape_cast %126 : vector<128xf32> to vector<1x128xf32>
    %128 = arith.addf %119, %127 : vector<1x128xf32>
    %c13_i32 = arith.constant 13 : i32
    %129 = arith.index_cast %c13_i32 : i32 to index
    %c0_44 = arith.constant 0 : index
    %130 = vector.load %arg2[%129, %c0_44] : memref<16x128xi32, #tpu.memory_space<vmem>>, vector<1x128xi32>
    %131 = vector.broadcast %130 : vector<1x128xi32> to vector<256x128xi32>
    %132 = arith.cmpi eq, %6, %131 : vector<256x128xi32>
    %cst_45 = arith.constant 0.000000e+00 : f32
    %133 = vector.broadcast %cst_45 : f32 to vector<256x128xf32>
    %134 = arith.select %132, %9, %133 : vector<256x128xi1>, vector<256x128xf32>
    %cst_46 = arith.constant dense<0.000000e+00> : vector<128xf32>
    %135 = vector.multi_reduction <add>, %134, %cst_46 [0] : vector<256x128xf32> to vector<128xf32>
    %136 = vector.shape_cast %135 : vector<128xf32> to vector<1x128xf32>
    %137 = arith.addf %128, %136 : vector<1x128xf32>
    %c14_i32 = arith.constant 14 : i32
    %138 = arith.index_cast %c14_i32 : i32 to index
    %c0_47 = arith.constant 0 : index
    %139 = vector.load %arg2[%138, %c0_47] : memref<16x128xi32, #tpu.memory_space<vmem>>, vector<1x128xi32>
    %140 = vector.broadcast %139 : vector<1x128xi32> to vector<256x128xi32>
    %141 = arith.cmpi eq, %6, %140 : vector<256x128xi32>
    %cst_48 = arith.constant 0.000000e+00 : f32
    %142 = vector.broadcast %cst_48 : f32 to vector<256x128xf32>
    %143 = arith.select %141, %9, %142 : vector<256x128xi1>, vector<256x128xf32>
    %cst_49 = arith.constant dense<0.000000e+00> : vector<128xf32>
    %144 = vector.multi_reduction <add>, %143, %cst_49 [0] : vector<256x128xf32> to vector<128xf32>
    %145 = vector.shape_cast %144 : vector<128xf32> to vector<1x128xf32>
    %146 = arith.addf %137, %145 : vector<1x128xf32>
    %c15_i32 = arith.constant 15 : i32
    %147 = arith.index_cast %c15_i32 : i32 to index
    %c0_50 = arith.constant 0 : index
    %148 = vector.load %arg2[%147, %c0_50] : memref<16x128xi32, #tpu.memory_space<vmem>>, vector<1x128xi32>
    %149 = vector.broadcast %148 : vector<1x128xi32> to vector<256x128xi32>
    %150 = arith.cmpi eq, %6, %149 : vector<256x128xi32>
    %cst_51 = arith.constant 0.000000e+00 : f32
    %151 = vector.broadcast %cst_51 : f32 to vector<256x128xf32>
    %152 = arith.select %150, %9, %151 : vector<256x128xi1>, vector<256x128xf32>
    %cst_52 = arith.constant dense<0.000000e+00> : vector<128xf32>
    %153 = vector.multi_reduction <add>, %152, %cst_52 [0] : vector<256x128xf32> to vector<128xf32>
    %154 = vector.shape_cast %153 : vector<128xf32> to vector<1x128xf32>
    %155 = arith.addf %146, %154 : vector<1x128xf32>
    %c16_i32 = arith.constant 16 : i32
    %156 = arith.addf %10, %155 : vector<1x128xf32>
    %c0_53 = arith.constant 0 : index
    %c0_54 = arith.constant 0 : index
    %157 = vector.load %arg6[%c0_53, %c0_54] : memref<1x128xf32, #tpu.memory_space<vmem>>, vector<1x128xf32>
    tpu.vector_store %arg6[%c0_53, %c0_54], %156 {strides = array<i32>} : memref<1x128xf32, #tpu.memory_space<vmem>>, vector<1x128xf32>,
    %c1_i32_55 = arith.constant 1 : i32
    %158 = arith.cmpi eq, %arg1, %c1_i32_55 : i32
    %159 = arith.extui %158 : i1 to i32
    %c0_i32_56 = arith.constant 0 : i32
    %160 = arith.cmpi ne, %159, %c0_i32_56 : i32
    scf.if %160 {
      %c0_57 = arith.constant 0 : index
      %c0_58 = arith.constant 0 : index
      %161 = vector.load %arg6[%c0_57, %c0_58] : memref<1x128xf32, #tpu.memory_space<vmem>>, vector<1x128xf32>
      %c0_59 = arith.constant 0 : index
      %c0_60 = arith.constant 0 : index
      %162 = memref.load %arg4[%c0_59, %c0_60] : memref<1x1xf32, #tpu.memory_space<smem>>
      %163 = vector.broadcast %162 : f32 to vector<1x128xf32>
      %164 = arith.addf %161, %163 : vector<1x128xf32>
      %c0_61 = arith.constant 0 : index
      %c0_62 = arith.constant 0 : index
      %165 = vector.load %arg5[%c0_61, %c0_62] : memref<1x128xf32, #tpu.memory_space<vmem>>, vector<1x128xf32>
      tpu.vector_store %arg5[%c0_61, %c0_62], %164 {strides = array<i32>} : memref<1x128xf32, #tpu.memory_space<vmem>>, vector<1x128xf32>,
    } else {
    }
    return
  }
  func.func @transform_0(%arg0: i32, %arg1: i32) -> (i32, i32) {
    %c0_i32 = arith.constant 0 : i32
    %c0_i32_0 = arith.constant 0 : i32
    return %c0_i32, %arg0 : i32, i32
  }
  func.func @transform_1(%arg0: i32, %arg1: i32) -> (i32, i32) {
    %c0_i32 = arith.constant 0 : i32
    %c0_i32_0 = arith.constant 0 : i32
    return %arg1, %c0_i32 : i32, i32
  }
  func.func @transform_2(%arg0: i32, %arg1: i32) -> (i32, i32) {
    %c0_i32 = arith.constant 0 : i32
    %c0_i32_0 = arith.constant 0 : i32
    %c0_i32_1 = arith.constant 0 : i32
    return %c0_i32, %c0_i32_0 : i32, i32
  }
  func.func @transform_3(%arg0: i32, %arg1: i32) -> (i32, i32) {
    %c0_i32 = arith.constant 0 : i32
    %c0_i32_0 = arith.constant 0 : i32
    return %c0_i32, %arg0 : i32, i32
  }
}

</mosaic_0001>

<bundles_post_ra>
// kernel: tpu_custom_call.1
= control target key start
LH: loop header
LB: loop body
LE: loop exit
PB: predicated region body
PF: predicated region fallthrough
CT: control target
= control target key end

     0   :  { %s6342_s0 = inlined_call_operand.vmem [shape: s32[16,256], index: 0, kind: input, shape index: {}]   ;;  %s6343_s1 = inlined_call_operand.vmem [shape: f32[512,1], index: 1, kind: input, shape index: {}]   ;;  %s6344_s2 = inlined_call_operand.<no memory space> [shape: f32[1,1], index: 2, kind: input, shape index: {}]   ;;  %s6345_s3 = inlined_call_operand.hbm [shape: f32[1,256], index: 3, kind: output, shape index: {}]  }
   0x1   :  { %8 = sst [smem:[#allocation3]] %s6344_s2 }
   0x2   :  { %9 = vsyncpa [#allocation6], 0 }
   0x3   :  { %11 = vsyncpa [#allocation6 + $0x1], 0  ;;  %s2592_s14 = smov 0   ;;  %s2594_s15 = smov 0  }
   0x4   :  { %s2596_s16 = smov 0   ;;  %s2598_s17 = smov 0  }
   0x5   :  { %s2600_s18 = smov 0   ;;  %s2602_s19 = smov 0  }
   0x6   :  { %s2604_s20 = smov 0   ;;  %s2606_s21 = smov 0  }
   0x7 LB: > { %s2326_s2 = sadd.s32 4294967295, %s2564_s21   ;;  %s2327_s22 = sadd.s32 4294967294, %s2564_s21   ;;  %s2564_s21 = sphi %s2606_s21, %s17_s21   ;;  %s2560_s20 = sphi %s2604_s20, %s6695_s20   ;;  %s2556_s19 = sphi %s2602_s19, %s6694_s19   ;;  %s2552_s18 = sphi %s2600_s18, %s6693_s18   ;;  %s2548_s17 = sphi %s2598_s17, %s6692_s17   ;;  %s2544_s16 = sphi %s2596_s16, %s6691_s16   ;;  %s2540_s15 = sphi %s2594_s15, %s6690_s15   ;;  %s2536_s14 = sphi %s2592_s14, %s6689_s14  }
   0x8   : > { %s26_s23 = sadd.s32 1, %s2556_s19  ;;  %s29_s24 = sadd.s32 1, %s2560_s20 }
   0x9   : > { %p27_p0 = scmp.ge.s32.totalorder %s26_s23, 2  ;;  %p43_p1 = scmp.ne.s32.totalorder %s2544_s16, %s2540_s15 }
   0xa   : > { %p44_p2 = scmp.eq.s32.totalorder %s2564_s21, 0  ;;  %p120_p4 = scmp.eq.s32.totalorder %s2326_s2, 3 }
   0xb   : > { %s6697_s23 = smov (%p27_p0, %s26_s23), 0  ;;  %s6699_s24 = smov (!%p27_p0, %s29_s24), %s2560_s20 }
   0xc   : > { %p2642_p3 = por %p44_p2, %p43_p1  ;;  %p31_p5 = scmp.ge.s32.totalorder %s6699_s24, 2 }
   0xd   : > { %p125_p6 = scmp.ne.s32.totalorder %s2540_s15, %s2536_s14  ;;  %p2648_p7 = por %p120_p4, %p43_p1 }
   0xe   : > { %p126_p8 = scmp.eq.s32.totalorder %s2327_s22, 3  ;;  %s6701_s24 = smov (%p31_p5, %s6699_s24), 0 }
   0xf   : > { %s33_s28 = ssub.s32 %s2560_s20, %s6701_s24  ;;  %s36_s29 = sadd.s32 1, %s2544_s16 }
  0x10   : > { %p2654_p9 = por %p126_p8, %p125_p6  ;;  %p34_p10 = scmp.eq.s32.totalorder %s33_s28, 0 }
  0x11   : > { %p2329_p11 = scmp.ge.s32.totalorder %s2564_s21, 4 }
  0x12   : > { %s2662_s30 = scalar_select %p34_p10, %s2544_s16, %s36_s29  }
  0x13   : > { %145 = sbr.rel (%p2329_p11) target bundleno = 33 (0x21), region = 20 }
  0x1a   : > { %148 = sbr.rel (!%p2642_p3) target bundleno = 33 (0x21), region = 24  ;;  %s150_s4 = sand.u32 (%p2642_p3), 1, %s2544_s16  }
  0x1b   : > { %s2331_s5 = sshll.u32 (%p2642_p3), %s2560_s20, 3  ;;  %s2330_s6 = sshll.u32 (%p2642_p3), %s150_s4, 4 }
  0x1c   : > { %s154_s9 = scalar_lea.vmem (%p2642_p3), %s6342_s0, %s2331_s5  ;;  %s152_s10 = scalar_lea.vmem (%p2642_p3), [#allocation4], %s2330_s6 }
  0x1d   : > { %v184_v0 = vld [vmem:[%s154_s9] sm:$0xff] (%p2642_p3)  ;;  %v186_v1 = vld [vmem:[%s154_s9 + $0x10] sm:$0xff] (%p2642_p3) }
  0x1e   : > { %185 = vst [vmem:[%s152_s10] sm:$0xff] (%p2642_p3), %v184_v0  ;;  %187 = vst [vmem:[%s152_s10 + $0x8] sm:$0xff] (%p2642_p3), %v186_v1 }
  0x21 PF: > { %p2332_p12 = scmp.ge.s32.totalorder %s2564_s21, 1  ;;  %p201_p13 = scmp.lt.s32.totalorder %s2564_s21, 5 }
  0x23   : > { %p202_p0 = pnand %p2332_p12, %p201_p13 }
  0x25   : > { %205 = sbr.rel (%p202_p0) target bundleno = 647 (0x287), region = 66 }
  0x2c   : > { %s2675_s11 = sand.u32 1, %s2540_s15   ;;  %s2334_s12 = sshll.u32 %s2548_s17, 5 }
  0x2d   : > { %s2333_s13 = sshll.u32 %s2675_s11, 4  ;;  %p236_p1 = scmp.lt.s32.totalorder %s2334_s12, 63 }
  0x2e   : > { %s2684_s29 = scalar_lea.vmem [#allocation4], %s2333_s13  ;;  %s234_s4 = scalar_lea.vmem [#allocation5], %s2675_s11 }
  0x2f   : > { %s6703_s12 = smov (!%p236_p1, %s2334_s12), 63  ;;  %p2336_p2 = scmp.ne.s32.totalorder %s2548_s17, 0 }
  0x30   : > { %s2335_s2 = sshll.u32 %s6703_s12, 3  ;;  %v2566_v2 = vmov (!%p2336_p2), 0.0  }
  0x31   : > { %s2682_s28 = scalar_lea.vmem %s6343_s1, %s2335_s2  ;;  %244 = sbr.rel (%p2336_p2) target bundleno = 56 (0x38), region = 74  ;;  %245 = vst [vmem:[#allocation2] sm:$0x1] (!%p2336_p2), %v2566_v2 }
  0x38 PF: > { %v315_v3 = vld [vmem:[%s2682_s28 + $0x10] sm:$0xff]  ;;  %v313_v4 = vld [vmem:[%s2682_s28] sm:$0xff]  ;;  %v2567_v5 = vmov 0   ;;  %v316_v6 = vld [vmem:[%s2682_s28 + $0x18] sm:$0xff]  ;;  %v247_v36 = vlaneseq  ;;  %s2337_s5 = sshll.u32 %s2548_s17, 8  ;;  %p2354_p3 = scmp.ne.s32.totalorder %s2548_s17, 1 }
  0x39   : > { %2432 = vset.pattern.permute.xlu1 %v2567_v5  ;;  %2431 = vset.pattern.permute.xlu0 %v2567_v5  ;;  %v314_v7 = vld [vmem:[%s2682_s28 + $0x8] sm:$0xff]  ;;  %v317_v9 = vld [vmem:[%s2682_s28 + $0x20] sm:$0xff]  ;;  %v320_v10 = vld [vmem:[%s2682_s28 + $0x38] sm:$0xff]  ;;  %v2724_v39 = vstv %s2337_s5  ;;  %s2225_s6 = sld [smem:[#allocation3]] (!%p2354_p3) }
  0x3a   : > { %357 = vperm.xlu1 %2432, %v315_v3   ;;  %347 = vperm.xlu0 %2431, %v313_v4   ;;  %v318_v8 = vld [vmem:[%s2682_s28 + $0x28] sm:$0xff]  ;;  %v319_v11 = vld [vmem:[%s2682_s28 + $0x30] sm:$0xff]  ;;  %v321_v13 = vld [vmem:[%s2682_s28 + $0x40] sm:$0xff]  ;;  %v2720_v37 = vshrl.u32 %v247_v36, 7  ;;  %6368 = vst [vmem:[#allocation9_spill] sm:$0xff] %v2724_v39 }
  0x3b   : > { %v322_v12 = vld [vmem:[%s2682_s28 + $0x48] sm:$0xff]  ;;  %v324_v14 = vld [vmem:[%s2682_s28 + $0x58] sm:$0xff]  ;;  %v323_v15 = vld [vmem:[%s2682_s28 + $0x50] sm:$0xff] }
  0x3c   : > { %v326_v16 = vld [vmem:[%s2682_s28 + $0x68] sm:$0xff]  ;;  %v325_v17 = vld [vmem:[%s2682_s28 + $0x60] sm:$0xff]  ;;  %v328_v18 = vld [vmem:[%s2682_s28 + $0x78] sm:$0xff]  ;;  %6367 = vst [vmem:[#allocation8_spill] sm:$0xff] %v2720_v37  ;;  %v250_v38 = vadd.s32 16, %v2720_v37  ;;  %v251_v41 = vadd.s32 24, %v2720_v37  ;;  %v2748_v48 = vadd.s32 %v2724_v39, %v2720_v37 }
  0x3d   : > { %v327_v19 = vld [vmem:[%s2682_s28 + $0x70] sm:$0xff]  ;;  %v330_v20 = vld [vmem:[%s2682_s28 + $0x88] sm:$0xff]  ;;  %v329_v21 = vld [vmem:[%s2682_s28 + $0x80] sm:$0xff]  ;;  %v249_v42 = vadd.s32 8, %v2720_v37  ;;  %v253_v62 = vadd.s32 40, %v2720_v37  ;;  %v252_v63 = vadd.s32 32, %v2720_v37 }
  0x3e   : > { %362 = vperm.xlu1 %2432, %v316_v6   ;;  %352 = vperm.xlu0 %2431, %v314_v7   ;;  %v332_v22 = vld [vmem:[%s2682_s28 + $0x98] sm:$0xff]  ;;  %v331_v23 = vld [vmem:[%s2682_s28 + $0x90] sm:$0xff]  ;;  %v334_v24 = vld [vmem:[%s2682_s28 + $0xa8] sm:$0xff]  ;;  %v2727_v40 = vadd.s32 %v2724_v39, %v250_v38  ;;  %v2764_v52 = vadd.s32 %v2724_v39, %v251_v41  ;;  %v255_v0 = vadd.s32 56, %v2720_v37  ;;  %v254_v1 = vadd.s32 48, %v2720_v37 }
  0x3f   : > { %v333_v25 = vld [vmem:[%s2682_s28 + $0xa0] sm:$0xff]  ;;  %v336_v26 = vld [vmem:[%s2682_s28 + $0xb8] sm:$0xff]  ;;  %v335_v27 = vld [vmem:[%s2682_s28 + $0xb0] sm:$0xff]  ;;  %v2767_v53 = vadd.s32 %v2724_v39, %v249_v42  ;;  %v257_v2 = vadd.s32 72, %v2720_v37  ;;  %v256_v3 = vadd.s32 64, %v2720_v37  ;;  %v259_v4 = vadd.s32 88, %v2720_v37 }
  0x40   : > { %v338_v28 = vld [vmem:[%s2682_s28 + $0xc8] sm:$0xff]  ;;  %v337_v29 = vld [vmem:[%s2682_s28 + $0xc0] sm:$0xff]  ;;  %v340_v30 = vld [vmem:[%s2682_s28 + $0xd8] sm:$0xff]  ;;  %v258_v5 = vadd.s32 80, %v2720_v37  ;;  %v261_v6 = vadd.s32 104, %v2720_v37  ;;  %v260_v7 = vadd.s32 96, %v2720_v37 }
  0x41   : > { %v339_v31 = vld [vmem:[%s2682_s28 + $0xd0] sm:$0xff]  ;;  %v342_v32 = vld [vmem:[%s2682_s28 + $0xe8] sm:$0xff]  ;;  %v341_v33 = vld [vmem:[%s2682_s28 + $0xe0] sm:$0xff] }
  0x42   : > { %372 = vperm.xlu1 %2432, %v318_v8   ;;  %367 = vperm.xlu0 %2431, %v317_v9   ;;  %v344_v34 = vld [vmem:[%s2682_s28 + $0xf8] sm:$0xff]  ;;  %v343_v35 = vld [vmem:[%s2682_s28 + $0xf0] sm:$0xff]  ;;  %v263_v8 = vadd.s32 120, %v2720_v37  ;;  %v262_v9 = vadd.s32 112, %v2720_v37 }
  0x43   : > { %v2732_v43 = vld [vmem:[%s2684_s29] ss:$0 sm:$0xff]  ;;  %v2735_v44 = vld [vmem:[%s2684_s29 + $0x1] ss:$0 sm:$0xff]  ;;  %v2738_v45 = vld [vmem:[%s2684_s29 + $0x2] ss:$0 sm:$0xff] }
  0x44   : > { %v2741_v46 = vld [vmem:[%s2684_s29 + $0x3] ss:$0 sm:$0xff]  ;;  %v2744_v47 = vld [vmem:[%s2684_s29 + $0x4] ss:$0 sm:$0xff]  ;;  %v2751_v49 = vld [vmem:[%s2684_s29 + $0x5] ss:$0 sm:$0xff]  ;;  %vm513_vm0 = vcmp.eq.s32.totalorder %v2727_v40, %v2732_v43  ;;  %vm620_vm1 = vcmp.eq.s32.totalorder %v2727_v40, %v2735_v44  ;;  %vm727_vm2 = vcmp.eq.s32.totalorder %v2727_v40, %v2738_v45  ;;  %vm512_vm15 = vcmp.eq.s32.totalorder %v2767_v53, %v2732_v43 }
  0x45   : > { %v2754_v50 = vld [vmem:[%s2684_s29 + $0x6] ss:$0 sm:$0xff]  ;;  %v2757_v51 = vld [vmem:[%s2684_s29 + $0x7] ss:$0 sm:$0xff]  ;;  %v2770_v54 = vld [vmem:[%s2684_s29 + $0x8] ss:$0 sm:$0xff]  ;;  %vm834_vm3 = vcmp.eq.s32.totalorder %v2727_v40, %v2741_v46  ;;  %vm941_vm4 = vcmp.eq.s32.totalorder %v2727_v40, %v2744_v47  ;;  %vm1048_vm5 = vcmp.eq.s32.totalorder %v2727_v40, %v2751_v49  ;;  %vm619_vm14 = vcmp.eq.s32.totalorder %v2767_v53, %v2735_v44 }
  0x46   : > { %382 = vperm.xlu1 %2432, %v320_v10   ;;  %377 = vperm.xlu0 %2431, %v319_v11   ;;  %v2773_v55 = vld [vmem:[%s2684_s29 + $0x9] ss:$0 sm:$0xff]  ;;  %v2776_v56 = vld [vmem:[%s2684_s29 + $0xa] ss:$0 sm:$0xff]  ;;  %v2787_v57 = vld [vmem:[%s2684_s29 + $0xb] ss:$0 sm:$0xff]  ;;  %vm1155_vm6 = vcmp.eq.s32.totalorder %v2727_v40, %v2754_v50  ;;  %vm1262_vm7 = vcmp.eq.s32.totalorder %v2727_v40, %v2757_v51  ;;  %vm1369_vm8 = vcmp.eq.s32.totalorder %v2727_v40, %v2770_v54 }
  0x47   : > { %v2790_v58 = vld [vmem:[%s2684_s29 + $0xc] ss:$0 sm:$0xff]  ;;  %v2793_v59 = vld [vmem:[%s2684_s29 + $0xd] ss:$0 sm:$0xff]  ;;  %v2804_v60 = vld [vmem:[%s2684_s29 + $0xe] ss:$0 sm:$0xff]  ;;  %vm1690_vm11 = vcmp.eq.s32.totalorder %v2727_v40, %v2787_v57  ;;  %vm1584_vm12 = vcmp.eq.s32.totalorder %v2764_v52, %v2776_v56  ;;  %vm1691_vm13 = vcmp.eq.s32.totalorder %v2764_v52, %v2787_v57 }
  0x48   : > { %v2807_v61 = vld [vmem:[%s2684_s29 + $0xf] ss:$0 sm:$0xff]  ;;  %vm1795_vm9 = vcmp.eq.s32.totalorder %v2748_v48, %v2790_v58  ;;  %vm1902_vm10 = vcmp.eq.s32.totalorder %v2748_v48, %v2793_v59  ;;  %v265_v10 = vadd.s32 136, %v2720_v37  ;;  %v264_v11 = vadd.s32 128, %v2720_v37 }
  0x4a   : > { %392 = vperm.xlu1 %2432, %v322_v12   ;;  %387 = vperm.xlu0 %2431, %v321_v13   ;;  %v2872_v12 = vadd.s32 %v2724_v39, %v253_v62  ;;  %v2875_v13 = vadd.s32 %v2724_v39, %v252_v63 }
  0x4e   : > { %402 = vperm.xlu1 %2432, %v324_v14   ;;  %397 = vperm.xlu0 %2431, %v323_v15   ;;  %v2878_v14 = vadd.s32 %v2724_v39, %v255_v0  ;;  %v2881_v15 = vadd.s32 %v2724_v39, %v254_v1 }
  0x50   : > { %6369 = vst [vmem:[#allocation10_spill] sm:$0xff] %v2878_v14  ;;  %6370 = vst [vmem:[#allocation11_spill] sm:$0xff] %v2881_v15 }
  0x52   : > { %412 = vperm.xlu1 %2432, %v326_v16   ;;  %407 = vperm.xlu0 %2431, %v325_v17   ;;  %v2892_v16 = vadd.s32 %v2724_v39, %v257_v2  ;;  %v2895_v17 = vadd.s32 %v2724_v39, %v256_v3 }
  0x54   : > { %6371 = vst [vmem:[#allocation12_spill] sm:$0xff] %v2892_v16  ;;  %6372 = vst [vmem:[#allocation13_spill] sm:$0xff] %v2895_v17 }
  0x56   : > { %422 = vperm.xlu1 %2432, %v328_v18   ;;  %417 = vperm.xlu0 %2431, %v327_v19   ;;  %v2898_v18 = vadd.s32 %v2724_v39, %v259_v4  ;;  %v2901_v19 = vadd.s32 %v2724_v39, %v258_v5 }
  0x58   : > { %6373 = vst [vmem:[#allocation14_spill] sm:$0xff] %v2898_v18  ;;  %6374 = vst [vmem:[#allocation15_spill] sm:$0xff] %v2901_v19 }
  0x5a   : > { %432 = vperm.xlu1 %2432, %v330_v20   ;;  %427 = vperm.xlu0 %2431, %v329_v21   ;;  %v2912_v21 = vadd.s32 %v2724_v39, %v261_v6 }
  0x5c   : > { %6375 = vst [vmem:[#allocation16_spill] sm:$0xff] %v2912_v21 }
  0x5e   : > { %442 = vperm.xlu1 %2432, %v332_v22   ;;  %437 = vperm.xlu0 %2431, %v331_v23   ;;  %v2915_v22 = vadd.s32 %v2724_v39, %v260_v7  ;;  %v2918_v23 = vadd.s32 %v2724_v39, %v263_v8 }
  0x60   : > { %6376 = vst [vmem:[#allocation17_spill] sm:$0xff] %v2915_v22  ;;  %6377 = vst [vmem:[#allocation18_spill] sm:$0xff] %v2918_v23 }
  0x62   : > { %452 = vperm.xlu1 %2432, %v334_v24   ;;  %447 = vperm.xlu0 %2431, %v333_v25   ;;  %v2921_v24 = vadd.s32 %v2724_v39, %v262_v9 }
  0x64   : > { %6378 = vst [vmem:[#allocation19_spill] sm:$0xff] %v2921_v24 }
  0x66   : > { %462 = vperm.xlu1 %2432, %v336_v26   ;;  %457 = vperm.xlu0 %2431, %v335_v27   ;;  %v2942_v27 = vadd.s32 %v2724_v39, %v265_v10 }
  0x68   : > { %6379 = vst [vmem:[#allocation20_spill] sm:$0xff] %v2942_v27 }
  0x6a   : > { %472 = vperm.xlu1 %2432, %v338_v28   ;;  %467 = vperm.xlu0 %2431, %v337_v29   ;;  %v2945_v28 = vadd.s32 %v2724_v39, %v264_v11 }
  0x6c   : > { %6380 = vst [vmem:[#allocation21_spill] sm:$0xff] %v2945_v28 }
  0x6e   : > { %482 = vperm.xlu1 %2432, %v340_v30   ;;  %477 = vperm.xlu0 %2431, %v339_v31  }
  0x72   : > { %492 = vperm.xlu1 %2432, %v342_v32   ;;  %487 = vperm.xlu0 %2431, %v341_v33  }
  0x76   : > { %502 = vperm.xlu1 %2432, %v344_v34   ;;  %497 = vperm.xlu0 %2431, %v343_v35  }
  0xb9   : > { %v358_v20 = vpop.permute.xlu1 %357  ;;  %v348_v33 = vpop.permute.xlu0 %347 }
  0xba   : > { %v2926_v25 = vsel %vm513_vm0, %v358_v20, 0.0  ;;  %v2931_v26 = vsel %vm620_vm1, %v358_v20, 0.0  ;;  %v2950_v29 = vsel %vm727_vm2, %v358_v20, 0.0  ;;  %v2955_v30 = vsel %vm834_vm3, %v358_v20, 0.0 }
  0xbb   : > { %v2960_v31 = vsel %vm941_vm4, %v358_v20, 0.0  ;;  %v2965_v32 = vsel %vm1048_vm5, %v358_v20, 0.0  ;;  %vm1798_vm0 = vcmp.eq.s32.totalorder %v2764_v52, %v2790_v58  ;;  %vm1905_vm1 = vcmp.eq.s32.totalorder %v2764_v52, %v2793_v59 }
  0xbc   : > { %vm726_vm2 = vcmp.eq.s32.totalorder %v2767_v53, %v2738_v45  ;;  %v2978_v34 = vsel %vm1155_vm6, %v358_v20, 0.0  ;;  %v2983_v35 = vsel %vm1262_vm7, %v358_v20, 0.0  ;;  %v2988_v36 = vsel %vm1369_vm8, %v358_v20, 0.0 }
  0xbd   : > { %vm6381_vm4 = vcmp.eq.s32.totalorder %v2727_v40, %v2773_v55  ;;  %vm2012_vm5 = vcmp.eq.s32.totalorder %v2764_v52, %v2804_v60  ;;  %vm6382_vm8 = vcmp.eq.s32.totalorder %v2727_v40, %v2776_v56  ;;  %v3011_v42 = vsel %vm1690_vm11, %v358_v20, 0.0  ;;  %v363_v7 = vpop.permute.xlu1 %362  ;;  %v353_v21 = vpop.permute.xlu0 %352 }
  0xbe   : > { %v2993_v38 = vsel %vm6381_vm4, %v358_v20, 0.0  ;;  %v3006_v41 = vsel %vm6382_vm8, %v358_v20, 0.0  ;;  %vm6383_vm4 = vcmp.eq.s32.totalorder %v2727_v40, %v2790_v58  ;;  %vm6384_vm7 = vcmp.eq.s32.totalorder %v2727_v40, %v2793_v59 }
  0xbf   : > { %v3016_v62 = vsel %vm6383_vm4, %v358_v20, 0.0  ;;  %v3021_v63 = vsel %vm6384_vm7, %v358_v20, 0.0  ;;  %vm6385_vm11 = vcmp.eq.s32.totalorder %v2727_v40, %v2804_v60  ;;  %vm6386_vm4 = vcmp.eq.s32.totalorder %v2727_v40, %v2807_v61 }
  0xc0   : > { %v3030_v0 = vsel %vm6385_vm11, %v358_v20, 0.0  ;;  %v3035_v1 = vsel %vm6386_vm4, %v358_v20, 0.0  ;;  %vm6387_vm7 = vcmp.eq.s32.totalorder %v2748_v48, %v2732_v43  ;;  %vm6388_vm3 = vcmp.eq.s32.totalorder %v2748_v48, %v2735_v44 }
  0xc1   : > { %v543_v2 = vsel %vm6387_vm7, %v348_v33, 0.0  ;;  %v650_v3 = vsel %vm6388_vm3, %v348_v33, 0.0  ;;  %vm6389_vm6 = vcmp.eq.s32.totalorder %v2748_v48, %v2738_v45  ;;  %vm6390_vm4 = vcmp.eq.s32.totalorder %v2748_v48, %v2741_v46 }
  0xc2   : > { %v757_v40 = vsel %vm6389_vm6, %v348_v33, 0.0  ;;  %v864_v4 = vsel %vm6390_vm4, %v348_v33, 0.0  ;;  %vm6391_vm7 = vcmp.eq.s32.totalorder %v2748_v48, %v2744_v47  ;;  %vm6392_vm3 = vcmp.eq.s32.totalorder %v2748_v48, %v2751_v49 }
  0xc3   : > { %v971_v5 = vsel %vm6391_vm7, %v348_v33, 0.0  ;;  %v1078_v6 = vsel %vm6392_vm3, %v348_v33, 0.0  ;;  %vm6393_vm6 = vcmp.eq.s32.totalorder %v2748_v48, %v2754_v50  ;;  %vm6394_vm4 = vcmp.eq.s32.totalorder %v2748_v48, %v2757_v51 }
  0xc4   : > { %v1185_v8 = vsel %vm6393_vm6, %v348_v33, 0.0  ;;  %v1292_v9 = vsel %vm6394_vm4, %v348_v33, 0.0  ;;  %vm6395_vm7 = vcmp.eq.s32.totalorder %v2748_v48, %v2770_v54  ;;  %vm6396_vm3 = vcmp.eq.s32.totalorder %v2748_v48, %v2773_v55 }
  0xc5   : > { %v3072_v10 = vsel %vm6395_vm7, %v348_v33, 0.0  ;;  %v3077_v11 = vsel %vm6396_vm3, %v348_v33, 0.0  ;;  %vm1796_vm8 = vcmp.eq.s32.totalorder %v2767_v53, %v2790_v58  ;;  %vm1903_vm6 = vcmp.eq.s32.totalorder %v2767_v53, %v2793_v59 }
  0xc6   : > { %vm6397_vm11 = vcmp.eq.s32.totalorder %v2748_v48, %v2776_v56  ;;  %vm6398_vm4 = vcmp.eq.s32.totalorder %v2748_v48, %v2787_v57  ;;  %v3096_v37 = vsel %vm1795_vm9, %v348_v33, 0.0  ;;  %v3101_v28 = vsel %vm1902_vm10, %v348_v33, 0.0 }
  0xc7   : > { %v3086_v20 = vsel %vm6397_vm11, %v348_v33, 0.0  ;;  %v3091_v39 = vsel %vm6398_vm4, %v348_v33, 0.0  ;;  %vm2010_vm7 = vcmp.eq.s32.totalorder %v2767_v53, %v2804_v60  ;;  %vm6399_vm3 = vcmp.eq.s32.totalorder %v2748_v48, %v2804_v60 }
  0xc8   : > { %v3110_v27 = vsel %vm6399_vm3, %v348_v33, 0.0  ;;  %vm6400_vm9 = vcmp.eq.s32.totalorder %v2748_v48, %v2807_v61  ;;  %vm6401_vm10 = vcmp.eq.s32.totalorder %v2764_v52, %v2732_v43  ;;  %vm6403_vm4 = vcmp.eq.s32.totalorder %v2764_v52, %v2735_v44 }
  0xc9   : > { %v3115_v24 = vsel %vm6400_vm9, %v348_v33, 0.0  ;;  %v3120_v23 = vsel %vm6401_vm10, %v363_v7, 0.0  ;;  %v3125_v22 = vsel %vm6403_vm4, %v363_v7, 0.0  ;;  %vm6405_vm3 = vcmp.eq.s32.totalorder %v2764_v52, %v2738_v45 }
  0xca   : > { %6402 = vst [vmem:[#allocation22_spill] sm:$0xff] %v3120_v23  ;;  %6404 = vst [vmem:[#allocation23_spill] sm:$0xff] %v3125_v22  ;;  %v3130_v19 = vsel %vm6405_vm3, %v363_v7, 0.0  ;;  %vm6407_vm9 = vcmp.eq.s32.totalorder %v2764_v52, %v2741_v46  ;;  %vm6409_vm10 = vcmp.eq.s32.totalorder %v2764_v52, %v2744_v47  ;;  %vm6411_vm4 = vcmp.eq.s32.totalorder %v2764_v52, %v2751_v49 }
  0xcb   : > { %6406 = vst [vmem:[#allocation24_spill] sm:$0xff] %v3130_v19  ;;  %v3135_v48 = vsel %vm6407_vm9, %v363_v7, 0.0  ;;  %v3140_v33 = vsel %vm6409_vm10, %v363_v7, 0.0  ;;  %v3145_v18 = vsel %vm6411_vm4, %v363_v7, 0.0  ;;  %vm6413_vm11 = vcmp.eq.s32.totalorder %v2764_v52, %v2754_v50 }
  0xcc   : > { %6408 = vst [vmem:[#allocation25_spill] sm:$0xff] %v3135_v48  ;;  %6410 = vst [vmem:[#allocation26_spill] sm:$0xff] %v3140_v33  ;;  %v3150_v17 = vsel %vm6413_vm11, %v363_v7, 0.0  ;;  %vm6415_vm3 = vcmp.eq.s32.totalorder %v2764_v52, %v2757_v51  ;;  %vm6417_vm9 = vcmp.eq.s32.totalorder %v2764_v52, %v2770_v54  ;;  %vm6419_vm10 = vcmp.eq.s32.totalorder %v2764_v52, %v2773_v55 }
  0xcd   : > { %6412 = vst [vmem:[#allocation27_spill] sm:$0xff] %v3145_v18  ;;  %6414 = vst [vmem:[#allocation28_spill] sm:$0xff] %v3150_v17  ;;  %v3155_v16 = vsel %vm6415_vm3, %v363_v7, 0.0  ;;  %v3160_v15 = vsel %vm6417_vm9, %v363_v7, 0.0  ;;  %v3165_v14 = vsel %vm6419_vm10, %v363_v7, 0.0  ;;  %v3170_v18 = vsel %vm1584_vm12, %v363_v7, 0.0 }
  0xce   : > { %6416 = vst [vmem:[#allocation29_spill] sm:$0xff] %v3155_v16  ;;  %6418 = vst [vmem:[#allocation30_spill] sm:$0xff] %v3160_v15  ;;  %v3175_v17 = vsel %vm1691_vm13, %v363_v7, 0.0  ;;  %v544_v16 = vsel %vm512_vm15, %v353_v21, 0.0  ;;  %v651_v15 = vsel %vm619_vm14, %v353_v21, 0.0  ;;  %vm6425_vm12 = vcmp.eq.s32.totalorder %v2767_v53, %v2741_v46 }
  0xcf   : > { %6420 = vst [vmem:[#allocation31_spill] sm:$0xff] %v3165_v14  ;;  %6421 = vst [vmem:[#allocation32_spill] sm:$0xff] %v3170_v18  ;;  %v3186_v14 = vsel %vm1798_vm0, %v363_v7, 0.0  ;;  %v3191_v18 = vsel %vm1905_vm1, %v363_v7, 0.0  ;;  %v865_v33 = vsel %vm6425_vm12, %v353_v21, 0.0  ;;  %vm516_vm13 = vcmp.eq.s32.totalorder %v2872_v12, %v2732_v43 }
  0xd0   : > { %6422 = vst [vmem:[#allocation33_spill] sm:$0xff] %v3175_v17  ;;  %6423 = vst [vmem:[#allocation34_spill] sm:$0xff] %v3186_v14  ;;  %v758_v17 = vsel %vm726_vm2, %v353_v21, 0.0  ;;  %vm623_vm14 = vcmp.eq.s32.totalorder %v2872_v12, %v2735_v44  ;;  %v3206_v14 = vsel %vm2012_vm5, %v363_v7, 0.0  ;;  %vm6427_vm15 = vcmp.eq.s32.totalorder %v2764_v52, %v2807_v61 }
  0xd1   : > { %6424 = vst [vmem:[#allocation35_spill] sm:$0xff] %v3191_v18  ;;  %6426 = vst [vmem:[#allocation36_spill] sm:$0xff] %v3206_v14  ;;  %v3211_v18 = vsel %vm6427_vm15, %v363_v7, 0.0  ;;  %vm6429_vm0 = vcmp.eq.s32.totalorder %v2767_v53, %v2744_v47  ;;  %vm6430_vm1 = vcmp.eq.s32.totalorder %v2767_v53, %v2751_v49  ;;  %vm730_vm2 = vcmp.eq.s32.totalorder %v2872_v12, %v2738_v45 }
  0xd2   : > { %6428 = vst [vmem:[#allocation37_spill] sm:$0xff] %v3211_v18  ;;  %v972_v48 = vsel %vm6429_vm0, %v353_v21, 0.0  ;;  %v1079_v19 = vsel %vm6430_vm1, %v353_v21, 0.0  ;;  %vm837_vm5 = vcmp.eq.s32.totalorder %v2872_v12, %v2741_v46  ;;  %v575_v14 = vadd.f32 %v544_v16, %v543_v2 }
  0xd3   : > { %v682_v22 = vadd.f32 %v651_v15, %v650_v3  ;;  %vm6431_vm11 = vcmp.eq.s32.totalorder %v2767_v53, %v2754_v50  ;;  %vm6432_vm4 = vcmp.eq.s32.totalorder %v2767_v53, %v2757_v51  ;;  %vm944_vm3 = vcmp.eq.s32.totalorder %v2872_v12, %v2744_v47 }
  0xd4   : > { %v1186_v52 = vsel %vm6431_vm11, %v353_v21, 0.0  ;;  %v1293_v7 = vsel %vm6432_vm4, %v353_v21, 0.0  ;;  %vm1051_vm9 = vcmp.eq.s32.totalorder %v2872_v12, %v2751_v49  ;;  %v789_v18 = vadd.f32 %v758_v17, %v757_v40 }
  0xd5   : > { %v896_v23 = vadd.f32 %v865_v33, %v864_v4  ;;  %vm6433_vm10 = vcmp.eq.s32.totalorder %v2767_v53, %v2770_v54  ;;  %vm6434_vm12 = vcmp.eq.s32.totalorder %v2767_v53, %v2773_v55  ;;  %vm1158_vm15 = vcmp.eq.s32.totalorder %v2872_v12, %v2754_v50 }
  0xd6   : > { %v1400_v15 = vsel %vm6433_vm10, %v353_v21, 0.0  ;;  %v1507_v16 = vsel %vm6434_vm12, %v353_v21, 0.0  ;;  %vm1372_vm1 = vcmp.eq.s32.totalorder %v2872_v12, %v2770_v54  ;;  %vm1479_vm11 = vcmp.eq.s32.totalorder %v2872_v12, %v2773_v55 }
  0xd7   : > { %v1003_v17 = vadd.f32 %v972_v48, %v971_v5  ;;  %v1110_v2 = vadd.f32 %v1079_v19, %v1078_v6  ;;  %vm6435_vm4 = vcmp.eq.s32.totalorder %v2767_v53, %v2776_v56  ;;  %vm6436_vm10 = vcmp.eq.s32.totalorder %v2767_v53, %v2787_v57 }
  0xd8   : > { %v1614_v3 = vsel %vm6435_vm4, %v353_v21, 0.0  ;;  %v1721_v40 = vsel %vm6436_vm10, %v353_v21, 0.0  ;;  %vm1586_vm12 = vcmp.eq.s32.totalorder %v2872_v12, %v2776_v56  ;;  %vm1693_vm0 = vcmp.eq.s32.totalorder %v2872_v12, %v2787_v57 }
  0xd9   : > { %v1217_v4 = vadd.f32 %v1186_v52, %v1185_v8  ;;  %v1324_v33 = vadd.f32 %v1293_v7, %v1292_v9  ;;  %v1828_v19 = vsel %vm1796_vm8, %v353_v21, 0.0  ;;  %v1935_v5 = vsel %vm1903_vm6, %v353_v21, 0.0 }
  0xda   : > { %v1431_v6 = vadd.f32 %v1400_v15, %v3072_v10  ;;  %v1538_v48 = vadd.f32 %v1507_v16, %v3077_v11  ;;  %v2042_v8 = vsel %vm2010_vm7, %v353_v21, 0.0  ;;  %vm6437_vm8 = vcmp.eq.s32.totalorder %v2767_v53, %v2807_v61  ;;  %v3391_v16 = vpop.permute.xlu0 %367 }
  0xdb   : > { %v2149_v9 = vsel %vm6437_vm8, %v353_v21, 0.0  ;;  %vm2014_vm6 = vcmp.eq.s32.totalorder %v2872_v12, %v2804_v60  ;;  %v576_v10 = vadd.f32 %v575_v14, %v2926_v25  ;;  %v683_v11 = vadd.f32 %v682_v22, %v2931_v26  ;;  %v373_v25 = vpop.permute.xlu1 %372 }
  0xdc   : > { %v1645_v52 = vadd.f32 %v1614_v3, %v3086_v20  ;;  %v1752_v7 = vadd.f32 %v1721_v40, %v3091_v39  ;;  %vm622_vm7 = vcmp.eq.s32.totalorder %v2875_v13, %v2735_v44  ;;  %vm729_vm8 = vcmp.eq.s32.totalorder %v2875_v13, %v2738_v45  ;;  %v6439_v3 = vld [vmem:[#allocation22_spill] sm:$0xff] }
  0xdd   : > { %v790_v53 = vadd.f32 %v789_v18, %v2950_v29  ;;  %v897_v21 = vadd.f32 %v896_v23, %v2955_v30  ;;  %v1859_v14 = vadd.f32 %v1828_v19, %v3096_v37  ;;  %v1966_v22 = vadd.f32 %v1935_v5, %v3101_v28 }
  0xde   : > { %v1004_v39 = vadd.f32 %v1003_v17, %v2960_v31  ;;  %v1111_v26 = vadd.f32 %v1110_v2, %v2965_v32  ;;  %v2073_v20 = vadd.f32 %v2042_v8, %v3110_v27  ;;  %v2180_v15 = vadd.f32 %v2149_v9, %v3115_v24  ;;  %v6444_v8 = vld [vmem:[#allocation25_spill] sm:$0xff] }
  0xdf   : > { %v1218_v18 = vadd.f32 %v1217_v4, %v2978_v34  ;;  %v3305_v37 = vadd.f32 %v1324_v33, %v2983_v35  ;;  %v3308_v23 = vadd.f32 %v1431_v6, %v2988_v36  ;;  %v3311_v28 = vadd.f32 %v1538_v48, %v2993_v38  ;;  %v6440_v4 = vld [vmem:[#allocation23_spill] sm:$0xff]  ;;  %v6443_v6 = vld [vmem:[#allocation24_spill] sm:$0xff] }
  0xe0   : > { %v3316_v27 = vadd.f32 %v1645_v52, %v3006_v41  ;;  %v3319_v24 = vadd.f32 %v1752_v7, %v3011_v42  ;;  %v3324_v29 = vsel %vm516_vm13, %v373_v25, 0.0  ;;  %v3329_v30 = vsel %vm623_vm14, %v373_v25, 0.0  ;;  %v6447_v7 = vld [vmem:[#allocation26_spill] sm:$0xff] }
  0xe1   : > { %vm1264_vm4 = vcmp.eq.s32.totalorder %v2875_v13, %v2757_v51  ;;  %vm1371_vm10 = vcmp.eq.s32.totalorder %v2875_v13, %v2770_v54  ;;  %v3336_v31 = vadd.f32 %v1859_v14, %v3016_v62  ;;  %v3339_v32 = vadd.f32 %v1966_v22, %v3021_v63 }
  0xe2   : > { %v3344_v34 = vsel %vm730_vm2, %v373_v25, 0.0  ;;  %v3349_v35 = vsel %vm837_vm5, %v373_v25, 0.0  ;;  %v3352_v36 = vadd.f32 %v2073_v20, %v3030_v0  ;;  %v3355_v38 = vadd.f32 %v2180_v15, %v3035_v1 }
  0xe3   : > { %v3360_v41 = vsel %vm944_vm3, %v373_v25, 0.0  ;;  %v3365_v42 = vsel %vm1051_vm9, %v373_v25, 0.0  ;;  %vm1478_vm13 = vcmp.eq.s32.totalorder %v2875_v13, %v2773_v55  ;;  %vm1585_vm14 = vcmp.eq.s32.totalorder %v2875_v13, %v2776_v56 }
  0xe4   : > { %v3374_v62 = vsel %vm1158_vm15, %v373_v25, 0.0  ;;  %vm6438_vm2 = vcmp.eq.s32.totalorder %v2872_v12, %v2757_v51  ;;  %v3384_v0 = vsel %vm1372_vm1, %v373_v25, 0.0  ;;  %v3389_v1 = vsel %vm1479_vm11, %v373_v25, 0.0 }
  0xe5   : > { %v3379_v63 = vsel %vm6438_vm2, %v373_v25, 0.0  ;;  %vm1692_vm5 = vcmp.eq.s32.totalorder %v2875_v13, %v2787_v57  ;;  %v3398_v17 = vsel %vm1586_vm12, %v373_v25, 0.0  ;;  %v3403_v2 = vsel %vm1693_vm0, %v373_v25, 0.0 }
  0xe6   : > { %v577_v40 = vadd.f32 %v576_v10, %v6439_v3  ;;  %v684_v33 = vadd.f32 %v683_v11, %v6440_v4  ;;  %vm1799_vm3 = vcmp.eq.s32.totalorder %v2875_v13, %v2790_v58  ;;  %vm1906_vm9 = vcmp.eq.s32.totalorder %v2875_v13, %v2793_v59  ;;  %v6452_v4 = vld [vmem:[#allocation28_spill] sm:$0xff] }
  0xe7   : > { %vm2013_vm15 = vcmp.eq.s32.totalorder %v2875_v13, %v2804_v60  ;;  %vm6441_vm1 = vcmp.eq.s32.totalorder %v2872_v12, %v2790_v58  ;;  %vm6442_vm0 = vcmp.eq.s32.totalorder %v2872_v12, %v2793_v59  ;;  %v791_v48 = vadd.f32 %v790_v53, %v6443_v6  ;;  %v6454_v6 = vld [vmem:[#allocation29_spill] sm:$0xff] }
  0xe8   : > { %v3416_v19 = vsel %vm6441_vm1, %v373_v25, 0.0  ;;  %v3421_v5 = vsel %vm6442_vm0, %v373_v25, 0.0  ;;  %v898_v9 = vadd.f32 %v897_v21, %v6444_v8  ;;  %vm2120_vm11 = vcmp.eq.s32.totalorder %v2875_v13, %v2807_v61  ;;  %v6448_v21 = vld [vmem:[#allocation10_spill] sm:$0xff] }
  0xe9   : > { %v3430_v10 = vsel %vm2014_vm6, %v373_v25, 0.0  ;;  %vm6445_vm12 = vcmp.eq.s32.totalorder %v2872_v12, %v2807_v61  ;;  %vm6446_vm2 = vcmp.eq.s32.totalorder %v2875_v13, %v2732_v43  ;;  %v1005_v53 = vadd.f32 %v1004_v39, %v6447_v7 }
  0xea   : > { %v3435_v11 = vsel %vm6445_vm12, %v373_v25, 0.0  ;;  %v547_v52 = vsel %vm6446_vm2, %v3391_v16, 0.0  ;;  %vm518_vm1 = vcmp.eq.s32.totalorder %v6448_v21, %v2732_v43  ;;  %vm625_vm0 = vcmp.eq.s32.totalorder %v6448_v21, %v2735_v44  ;;  %v6450_v25 = vld [vmem:[#allocation27_spill] sm:$0xff] }
  0xeb   : > { %v654_v12 = vsel %vm622_vm7, %v3391_v16, 0.0  ;;  %v761_v14 = vsel %vm729_vm8, %v3391_v16, 0.0  ;;  %vm6449_vm12 = vcmp.eq.s32.totalorder %v2875_v13, %v2741_v46  ;;  %v1112_v39 = vadd.f32 %v1111_v26, %v6450_v25  ;;  %v6459_v25 = vld [vmem:[#allocation11_spill] sm:$0xff] }
  0xec   : > { %v868_v22 = vsel %vm6449_vm12, %v3391_v16, 0.0  ;;  %v3467_v20 = vadd.f32 %v577_v40, %v547_v52  ;;  %v3469_v15 = vadd.f32 %v684_v33, %v654_v12  ;;  %vm6451_vm8 = vcmp.eq.s32.totalorder %v2875_v13, %v2744_v47  ;;  %v6457_v12 = vld [vmem:[#allocation31_spill] sm:$0xff] }
  0xed   : > { %v975_v3 = vsel %vm6451_vm8, %v3391_v16, 0.0  ;;  %v1219_v26 = vadd.f32 %v1218_v18, %v6452_v4  ;;  %vm1160_vm12 = vcmp.eq.s32.totalorder %v6448_v21, %v2754_v50  ;;  %v3484_v40 = vadd.f32 %v791_v48, %v761_v14 }
  0xee   : > { %v3486_v33 = vadd.f32 %v898_v9, %v868_v22  ;;  %vm6453_vm8 = vcmp.eq.s32.totalorder %v2875_v13, %v2751_v49  ;;  %v1326_v8 = vadd.f32 %v3305_v37, %v6454_v6  ;;  %vm1695_vm7 = vcmp.eq.s32.totalorder %v6448_v21, %v2787_v57  ;;  %v6456_v9 = vld [vmem:[#allocation30_spill] sm:$0xff]  ;;  %v6458_v22 = vld [vmem:[#allocation32_spill] sm:$0xff] }
  0xef   : > { %v1082_v18 = vsel %vm6453_vm8, %v3391_v16, 0.0  ;;  %v3498_v52 = vadd.f32 %v1005_v53, %v975_v3  ;;  %vm6455_vm2 = vcmp.eq.s32.totalorder %v2875_v13, %v2754_v50  ;;  %v1433_v7 = vadd.f32 %v3308_v23, %v6456_v9  ;;  %v6460_v3 = vld [vmem:[#allocation33_spill] sm:$0xff]  ;;  %v6462_v9 = vld [vmem:[#allocation35_spill] sm:$0xff] }
  0xf0   : > { %v1189_v48 = vsel %vm6455_vm2, %v3391_v16, 0.0  ;;  %v1540_v14 = vadd.f32 %v3311_v28, %v6457_v12  ;;  %v3512_v37 = vadd.f32 %v1112_v39, %v1082_v18  ;;  %v1296_v53 = vsel %vm1264_vm4, %v3391_v16, 0.0  ;;  %v6461_v18 = vld [vmem:[#allocation34_spill] sm:$0xff] }
  0xf1   : > { %v1403_v23 = vsel %vm1371_vm10, %v3391_v16, 0.0  ;;  %v1647_v28 = vadd.f32 %v3316_v27, %v6458_v22  ;;  %vm2016_vm2 = vcmp.eq.s32.totalorder %v6448_v21, %v2804_v60  ;;  %vm2123_vm6 = vcmp.eq.s32.totalorder %v6448_v21, %v2807_v61  ;;  %v6464_v22 = vld [vmem:[#allocation37_spill] sm:$0xff] }
  0xf2   : > { %v3530_v39 = vadd.f32 %v1219_v26, %v1189_v48  ;;  %v1754_v4 = vadd.f32 %v3319_v24, %v6460_v3  ;;  %v1861_v6 = vadd.f32 %v3336_v31, %v6461_v18  ;;  %v1968_v27 = vadd.f32 %v3339_v32, %v6462_v9  ;;  %v6463_v32 = vld [vmem:[#allocation36_spill] sm:$0xff]  ;;  %v383_v18 = vpop.permute.xlu1 %382 }
  0xf3   : > { %vm624_vm4 = vcmp.eq.s32.totalorder %v6459_v25, %v2735_v44  ;;  %vm838_vm8 = vcmp.eq.s32.totalorder %v6459_v25, %v2741_v46  ;;  %v3544_v26 = vadd.f32 %v1326_v8, %v1296_v53  ;;  %v1510_v24 = vsel %vm1478_vm13, %v3391_v16, 0.0 }
  0xf4   : > { %v1617_v31 = vsel %vm1585_vm14, %v3391_v16, 0.0  ;;  %v2075_v48 = vadd.f32 %v3352_v36, %v6463_v32  ;;  %vm945_vm10 = vcmp.eq.s32.totalorder %v6459_v25, %v2744_v47  ;;  %v3558_v12 = vadd.f32 %v1433_v7, %v1403_v23 }
  0xf5   : > { %v3560_v8 = vadd.f32 %v1540_v14, %v1510_v24  ;;  %v1724_v53 = vsel %vm1692_vm5, %v3391_v16, 0.0  ;;  %v2182_v3 = vadd.f32 %v3355_v38, %v6464_v22  ;;  %vm1052_vm13 = vcmp.eq.s32.totalorder %v6459_v25, %v2751_v49 }
  0xf6   : > { %v3570_v36 = vadd.f32 %v1647_v28, %v1617_v31  ;;  %v1831_v7 = vsel %vm1799_vm3, %v3391_v16, 0.0  ;;  %v1938_v14 = vsel %vm1906_vm9, %v3391_v16, 0.0  ;;  %v2045_v38 = vsel %vm2013_vm15, %v3391_v16, 0.0 }
  0xf7   : > { %vm1159_vm14 = vcmp.eq.s32.totalorder %v6459_v25, %v2754_v50  ;;  %v3586_v23 = vadd.f32 %v1754_v4, %v1724_v53  ;;  %v3588_v28 = vadd.f32 %v1861_v6, %v1831_v7  ;;  %v3590_v9 = vadd.f32 %v1968_v27, %v1938_v14  ;;  %v3658_v14 = vpop.permute.xlu0 %377 }
  0xf8   : > { %v2152_v24 = vsel %vm2120_vm11, %v3391_v16, 0.0  ;;  %vm1266_vm5 = vcmp.eq.s32.totalorder %v6459_v25, %v2757_v51  ;;  %vm1373_vm3 = vcmp.eq.s32.totalorder %v6459_v25, %v2770_v54  ;;  %v3600_v31 = vadd.f32 %v2075_v48, %v2045_v38 }
  0xf9   : > { %v3605_v4 = vsel %vm518_vm1, %v383_v18, 0.0  ;;  %v3610_v6 = vsel %vm625_vm0, %v383_v18, 0.0  ;;  %vm6465_vm9 = vcmp.eq.s32.totalorder %v6448_v21, %v2738_v45  ;;  %v3617_v16 = vadd.f32 %v2182_v3, %v2152_v24 }
  0xfa   : > { %v3615_v13 = vsel %vm6465_vm9, %v383_v18, 0.0  ;;  %vm6466_vm15 = vcmp.eq.s32.totalorder %v6448_v21, %v2741_v46  ;;  %vm6467_vm11 = vcmp.eq.s32.totalorder %v6448_v21, %v2744_v47  ;;  %vm6468_vm1 = vcmp.eq.s32.totalorder %v6448_v21, %v2751_v49 }
  0xfb   : > { %v3622_v27 = vsel %vm6466_vm15, %v383_v18, 0.0  ;;  %v3627_v32 = vsel %vm6467_vm11, %v383_v18, 0.0  ;;  %v3632_v48 = vsel %vm6468_vm1, %v383_v18, 0.0  ;;  %vm1480_vm0 = vcmp.eq.s32.totalorder %v6459_v25, %v2773_v55 }
  0xfc   : > { %v3641_v53 = vsel %vm1160_vm12, %v383_v18, 0.0  ;;  %vm6469_vm15 = vcmp.eq.s32.totalorder %v6448_v21, %v2757_v51  ;;  %vm6470_vm11 = vcmp.eq.s32.totalorder %v6448_v21, %v2770_v54  ;;  %vm6472_vm1 = vcmp.eq.s32.totalorder %v6448_v21, %v2773_v55 }
  0xfd   : > { %v3646_v22 = vsel %vm6469_vm15, %v383_v18, 0.0  ;;  %v3651_v3 = vsel %vm6470_vm11, %v383_v18, 0.0  ;;  %v3656_v7 = vsel %vm6472_vm1, %v383_v18, 0.0  ;;  %vm1694_vm12 = vcmp.eq.s32.totalorder %v6459_v25, %v2787_v57 }
  0xfe   : > { %6471 = vst [vmem:[#allocation22_spill] sm:$0xff] %v3651_v3  ;;  %6473 = vst [vmem:[#allocation23_spill] sm:$0xff] %v3656_v7  ;;  %vm6474_vm9 = vcmp.eq.s32.totalorder %v6448_v21, %v2776_v56  ;;  %v3670_v24 = vsel %vm1695_vm7, %v383_v18, 0.0  ;;  %v579_v3 = vadd.f32 %v3467_v20, %v3324_v29  ;;  %v686_v7 = vadd.f32 %v3469_v15, %v3329_v30 }
  0xff   : > { %v3665_v38 = vsel %vm6474_vm9, %v383_v18, 0.0  ;;  %vm1801_vm15 = vcmp.eq.s32.totalorder %v6459_v25, %v2790_v58  ;;  %vm2015_vm9 = vcmp.eq.s32.totalorder %v6459_v25, %v2804_v60  ;;  %vm6476_vm1 = vcmp.eq.s32.totalorder %v6448_v21, %v2790_v58 }
 0x100   : > { %6475 = vst [vmem:[#allocation24_spill] sm:$0xff] %v3665_v38  ;;  %v3685_v38 = vsel %vm6476_vm1, %v383_v18, 0.0  ;;  %vm6478_vm7 = vcmp.eq.s32.totalorder %v6448_v21, %v2793_v59  ;;  %v793_v30 = vadd.f32 %v3484_v40, %v3344_v34  ;;  %v900_v20 = vadd.f32 %v3486_v33, %v3349_v35  ;;  %v6482_v40 = vld [vmem:[#allocation12_spill] sm:$0xff] }
 0x101   : > { %6477 = vst [vmem:[#allocation25_spill] sm:$0xff] %v3685_v38  ;;  %v3690_v29 = vsel %vm6478_vm7, %v383_v18, 0.0  ;;  %v3701_v15 = vsel %vm2016_vm2, %v383_v18, 0.0  ;;  %v3706_v38 = vsel %vm2123_vm6, %v383_v18, 0.0  ;;  %vm6481_vm1 = vcmp.eq.s32.totalorder %v6459_v25, %v2732_v43 }
 0x102   : > { %6479 = vst [vmem:[#allocation26_spill] sm:$0xff] %v3701_v15  ;;  %6480 = vst [vmem:[#allocation10_spill] sm:$0xff] %v3706_v38  ;;  %v549_v34 = vsel %vm6481_vm1, %v3658_v14, 0.0  ;;  %v1007_v35 = vadd.f32 %v3498_v52, %v3360_v41  ;;  %vm520_vm7 = vcmp.eq.s32.totalorder %v6482_v40, %v2732_v43  ;;  %vm627_vm2 = vcmp.eq.s32.totalorder %v6482_v40, %v2735_v44 }
 0x103   : > { %v656_v21 = vsel %vm624_vm4, %v3658_v14, 0.0  ;;  %vm6483_vm6 = vcmp.eq.s32.totalorder %v6459_v25, %v2738_v45  ;;  %v870_v41 = vsel %vm838_vm8, %v3658_v14, 0.0  ;;  %v1114_v52 = vadd.f32 %v3512_v37, %v3365_v42 }
 0x104   : > { %v763_v33 = vsel %vm6483_vm6, %v3658_v14, 0.0  ;;  %vm841_vm1 = vcmp.eq.s32.totalorder %v6482_v40, %v2741_v46  ;;  %v3740_v18 = vadd.f32 %v579_v3, %v549_v34  ;;  %v3742_v38 = vadd.f32 %v686_v7, %v656_v21 }
 0x105   : > { %v977_v15 = vsel %vm945_vm10, %v3658_v14, 0.0  ;;  %v1221_v42 = vadd.f32 %v3530_v39, %v3374_v62  ;;  %vm1162_vm8 = vcmp.eq.s32.totalorder %v6482_v40, %v2754_v50  ;;  %vm1269_vm6 = vcmp.eq.s32.totalorder %v6482_v40, %v2757_v51 }
 0x106   : > { %vm1483_vm11 = vcmp.eq.s32.totalorder %v6482_v40, %v2773_v55  ;;  %v3758_v37 = vadd.f32 %v793_v30, %v763_v33  ;;  %v3760_v3 = vadd.f32 %v900_v20, %v870_v41  ;;  %v1084_v62 = vsel %vm1052_vm13, %v3658_v14, 0.0  ;;  %v393_v33 = vpop.permute.xlu1 %392 }
 0x107   : > { %v1328_v39 = vadd.f32 %v3544_v26, %v3379_v63  ;;  %vm1697_vm4 = vcmp.eq.s32.totalorder %v6482_v40, %v2787_v57  ;;  %v3772_v7 = vadd.f32 %v1007_v35, %v977_v15  ;;  %v1191_v30 = vsel %vm1159_vm14, %v3658_v14, 0.0 }
 0x108   : > { %v1435_v20 = vadd.f32 %v3558_v12, %v3384_v0  ;;  %v1542_v34 = vadd.f32 %v3560_v8, %v3389_v1  ;;  %v3786_v63 = vadd.f32 %v1114_v52, %v1084_v62  ;;  %v1298_v26 = vsel %vm1266_vm5, %v3658_v14, 0.0  ;;  %v6484_v12 = vld [vmem:[#allocation13_spill] sm:$0xff] }
 0x109   : > { %v1405_v0 = vsel %vm1373_vm3, %v3658_v14, 0.0  ;;  %v1649_v1 = vadd.f32 %v3570_v36, %v3398_v17  ;;  %vm2018_vm14 = vcmp.eq.s32.totalorder %v6482_v40, %v2804_v60  ;;  %v3804_v8 = vadd.f32 %v1221_v42, %v1191_v30 }
 0x10a   : > { %v1756_v15 = vadd.f32 %v3586_v23, %v3403_v2  ;;  %v1863_v35 = vadd.f32 %v3588_v28, %v3416_v19  ;;  %v1970_v17 = vadd.f32 %v3590_v9, %v3421_v5  ;;  %vm626_vm5 = vcmp.eq.s32.totalorder %v6484_v12, %v2735_v44 }
 0x10b   : > { %vm840_vm13 = vcmp.eq.s32.totalorder %v6484_v12, %v2741_v46  ;;  %v3818_v36 = vadd.f32 %v1328_v39, %v1298_v26  ;;  %v1512_v2 = vsel %vm1480_vm0, %v3658_v14, 0.0  ;;  %vm6485_vm10 = vcmp.eq.s32.totalorder %v6459_v25, %v2776_v56 }
 0x10c   : > { %v1619_v19 = vsel %vm6485_vm10, %v3658_v14, 0.0  ;;  %v2077_v5 = vadd.f32 %v3600_v31, %v3430_v10  ;;  %vm947_vm3 = vcmp.eq.s32.totalorder %v6484_v12, %v2744_v47  ;;  %v3832_v23 = vadd.f32 %v1435_v20, %v1405_v0 }
 0x10d   : > { %v3834_v28 = vadd.f32 %v1542_v34, %v1512_v2  ;;  %v1726_v9 = vsel %vm1694_vm12, %v3658_v14, 0.0  ;;  %v2184_v21 = vadd.f32 %v3617_v16, %v3435_v11  ;;  %vm1054_vm0 = vcmp.eq.s32.totalorder %v6484_v12, %v2751_v49  ;;  %v3932_v2 = vpop.permute.xlu0 %387 }
 0x10e   : > { %v3844_v10 = vadd.f32 %v1649_v1, %v1619_v19  ;;  %v1833_v31 = vsel %vm1801_vm15, %v3658_v14, 0.0  ;;  %vm6486_vm10 = vcmp.eq.s32.totalorder %v6459_v25, %v2793_v59  ;;  %v2047_v11 = vsel %vm2015_vm9, %v3658_v14, 0.0 }
 0x10f   : > { %v1940_v41 = vsel %vm6486_vm10, %v3658_v14, 0.0  ;;  %vm1161_vm12 = vcmp.eq.s32.totalorder %v6484_v12, %v2754_v50  ;;  %v3860_v16 = vadd.f32 %v1756_v15, %v1726_v9  ;;  %v3862_v52 = vadd.f32 %v1863_v35, %v1833_v31 }
 0x110   : > { %v3864_v42 = vadd.f32 %v1970_v17, %v1940_v41  ;;  %vm6487_vm15 = vcmp.eq.s32.totalorder %v6459_v25, %v2807_v61  ;;  %vm1268_vm10 = vcmp.eq.s32.totalorder %v6484_v12, %v2757_v51  ;;  %v3874_v39 = vadd.f32 %v2077_v5, %v2047_v11 }
 0x111   : > { %v2154_v62 = vsel %vm6487_vm15, %v3658_v14, 0.0  ;;  %v3879_v30 = vsel %vm520_vm7, %v393_v33, 0.0  ;;  %v3884_v20 = vsel %vm627_vm2, %v393_v33, 0.0  ;;  %vm6488_vm15 = vcmp.eq.s32.totalorder %v6482_v40, %v2738_v45 }
 0x112   : > { %v3889_v25 = vsel %vm6488_vm15, %v393_v33, 0.0  ;;  %v3891_v14 = vadd.f32 %v2184_v21, %v2154_v62  ;;  %v3896_v34 = vsel %vm841_vm1, %v393_v33, 0.0  ;;  %vm6489_vm7 = vcmp.eq.s32.totalorder %v6482_v40, %v2744_v47 }
 0x113   : > { %v3901_v26 = vsel %vm6489_vm7, %v393_v33, 0.0  ;;  %vm6490_vm2 = vcmp.eq.s32.totalorder %v6482_v40, %v2751_v49  ;;  %vm1482_vm15 = vcmp.eq.s32.totalorder %v6484_v12, %v2773_v55  ;;  %vm1589_vm9 = vcmp.eq.s32.totalorder %v6484_v12, %v2776_v56 }
 0x114   : > { %v3906_v0 = vsel %vm6490_vm2, %v393_v33, 0.0  ;;  %v3915_v1 = vsel %vm1162_vm8, %v393_v33, 0.0  ;;  %v3920_v15 = vsel %vm1269_vm6, %v393_v33, 0.0  ;;  %vm6491_vm1 = vcmp.eq.s32.totalorder %v6482_v40, %v2770_v54 }
 0x115   : > { %v3925_v35 = vsel %vm6491_vm1, %v393_v33, 0.0  ;;  %v3930_v17 = vsel %vm1483_vm11, %v393_v33, 0.0  ;;  %vm1696_vm8 = vcmp.eq.s32.totalorder %v6484_v12, %v2787_v57  ;;  %vm6492_vm7 = vcmp.eq.s32.totalorder %v6482_v40, %v2776_v56 }
 0x116   : > { %v3939_v19 = vsel %vm6492_vm7, %v393_v33, 0.0  ;;  %v3944_v5 = vsel %vm1697_vm4, %v393_v33, 0.0  ;;  %v581_v9 = vadd.f32 %v3740_v18, %v3605_v4  ;;  %v688_v21 = vadd.f32 %v3742_v38, %v3610_v6 }
 0x117   : > { %vm1803_vm11 = vcmp.eq.s32.totalorder %v6484_v12, %v2790_v58  ;;  %vm1910_vm6 = vcmp.eq.s32.totalorder %v6484_v12, %v2793_v59  ;;  %vm6493_vm1 = vcmp.eq.s32.totalorder %v6482_v40, %v2790_v58  ;;  %vm6494_vm4 = vcmp.eq.s32.totalorder %v6482_v40, %v2793_v59 }
 0x118   : > { %v3959_v31 = vsel %vm6493_vm1, %v393_v33, 0.0  ;;  %v3964_v4 = vsel %vm6494_vm4, %v393_v33, 0.0  ;;  %v795_v6 = vadd.f32 %v3758_v37, %v3615_v13  ;;  %v902_v38 = vadd.f32 %v3760_v3, %v3622_v27  ;;  %v6497_v37 = vld [vmem:[#allocation14_spill] sm:$0xff] }
 0x119   : > { %v3975_v18 = vsel %vm2018_vm14, %v393_v33, 0.0  ;;  %vm6495_vm1 = vcmp.eq.s32.totalorder %v6482_v40, %v2807_v61  ;;  %vm6496_vm4 = vcmp.eq.s32.totalorder %v6484_v12, %v2732_v43  ;;  %v1009_v27 = vadd.f32 %v3772_v7, %v3627_v32 }
 0x11a   : > { %v3980_v41 = vsel %vm6495_vm1, %v393_v33, 0.0  ;;  %v551_v13 = vsel %vm6496_vm4, %v3932_v2, 0.0  ;;  %vm522_vm7 = vcmp.eq.s32.totalorder %v6497_v37, %v2732_v43  ;;  %vm629_vm14 = vcmp.eq.s32.totalorder %v6497_v37, %v2735_v44 }
 0x11b   : > { %v658_v40 = vsel %vm626_vm5, %v3932_v2, 0.0  ;;  %vm6498_vm1 = vcmp.eq.s32.totalorder %v6484_v12, %v2738_v45  ;;  %v872_v32 = vsel %vm840_vm13, %v3932_v2, 0.0  ;;  %v1116_v7 = vadd.f32 %v3786_v63, %v3632_v48 }
 0x11c   : > { %v765_v3 = vsel %vm6498_vm1, %v3932_v2, 0.0  ;;  %vm843_vm4 = vcmp.eq.s32.totalorder %v6497_v37, %v2741_v46  ;;  %v4014_v33 = vadd.f32 %v581_v9, %v551_v13  ;;  %v4016_v11 = vadd.f32 %v688_v21, %v658_v40  ;;  %v6500_v40 = vld [vmem:[#allocation23_spill] sm:$0xff] }
 0x11d   : > { %v979_v62 = vsel %vm947_vm3, %v3932_v2, 0.0  ;;  %v1223_v48 = vadd.f32 %v3804_v8, %v3641_v53  ;;  %vm1164_vm13 = vcmp.eq.s32.totalorder %v6497_v37, %v2754_v50  ;;  %vm1271_vm1 = vcmp.eq.s32.totalorder %v6497_v37, %v2757_v51  ;;  %v4224_v50 = vld [vmem:[%s2684_s29 + $0xb] ss:$0 sm:$0xff] }
 0x11e   : > { %vm1485_vm2 = vcmp.eq.s32.totalorder %v6497_v37, %v2773_v55  ;;  %v4032_v63 = vadd.f32 %v795_v6, %v765_v3  ;;  %v4034_v9 = vadd.f32 %v902_v38, %v872_v32  ;;  %v1086_v53 = vsel %vm1054_vm0, %v3932_v2, 0.0  ;;  %v6499_v38 = vld [vmem:[#allocation22_spill] sm:$0xff]  ;;  %v6503_v32 = vld [vmem:[#allocation15_spill] sm:$0xff] }
 0x11f   : > { %v1330_v8 = vadd.f32 %v3818_v36, %v3646_v22  ;;  %v4046_v21 = vadd.f32 %v1009_v27, %v979_v62  ;;  %v1193_v6 = vsel %vm1161_vm12, %v3932_v2, 0.0  ;;  %v1437_v13 = vadd.f32 %v3832_v23, %v6499_v38  ;;  %v6502_v27 = vld [vmem:[#allocation24_spill] sm:$0xff] }
 0x120   : > { %v1544_v3 = vadd.f32 %v3834_v28, %v6500_v40  ;;  %v4060_v22 = vadd.f32 %v1116_v7, %v1086_v53  ;;  %v1300_v36 = vsel %vm1268_vm10, %v3932_v2, 0.0  ;;  %vm6501_vm12 = vcmp.eq.s32.totalorder %v6484_v12, %v2770_v54  ;;  %v6504_v53 = vld [vmem:[#allocation25_spill] sm:$0xff]  ;;  %v6506_v40 = vld [vmem:[#allocation10_spill] sm:$0xff] }
 0x121   : > { %v1407_v23 = vsel %vm6501_vm12, %v3932_v2, 0.0  ;;  %v1651_v28 = vadd.f32 %v3844_v10, %v6502_v27  ;;  %vm2020_vm0 = vcmp.eq.s32.totalorder %v6497_v37, %v2804_v60  ;;  %vm2127_vm3 = vcmp.eq.s32.totalorder %v6497_v37, %v2807_v61  ;;  %v403_v27 = vpop.permute.xlu1 %402 }
 0x122   : > { %v4078_v7 = vadd.f32 %v1223_v48, %v1193_v6  ;;  %v1758_v62 = vadd.f32 %v3860_v16, %v3670_v24  ;;  %v1865_v38 = vadd.f32 %v3862_v52, %v6504_v53  ;;  %v1972_v10 = vadd.f32 %v3864_v42, %v3690_v29  ;;  %v6505_v16 = vld [vmem:[#allocation26_spill] sm:$0xff] }
 0x123   : > { %vm628_vm10 = vcmp.eq.s32.totalorder %v6503_v32, %v2735_v44  ;;  %vm842_vm5 = vcmp.eq.s32.totalorder %v6503_v32, %v2741_v46  ;;  %v4092_v48 = vadd.f32 %v1330_v8, %v1300_v36  ;;  %v1514_v24 = vsel %vm1482_vm15, %v3932_v2, 0.0  ;;  %v4327_v44 = vld [vmem:[%s2684_s29 + $0x4] ss:$0 sm:$0xff] }
 0x124   : > { %v1621_v29 = vsel %vm1589_vm9, %v3932_v2, 0.0  ;;  %v2079_v52 = vadd.f32 %v3874_v39, %v6505_v16  ;;  %vm949_vm12 = vcmp.eq.s32.totalorder %v6503_v32, %v2744_v47  ;;  %v4106_v42 = vadd.f32 %v1437_v13, %v1407_v23  ;;  %v4133_v23 = vld [vmem:[%s2684_s29 + $0x6] ss:$0 sm:$0xff]  ;;  %v4148_v16 = vld [vmem:[%s2684_s29 + $0x7] ss:$0 sm:$0xff] }
 0x125   : > { %v4108_v8 = vadd.f32 %v1544_v3, %v1514_v24  ;;  %v1728_v6 = vsel %vm1696_vm8, %v3932_v2, 0.0  ;;  %v2186_v36 = vadd.f32 %v3891_v14, %v6506_v40  ;;  %vm1056_vm9 = vcmp.eq.s32.totalorder %v6503_v32, %v2751_v49  ;;  %v4153_v40 = vld [vmem:[%s2684_s29 + $0x8] ss:$0 sm:$0xff] }
 0x126   : > { %v4118_v39 = vadd.f32 %v1651_v28, %v1621_v29  ;;  %v1835_v13 = vsel %vm1803_vm11, %v3932_v2, 0.0  ;;  %v1942_v3 = vsel %vm1910_vm6, %v3932_v2, 0.0  ;;  %vm6507_vm15 = vcmp.eq.s32.totalorder %v6484_v12, %v2804_v60  ;;  %v6525_v60 = vld [vmem:[#allocation16_spill] sm:$0xff] }
 0x127   : > { %v2049_v14 = vsel %vm6507_vm15, %v3932_v2, 0.0  ;;  %vm1163_vm8 = vcmp.eq.s32.totalorder %v6503_v32, %v4133_v23  ;;  %v4137_v28 = vadd.f32 %v1758_v62, %v1728_v6  ;;  %v4139_v53 = vadd.f32 %v1865_v38, %v1835_v13 }
 0x128   : > { %v4141_v24 = vadd.f32 %v1972_v10, %v1942_v3  ;;  %vm6508_vm11 = vcmp.eq.s32.totalorder %v6484_v12, %v2807_v61  ;;  %vm1270_vm6 = vcmp.eq.s32.totalorder %v6503_v32, %v4148_v16  ;;  %vm1377_vm15 = vcmp.eq.s32.totalorder %v6503_v32, %v4153_v40  ;;  %v4192_v3 = vld [vmem:[%s2684_s29 + $0x9] ss:$0 sm:$0xff]  ;;  %v4303_v61 = vld [vmem:[%s2684_s29 + $0x2] ss:$0 sm:$0xff] }
 0x129   : > { %v2156_v29 = vsel %vm6508_vm11, %v3932_v2, 0.0  ;;  %v4157_v62 = vadd.f32 %v2079_v52, %v2049_v14  ;;  %v4162_v38 = vsel %vm522_vm7, %v403_v27, 0.0  ;;  %v4167_v12 = vsel %vm629_vm14, %v403_v27, 0.0 }
 0x12a   : > { %vm6509_vm11 = vcmp.eq.s32.totalorder %v6497_v37, %v2738_v45  ;;  %v4174_v10 = vadd.f32 %v2186_v36, %v2156_v29  ;;  %v4179_v52 = vsel %vm843_vm4, %v403_v27, 0.0  ;;  %vm6511_vm7 = vcmp.eq.s32.totalorder %v6497_v37, %v2744_v47  ;;  %v4197_v36 = vld [vmem:[%s2684_s29 + $0xa] ss:$0 sm:$0xff] }
 0x12b   : > { %v4172_v2 = vsel %vm6509_vm11, %v403_v27, 0.0  ;;  %6510 = vst [vmem:[#allocation27_spill] sm:$0xff] %v4179_v52  ;;  %v4184_v6 = vsel %vm6511_vm7, %v403_v27, 0.0  ;;  %vm6513_vm14 = vcmp.eq.s32.totalorder %v6497_v37, %v2751_v49  ;;  %vm1484_vm11 = vcmp.eq.s32.totalorder %v6503_v32, %v4192_v3  ;;  %v4221_v52 = vpop.permute.xlu0 %397 }
 0x12c   : > { %6512 = vst [vmem:[#allocation28_spill] sm:$0xff] %v4184_v6  ;;  %v4189_v13 = vsel %vm6513_vm14, %v403_v27, 0.0  ;;  %vm1591_vm4 = vcmp.eq.s32.totalorder %v6503_v32, %v4197_v36  ;;  %v4204_v14 = vsel %vm1164_vm13, %v403_v27, 0.0  ;;  %v4209_v29 = vsel %vm1271_vm1, %v403_v27, 0.0 }
 0x12d   : > { %6514 = vst [vmem:[#allocation29_spill] sm:$0xff] %v4189_v13  ;;  %vm6515_vm7 = vcmp.eq.s32.totalorder %v6497_v37, %v2770_v54  ;;  %v4219_v6 = vsel %vm1485_vm2, %v403_v27, 0.0  ;;  %vm1698_vm13 = vcmp.eq.s32.totalorder %v6503_v32, %v4224_v50  ;;  %vm6518_vm1 = vcmp.eq.s32.totalorder %v6497_v37, %v2776_v56  ;;  %v4248_v56 = vld [vmem:[%s2684_s29 + $0xd] ss:$0 sm:$0xff] }
 0x12e   : > { %v4214_v13 = vsel %vm6515_vm7, %v403_v27, 0.0  ;;  %6517 = vst [vmem:[#allocation31_spill] sm:$0xff] %v4219_v6  ;;  %v4231_v51 = vsel %vm6518_vm1, %v403_v27, 0.0  ;;  %vm6519_vm14 = vcmp.eq.s32.totalorder %v6497_v37, %v2787_v57  ;;  %v583_v55 = vadd.f32 %v4014_v33, %v3879_v30  ;;  %v4253_v57 = vld [vmem:[%s2684_s29 + $0xe] ss:$0 sm:$0xff] }
 0x12f   : > { %6516 = vst [vmem:[#allocation30_spill] sm:$0xff] %v4214_v13  ;;  %v4236_v54 = vsel %vm6519_vm14, %v403_v27, 0.0  ;;  %v690_v6 = vadd.f32 %v4016_v11, %v3884_v20  ;;  %v4243_v13 = vld [vmem:[%s2684_s29 + $0xc] ss:$0 sm:$0xff]  ;;  %vm1912_vm7 = vcmp.eq.s32.totalorder %v6503_v32, %v4248_v56  ;;  %vm6521_vm14 = vcmp.eq.s32.totalorder %v6497_v37, %v2790_v58 }
 0x130   : > { %6520 = vst [vmem:[#allocation32_spill] sm:$0xff] %v4236_v54  ;;  %v4260_v30 = vsel %vm6521_vm14, %v403_v27, 0.0  ;;  %vm6522_vm2 = vcmp.eq.s32.totalorder %v6497_v37, %v2793_v59  ;;  %v797_v33 = vadd.f32 %v4032_v63, %v3889_v25  ;;  %v904_v11 = vadd.f32 %v4034_v9, %v3896_v34  ;;  %v4272_v54 = vld [vmem:[%s2684_s29 + $0xf] ss:$0 sm:$0xff]  ;;  %v4293_v63 = vld [vmem:[%s2684_s29] ss:$0 sm:$0xff] }
 0x131   : > { %v4265_v20 = vsel %vm6522_vm2, %v403_v27, 0.0  ;;  %vm2126_vm1 = vcmp.eq.s32.totalorder %v6503_v32, %v4272_v54  ;;  %v4279_v58 = vsel %vm2020_vm0, %v403_v27, 0.0  ;;  %v4284_v59 = vsel %vm2127_vm3, %v403_v27, 0.0  ;;  %v4298_v9 = vld [vmem:[%s2684_s29 + $0x1] ss:$0 sm:$0xff] }
 0x132   : > { %6523 = vst [vmem:[#allocation11_spill] sm:$0xff] %v4284_v59  ;;  %vm6524_vm2 = vcmp.eq.s32.totalorder %v6503_v32, %v2732_v43  ;;  %v1011_v34 = vadd.f32 %v4046_v21, %v3901_v26  ;;  %vm524_vm0 = vcmp.eq.s32.totalorder %v6525_v60, %v4293_v63  ;;  %vm631_vm3 = vcmp.eq.s32.totalorder %v6525_v60, %v4298_v9  ;;  %v4322_v27 = vld [vmem:[%s2684_s29 + $0x3] ss:$0 sm:$0xff] }
 0x133   : > { %v553_v25 = vsel %vm6524_vm2, %v4221_v52, 0.0  ;;  %v660_v43 = vsel %vm628_vm10, %v4221_v52, 0.0  ;;  %vm6526_vm2 = vcmp.eq.s32.totalorder %v6503_v32, %v2738_v45  ;;  %v874_v37 = vsel %vm842_vm5, %v4221_v52, 0.0  ;;  %v4332_v45 = vld [vmem:[%s2684_s29 + $0x5] ss:$0 sm:$0xff] }
 0x134   : > { %v767_v26 = vsel %vm6526_vm2, %v4221_v52, 0.0  ;;  %v1118_v21 = vadd.f32 %v4060_v22, %v3906_v0  ;;  %v4336_v46 = vadd.f32 %v583_v55, %v553_v25  ;;  %v4338_v59 = vadd.f32 %v690_v6, %v660_v43 }
 0x135   : > { %v981_v0 = vsel %vm949_vm12, %v4221_v52, 0.0  ;;  %v1225_v22 = vadd.f32 %v4078_v7, %v3915_v1  ;;  %vm1166_vm5 = vcmp.eq.s32.totalorder %v6525_v60, %v4133_v23  ;;  %vm1273_vm10 = vcmp.eq.s32.totalorder %v6525_v60, %v4148_v16 }
 0x136   : > { %vm1487_vm14 = vcmp.eq.s32.totalorder %v6525_v60, %v4192_v3  ;;  %v4354_v6 = vadd.f32 %v797_v33, %v767_v26  ;;  %v4356_v55 = vadd.f32 %v904_v11, %v874_v37  ;;  %v1088_v47 = vsel %vm1056_vm9, %v4221_v52, 0.0  ;;  %v413_v26 = vpop.permute.xlu1 %412 }
 0x137   : > { %v1332_v1 = vadd.f32 %v4092_v48, %v3920_v15  ;;  %vm1701_vm2 = vcmp.eq.s32.totalorder %v6525_v60, %v4224_v50  ;;  %v4368_v7 = vadd.f32 %v1011_v34, %v981_v0  ;;  %v1195_v33 = vsel %vm1163_vm8, %v4221_v52, 0.0 }
 0x138   : > { %v1439_v49 = vadd.f32 %v4106_v42, %v3925_v35  ;;  %v1546_v11 = vadd.f32 %v4108_v8, %v3930_v17  ;;  %v4382_v15 = vadd.f32 %v1118_v21, %v1088_v47  ;;  %v1302_v48 = vsel %vm1270_vm6, %v4221_v52, 0.0  ;;  %v6527_v42 = vld [vmem:[#allocation17_spill] sm:$0xff] }
 0x139   : > { %v1409_v35 = vsel %vm1377_vm15, %v4221_v52, 0.0  ;;  %v1653_v17 = vadd.f32 %v4118_v39, %v3939_v19  ;;  %vm2022_vm8 = vcmp.eq.s32.totalorder %v6525_v60, %v4253_v57  ;;  %vm2129_vm12 = vcmp.eq.s32.totalorder %v6525_v60, %v4272_v54 }
 0x13a   : > { %v4400_v8 = vadd.f32 %v1225_v22, %v1195_v33  ;;  %v1760_v25 = vadd.f32 %v4137_v28, %v3944_v5  ;;  %v1867_v34 = vadd.f32 %v4139_v53, %v3959_v31  ;;  %v1974_v19 = vadd.f32 %v4141_v24, %v3964_v4 }
 0x13b   : > { %vm630_vm6 = vcmp.eq.s32.totalorder %v6527_v42, %v4298_v9  ;;  %vm844_vm9 = vcmp.eq.s32.totalorder %v6527_v42, %v4322_v27  ;;  %v4414_v39 = vadd.f32 %v1332_v1, %v1302_v48  ;;  %v1516_v5 = vsel %vm1484_vm11, %v4221_v52, 0.0 }
 0x13c   : > { %v1623_v31 = vsel %vm1591_vm4, %v4221_v52, 0.0  ;;  %v2081_v4 = vadd.f32 %v4157_v62, %v3975_v18  ;;  %vm951_vm15 = vcmp.eq.s32.totalorder %v6527_v42, %v4327_v44  ;;  %v4428_v28 = vadd.f32 %v1439_v49, %v1409_v35 }
 0x13d   : > { %v4430_v53 = vadd.f32 %v1546_v11, %v1516_v5  ;;  %v1730_v24 = vsel %vm1698_vm13, %v4221_v52, 0.0  ;;  %v2188_v43 = vadd.f32 %v4174_v10, %v3980_v41  ;;  %v4440_v18 = vadd.f32 %v1653_v17, %v1623_v31 }
 0x13e   : > { %vm6528_vm4 = vcmp.eq.s32.totalorder %v6503_v32, %v4243_v13  ;;  %v1944_v37 = vsel %vm1912_vm7, %v4221_v52, 0.0  ;;  %vm6529_vm13 = vcmp.eq.s32.totalorder %v6503_v32, %v4253_v57  ;;  %vm1165_vm11 = vcmp.eq.s32.totalorder %v6527_v42, %v4133_v23 }
 0x13f   : > { %v1837_v62 = vsel %vm6528_vm4, %v4221_v52, 0.0  ;;  %v2051_v41 = vsel %vm6529_vm13, %v4221_v52, 0.0  ;;  %v4456_v10 = vadd.f32 %v1760_v25, %v1730_v24  ;;  %v4460_v0 = vadd.f32 %v1974_v19, %v1944_v37  ;;  %v4528_v19 = vpop.permute.xlu0 %407 }
 0x140   : > { %v4458_v21 = vadd.f32 %v1867_v34, %v1837_v62  ;;  %v2158_v22 = vsel %vm2126_vm1, %v4221_v52, 0.0  ;;  %vm1272_vm7 = vcmp.eq.s32.totalorder %v6527_v42, %v4148_v16  ;;  %v4470_v47 = vadd.f32 %v2081_v4, %v2051_v41  ;;  %v6543_v41 = vld [vmem:[#allocation18_spill] sm:$0xff] }
 0x141   : > { %v4475_v1 = vsel %vm524_vm0, %v413_v26, 0.0  ;;  %v4480_v33 = vsel %vm631_vm3, %v413_v26, 0.0  ;;  %vm6530_vm1 = vcmp.eq.s32.totalorder %v6525_v60, %v4303_v61  ;;  %v4487_v52 = vadd.f32 %v2188_v43, %v2158_v22  ;;  %v6545_v22 = vld [vmem:[#allocation29_spill] sm:$0xff] }
 0x142   : > { %v4485_v32 = vsel %vm6530_vm1, %v413_v26, 0.0  ;;  %vm6531_vm13 = vcmp.eq.s32.totalorder %v6525_v60, %v4322_v27  ;;  %vm6532_vm0 = vcmp.eq.s32.totalorder %v6525_v60, %v4327_v44  ;;  %vm6533_vm3 = vcmp.eq.s32.totalorder %v6525_v60, %v4332_v45 }
 0x143   : > { %v4492_v49 = vsel %vm6531_vm13, %v413_v26, 0.0  ;;  %v4497_v11 = vsel %vm6532_vm0, %v413_v26, 0.0  ;;  %v4502_v48 = vsel %vm6533_vm3, %v413_v26, 0.0  ;;  %vm1486_vm1 = vcmp.eq.s32.totalorder %v6527_v42, %v4192_v3 }
 0x144   : > { %vm1593_vm4 = vcmp.eq.s32.totalorder %v6527_v42, %v4197_v36  ;;  %v4511_v35 = vsel %vm1166_vm5, %v413_v26, 0.0  ;;  %v4516_v17 = vsel %vm1273_vm10, %v413_v26, 0.0  ;;  %vm6534_vm13 = vcmp.eq.s32.totalorder %v6525_v60, %v4153_v40 }
 0x145   : > { %v4521_v25 = vsel %vm6534_vm13, %v413_v26, 0.0  ;;  %v4526_v34 = vsel %vm1487_vm14, %v413_v26, 0.0  ;;  %vm1700_vm5 = vcmp.eq.s32.totalorder %v6527_v42, %v4224_v50  ;;  %vm6535_vm0 = vcmp.eq.s32.totalorder %v6525_v60, %v4197_v36 }
 0x146   : > { %v4535_v5 = vsel %vm6535_vm0, %v413_v26, 0.0  ;;  %v4540_v31 = vsel %vm1701_vm2, %v413_v26, 0.0  ;;  %v585_v4 = vadd.f32 %v4336_v46, %v4162_v38  ;;  %v692_v24 = vadd.f32 %v4338_v59, %v4167_v12  ;;  %v6538_v59 = vld [vmem:[#allocation27_spill] sm:$0xff] }
 0x147   : > { %vm1807_vm14 = vcmp.eq.s32.totalorder %v6527_v42, %v4243_v13  ;;  %vm1914_vm10 = vcmp.eq.s32.totalorder %v6527_v42, %v4248_v56  ;;  %vm2021_vm3 = vcmp.eq.s32.totalorder %v6527_v42, %v4253_v57  ;;  %vm6536_vm13 = vcmp.eq.s32.totalorder %v6525_v60, %v4243_v13 }
 0x148   : > { %v4555_v43 = vsel %vm6536_vm13, %v413_v26, 0.0  ;;  %vm6537_vm2 = vcmp.eq.s32.totalorder %v6525_v60, %v4248_v56  ;;  %v799_v12 = vadd.f32 %v4354_v6, %v4172_v2  ;;  %v906_v46 = vadd.f32 %v4356_v55, %v6538_v59  ;;  %v6542_v6 = vld [vmem:[#allocation28_spill] sm:$0xff] }
 0x149   : > { %v4560_v38 = vsel %vm6537_vm2, %v413_v26, 0.0  ;;  %v4571_v62 = vsel %vm2022_vm8, %v413_v26, 0.0  ;;  %v4576_v37 = vsel %vm2129_vm12, %v413_v26, 0.0  ;;  %vm6541_vm13 = vcmp.eq.s32.totalorder %v6527_v42, %v4293_v63 }
 0x14a   : > { %6539 = vst [vmem:[#allocation33_spill] sm:$0xff] %v4571_v62  ;;  %6540 = vst [vmem:[#allocation34_spill] sm:$0xff] %v4576_v37  ;;  %v555_v2 = vsel %vm6541_vm13, %v4528_v19, 0.0  ;;  %v1013_v55 = vadd.f32 %v4368_v7, %v6542_v6  ;;  %vm526_vm2 = vcmp.eq.s32.totalorder %v6543_v41, %v4293_v63  ;;  %vm633_vm8 = vcmp.eq.s32.totalorder %v6543_v41, %v4298_v9 }
 0x14b   : > { %v662_v60 = vsel %vm630_vm6, %v4528_v19, 0.0  ;;  %vm6544_vm12 = vcmp.eq.s32.totalorder %v6527_v42, %v4303_v61  ;;  %v876_v7 = vsel %vm844_vm9, %v4528_v19, 0.0  ;;  %v1120_v59 = vadd.f32 %v4382_v15, %v6545_v22  ;;  %v6551_v22 = vld [vmem:[#allocation32_spill] sm:$0xff] }
 0x14c   : > { %v769_v26 = vsel %vm6544_vm12, %v4528_v19, 0.0  ;;  %vm847_vm13 = vcmp.eq.s32.totalorder %v6543_v41, %v4322_v27  ;;  %v4610_v6 = vadd.f32 %v585_v4, %v555_v2  ;;  %v4612_v37 = vadd.f32 %v692_v24, %v662_v60 }
 0x14d   : > { %v983_v62 = vsel %vm951_vm15, %v4528_v19, 0.0  ;;  %v1227_v15 = vadd.f32 %v4400_v8, %v4204_v14  ;;  %vm1168_vm9 = vcmp.eq.s32.totalorder %v6543_v41, %v4133_v23  ;;  %vm1489_vm0 = vcmp.eq.s32.totalorder %v6543_v41, %v4192_v3 }
 0x14e   : > { %v4628_v4 = vadd.f32 %v799_v12, %v769_v26  ;;  %v4630_v24 = vadd.f32 %v906_v46, %v876_v7  ;;  %vm6546_vm15 = vcmp.eq.s32.totalorder %v6527_v42, %v4332_v45  ;;  %v1334_v8 = vadd.f32 %v4414_v39, %v4209_v29  ;;  %v6547_v46 = vld [vmem:[#allocation30_spill] sm:$0xff]  ;;  %v6548_v26 = vld [vmem:[#allocation31_spill] sm:$0xff] }
 0x14f   : > { %v1090_v14 = vsel %vm6546_vm15, %v4528_v19, 0.0  ;;  %v4642_v2 = vadd.f32 %v1013_v55, %v983_v62  ;;  %v1197_v12 = vsel %vm1165_vm11, %v4528_v19, 0.0  ;;  %v1441_v60 = vadd.f32 %v4428_v28, %v6547_v46  ;;  %v6550_v62 = vld [vmem:[#allocation19_spill] sm:$0xff]  ;;  %v423_v46 = vpop.permute.xlu1 %422 }
 0x150   : > { %v1548_v7 = vadd.f32 %v4430_v53, %v6548_v26  ;;  %v4656_v29 = vadd.f32 %v1120_v59, %v1090_v14  ;;  %v1304_v39 = vsel %vm1272_vm7, %v4528_v19, 0.0  ;;  %vm6549_vm11 = vcmp.eq.s32.totalorder %v6527_v42, %v4153_v40 }
 0x151   : > { %v1411_v28 = vsel %vm6549_vm11, %v4528_v19, 0.0  ;;  %v1655_v53 = vadd.f32 %v4440_v18, %v4231_v51  ;;  %vm2024_vm15 = vcmp.eq.s32.totalorder %v6543_v41, %v4253_v57  ;;  %vm2131_vm12 = vcmp.eq.s32.totalorder %v6543_v41, %v4272_v54 }
 0x152   : > { %v4674_v55 = vadd.f32 %v1227_v15, %v1197_v12  ;;  %v1762_v59 = vadd.f32 %v4456_v10, %v6551_v22  ;;  %v1869_v14 = vadd.f32 %v4458_v21, %v4260_v30  ;;  %v1976_v51 = vadd.f32 %v4460_v0, %v4265_v20 }
 0x153   : > { %vm632_vm7 = vcmp.eq.s32.totalorder %v6550_v62, %v4298_v9  ;;  %vm846_vm6 = vcmp.eq.s32.totalorder %v6550_v62, %v4322_v27  ;;  %v4688_v18 = vadd.f32 %v1334_v8, %v1304_v39  ;;  %v1518_v10 = vsel %vm1486_vm1, %v4528_v19, 0.0  ;;  %v6552_v8 = vld [vmem:[#allocation11_spill] sm:$0xff] }
 0x154   : > { %v1625_v30 = vsel %vm1593_vm4, %v4528_v19, 0.0  ;;  %v2083_v20 = vadd.f32 %v4470_v47, %v4279_v58  ;;  %vm953_vm11 = vcmp.eq.s32.totalorder %v6550_v62, %v4327_v44  ;;  %v4702_v21 = vadd.f32 %v1441_v60, %v1411_v28 }
 0x155   : > { %v4704_v0 = vadd.f32 %v1548_v7, %v1518_v10  ;;  %v1732_v15 = vsel %vm1700_vm5, %v4528_v19, 0.0  ;;  %v2190_v12 = vadd.f32 %v4487_v52, %v6552_v8  ;;  %vm1060_vm4 = vcmp.eq.s32.totalorder %v6550_v62, %v4332_v45 }
 0x156   : > { %v4714_v58 = vadd.f32 %v1655_v53, %v1625_v30  ;;  %v1839_v47 = vsel %vm1807_vm14, %v4528_v19, 0.0  ;;  %v1946_v60 = vsel %vm1914_vm10, %v4528_v19, 0.0  ;;  %v2053_v52 = vsel %vm2021_vm3, %v4528_v19, 0.0 }
 0x157   : > { %vm1167_vm1 = vcmp.eq.s32.totalorder %v6550_v62, %v4133_v23  ;;  %v4730_v26 = vadd.f32 %v1762_v59, %v1732_v15  ;;  %v4732_v7 = vadd.f32 %v1869_v14, %v1839_v47  ;;  %v4734_v39 = vadd.f32 %v1976_v51, %v1946_v60 }
 0x158   : > { %vm6553_vm5 = vcmp.eq.s32.totalorder %v6527_v42, %v4272_v54  ;;  %vm1274_vm14 = vcmp.eq.s32.totalorder %v6550_v62, %v4148_v16  ;;  %vm1381_vm10 = vcmp.eq.s32.totalorder %v6550_v62, %v4153_v40  ;;  %v4744_v53 = vadd.f32 %v2083_v20, %v2053_v52 }
 0x159   : > { %v2160_v28 = vsel %vm6553_vm5, %v4528_v19, 0.0  ;;  %v4749_v22 = vsel %vm526_vm2, %v423_v46, 0.0  ;;  %v4754_v59 = vsel %vm633_vm8, %v423_v46, 0.0  ;;  %vm6554_vm3 = vcmp.eq.s32.totalorder %v6543_v41, %v4303_v61 }
 0x15a   : > { %v4759_v42 = vsel %vm6554_vm3, %v423_v46, 0.0  ;;  %v4761_v19 = vadd.f32 %v2190_v12, %v2160_v28  ;;  %v4766_v14 = vsel %vm847_vm13, %v423_v46, 0.0  ;;  %vm6555_vm2 = vcmp.eq.s32.totalorder %v6543_v41, %v4327_v44  ;;  %v4802_v12 = vpop.permute.xlu0 %417 }
 0x15b   : > { %v4771_v51 = vsel %vm6555_vm2, %v423_v46, 0.0  ;;  %vm6556_vm8 = vcmp.eq.s32.totalorder %v6543_v41, %v4332_v45  ;;  %vm1488_vm5 = vcmp.eq.s32.totalorder %v6550_v62, %v4192_v3  ;;  %vm1595_vm3 = vcmp.eq.s32.totalorder %v6550_v62, %v4197_v36 }
 0x15c   : > { %v4776_v10 = vsel %vm6556_vm8, %v423_v46, 0.0  ;;  %v4785_v30 = vsel %vm1168_vm9, %v423_v46, 0.0  ;;  %vm6557_vm13 = vcmp.eq.s32.totalorder %v6543_v41, %v4148_v16  ;;  %vm6558_vm2 = vcmp.eq.s32.totalorder %v6543_v41, %v4153_v40 }
 0x15d   : > { %v4790_v20 = vsel %vm6557_vm13, %v423_v46, 0.0  ;;  %v4795_v15 = vsel %vm6558_vm2, %v423_v46, 0.0  ;;  %v4800_v8 = vsel %vm1489_vm0, %v423_v46, 0.0  ;;  %vm6559_vm8 = vcmp.eq.s32.totalorder %v6543_v41, %v4197_v36 }
 0x15e   : > { %v4809_v47 = vsel %vm6559_vm8, %v423_v46, 0.0  ;;  %vm6561_vm13 = vcmp.eq.s32.totalorder %v6543_v41, %v4224_v50  ;;  %v587_v52 = vadd.f32 %v4610_v6, %v4475_v1  ;;  %v694_v28 = vadd.f32 %v4612_v37, %v4480_v33 }
 0x15f   : > { %6560 = vst [vmem:[#allocation35_spill] sm:$0xff] %v4809_v47  ;;  %v4814_v60 = vsel %vm6561_vm13, %v423_v46, 0.0  ;;  %vm1809_vm0 = vcmp.eq.s32.totalorder %v6550_v62, %v4243_v13  ;;  %vm2023_vm8 = vcmp.eq.s32.totalorder %v6550_v62, %v4253_v57  ;;  %vm6562_vm9 = vcmp.eq.s32.totalorder %v6543_v41, %v4243_v13 }
 0x160   : > { %v4829_v47 = vsel %vm6562_vm9, %v423_v46, 0.0  ;;  %vm6564_vm13 = vcmp.eq.s32.totalorder %v6543_v41, %v4248_v56  ;;  %v801_v33 = vadd.f32 %v4628_v4, %v4485_v32  ;;  %v908_v37 = vadd.f32 %v4630_v24, %v4492_v49  ;;  %v6568_v4 = vld [vmem:[#allocation20_spill] sm:$0xff] }
 0x161   : > { %6563 = vst [vmem:[#allocation36_spill] sm:$0xff] %v4829_v47  ;;  %v4834_v1 = vsel %vm6564_vm13, %v423_v46, 0.0  ;;  %v4845_v6 = vsel %vm2024_vm15, %v423_v46, 0.0  ;;  %v4850_v47 = vsel %vm2131_vm12, %v423_v46, 0.0  ;;  %vm6567_vm9 = vcmp.eq.s32.totalorder %v6550_v62, %v4293_v63 }
 0x162   : > { %6565 = vst [vmem:[#allocation37_spill] sm:$0xff] %v4845_v6  ;;  %6566 = vst [vmem:[#allocation12_spill] sm:$0xff] %v4850_v47  ;;  %v557_v32 = vsel %vm6567_vm9, %v4802_v12, 0.0  ;;  %v1015_v49 = vadd.f32 %v4642_v2, %v4497_v11  ;;  %vm528_vm13 = vcmp.eq.s32.totalorder %v6568_v4, %v4293_v63  ;;  %vm635_vm15 = vcmp.eq.s32.totalorder %v6568_v4, %v4298_v9 }
 0x163   : > { %v664_v41 = vsel %vm632_vm7, %v4802_v12, 0.0  ;;  %vm6569_vm12 = vcmp.eq.s32.totalorder %v6550_v62, %v4303_v61  ;;  %v878_v11 = vsel %vm846_vm6, %v4802_v12, 0.0  ;;  %v1122_v2 = vadd.f32 %v4656_v29, %v4502_v48 }
 0x164   : > { %v771_v24 = vsel %vm6569_vm12, %v4802_v12, 0.0  ;;  %vm849_vm9 = vcmp.eq.s32.totalorder %v6568_v4, %v4322_v27  ;;  %v4884_v46 = vadd.f32 %v587_v52, %v557_v32  ;;  %v4886_v47 = vadd.f32 %v694_v28, %v664_v41 }
 0x165   : > { %v985_v6 = vsel %vm953_vm11, %v4802_v12, 0.0  ;;  %v1229_v48 = vadd.f32 %v4674_v55, %v4511_v35  ;;  %vm1170_vm6 = vcmp.eq.s32.totalorder %v6568_v4, %v4133_v23  ;;  %vm1277_vm12 = vcmp.eq.s32.totalorder %v6568_v4, %v4148_v16 }
 0x166   : > { %v4902_v29 = vadd.f32 %v801_v33, %v771_v24  ;;  %v4904_v52 = vadd.f32 %v908_v37, %v878_v11  ;;  %v1092_v35 = vsel %vm1060_vm4, %v4802_v12, 0.0  ;;  %v1336_v55 = vadd.f32 %v4688_v18, %v4516_v17  ;;  %v6573_v24 = vld [vmem:[#allocation34_spill] sm:$0xff] }
 0x167   : > { %vm1598_vm11 = vcmp.eq.s32.totalorder %v6568_v4, %v4197_v36  ;;  %vm1705_vm7 = vcmp.eq.s32.totalorder %v6568_v4, %v4224_v50  ;;  %v4918_v28 = vadd.f32 %v1015_v49, %v985_v6  ;;  %v1199_v33 = vsel %vm1167_vm1, %v4802_v12, 0.0 }
 0x168   : > { %v1443_v37 = vadd.f32 %v4702_v21, %v4521_v25  ;;  %v1550_v17 = vadd.f32 %v4704_v0, %v4526_v34  ;;  %v4930_v18 = vadd.f32 %v1122_v2, %v1092_v35  ;;  %v1306_v6 = vsel %vm1274_vm14, %v4802_v12, 0.0  ;;  %v6570_v34 = vld [vmem:[#allocation21_spill] sm:$0xff]  ;;  %v433_v2 = vpop.permute.xlu1 %432 }
 0x169   : > { %v1413_v32 = vsel %vm1381_vm10, %v4802_v12, 0.0  ;;  %v1657_v25 = vadd.f32 %v4714_v58, %v4535_v5  ;;  %vm2026_vm1 = vcmp.eq.s32.totalorder %v6568_v4, %v4253_v57  ;;  %vm2133_vm4 = vcmp.eq.s32.totalorder %v6568_v4, %v4272_v54 }
 0x16a   : > { %vm527_vm2 = vcmp.eq.s32.totalorder %v6570_v34, %v4293_v63  ;;  %v1230_v21 = vadd.f32 %v1229_v48, %v1199_v33  ;;  %v1764_v0 = vadd.f32 %v4730_v26, %v4540_v31  ;;  %v1871_v49 = vadd.f32 %v4732_v7, %v4555_v43  ;;  %v6571_v43 = vld [vmem:[#allocation33_spill] sm:$0xff] }
 0x16b   : > { %v1978_v41 = vadd.f32 %v4734_v39, %v4560_v38  ;;  %v1337_v5 = vadd.f32 %v1336_v55, %v1306_v6  ;;  %v1520_v58 = vsel %vm1488_vm5, %v4802_v12, 0.0  ;;  %v1627_v31 = vsel %vm1595_vm3, %v4802_v12, 0.0 }
 0x16c   : > { %v2085_v38 = vadd.f32 %v4744_v53, %v6571_v43  ;;  %v1444_v26 = vadd.f32 %v1443_v37, %v1413_v32  ;;  %v4970_v7 = vadd.f32 %v1550_v17, %v1520_v58  ;;  %vm6572_vm10 = vcmp.eq.s32.totalorder %v6550_v62, %v4224_v50 }
 0x16d   : > { %v1734_v39 = vsel %vm6572_vm10, %v4802_v12, 0.0  ;;  %v2192_v11 = vadd.f32 %v4761_v19, %v6573_v24  ;;  %v1658_v48 = vadd.f32 %v1657_v25, %v1627_v31  ;;  %v1841_v53 = vsel %vm1809_vm0, %v4802_v12, 0.0 }
 0x16e   : > { %vm6574_vm3 = vcmp.eq.s32.totalorder %v6550_v62, %v4248_v56  ;;  %v2055_v19 = vsel %vm2023_vm8, %v4802_v12, 0.0  ;;  %vm1062_vm10 = vcmp.eq.s32.totalorder %v6570_v34, %v4332_v45  ;;  %vm1169_vm5 = vcmp.eq.s32.totalorder %v6570_v34, %v4133_v23 }
 0x16f   : > { %v1948_v35 = vsel %vm6574_vm3, %v4802_v12, 0.0  ;;  %vm1276_vm14 = vcmp.eq.s32.totalorder %v6570_v34, %v4148_v16  ;;  %v1765_v55 = vadd.f32 %v1764_v0, %v1734_v39  ;;  %v1872_v33 = vadd.f32 %v1871_v49, %v1841_v53  ;;  %v428_v39 = vpop.permute.xlu0 %427 }
 0x170   : > { %v1979_v37 = vadd.f32 %v1978_v41, %v1948_v35  ;;  %vm6575_vm0 = vcmp.eq.s32.totalorder %v6550_v62, %v4272_v54  ;;  %vm1383_vm8 = vcmp.eq.s32.totalorder %v6570_v34, %v4153_v40  ;;  %v2086_v6 = vadd.f32 %v2085_v38, %v2055_v19 }
 0x171   : > { %v2162_v17 = vsel %vm6575_vm0, %v4802_v12, 0.0  ;;  %v5007_v32 = vsel %vm528_vm13, %v433_v2, 0.0  ;;  %v5012_v25 = vsel %vm635_vm15, %v433_v2, 0.0  ;;  %vm6576_vm3 = vcmp.eq.s32.totalorder %v6568_v4, %v4303_v61 }
 0x172   : > { %v5017_v0 = vsel %vm6576_vm3, %v433_v2, 0.0  ;;  %v2193_v62 = vadd.f32 %v2192_v11, %v2162_v17  ;;  %v5022_v12 = vsel %vm849_vm9, %v433_v2, 0.0  ;;  %vm6577_vm13 = vcmp.eq.s32.totalorder %v6568_v4, %v4327_v44 }
 0x173   : > { %v5027_v49 = vsel %vm6577_vm13, %v433_v2, 0.0  ;;  %vm6578_vm15 = vcmp.eq.s32.totalorder %v6568_v4, %v4332_v45  ;;  %v5037_v58 = vsel %vm1170_vm6, %v433_v2, 0.0  ;;  %v5042_v31 = vsel %vm1277_vm12, %v433_v2, 0.0 }
 0x174   : > { %v5032_v41 = vsel %vm6578_vm15, %v433_v2, 0.0  ;;  %vm6579_vm9 = vcmp.eq.s32.totalorder %v6568_v4, %v4153_v40  ;;  %vm6580_vm0 = vcmp.eq.s32.totalorder %v6568_v4, %v4192_v3  ;;  %v5057_v24 = vsel %vm1598_vm11, %v433_v2, 0.0 }
 0x175   : > { %v5047_v43 = vsel %vm6579_vm9, %v433_v2, 0.0  ;;  %v5052_v38 = vsel %vm6580_vm0, %v433_v2, 0.0  ;;  %6582 = vst [vmem:[#allocation14_spill] sm:$0xff] %v5057_v24  ;;  %v5062_v11 = vsel %vm1705_vm7, %v433_v2, 0.0  ;;  %vm6584_vm6 = vcmp.eq.s32.totalorder %v6568_v4, %v4243_v13 }
 0x176   : > { %6581 = vst [vmem:[#allocation13_spill] sm:$0xff] %v5052_v38  ;;  %6583 = vst [vmem:[#allocation22_spill] sm:$0xff] %v5062_v11  ;;  %v5067_v53 = vsel %vm6584_vm6, %v433_v2, 0.0  ;;  %v589_v35 = vadd.f32 %v4884_v46, %v4749_v22  ;;  %vm6586_vm12 = vcmp.eq.s32.totalorder %v6568_v4, %v4248_v56  ;;  %v696_v17 = vadd.f32 %v4886_v47, %v4754_v59 }
 0x177   : > { %6585 = vst [vmem:[#allocation23_spill] sm:$0xff] %v5067_v53  ;;  %v5074_v19 = vsel %vm6586_vm12, %v433_v2, 0.0  ;;  %v803_v24 = vadd.f32 %v4902_v29, %v4759_v42  ;;  %v910_v11 = vadd.f32 %v4904_v52, %v4766_v14  ;;  %v5085_v53 = vsel %vm2026_vm1, %v433_v2, 0.0 }
 0x178   : > { %6587 = vst [vmem:[#allocation24_spill] sm:$0xff] %v5074_v19  ;;  %6588 = vst [vmem:[#allocation15_spill] sm:$0xff] %v5085_v53  ;;  %v5090_v22 = vsel %vm2133_vm4, %v433_v2, 0.0  ;;  %v559_v59 = vsel %vm527_vm2, %v428_v39, 0.0  ;;  %v1017_v42 = vadd.f32 %v4918_v28, %v4771_v51  ;;  %vm6590_vm7 = vcmp.eq.s32.totalorder %v6570_v34, %v4298_v9 }
 0x179   : > { %6589 = vst [vmem:[#allocation25_spill] sm:$0xff] %v5090_v22  ;;  %v666_v14 = vsel %vm6590_vm7, %v428_v39, 0.0  ;;  %vm6591_vm11 = vcmp.eq.s32.totalorder %v6570_v34, %v4303_v61  ;;  %v1124_v4 = vadd.f32 %v4930_v18, %v4776_v10  ;;  %v1231_v46 = vadd.f32 %v1230_v21, %v4785_v30 }
 0x17a   : > { %v773_v47 = vsel %vm6591_vm11, %v428_v39, 0.0  ;;  %v590_v29 = vadd.f32 %v589_v35, %v559_v59  ;;  %vm6592_vm2 = vcmp.eq.s32.totalorder %v6570_v34, %v4322_v27  ;;  %v1338_v51 = vadd.f32 %v1337_v5, %v4790_v20 }
 0x17b   : > { %v880_v52 = vsel %vm6592_vm2, %v428_v39, 0.0  ;;  %v1445_v28 = vadd.f32 %v1444_v26, %v4795_v15  ;;  %v697_v2 = vadd.f32 %v696_v17, %v666_v14  ;;  %v804_v22 = vadd.f32 %v803_v24, %v773_v47  ;;  %v6595_v17 = vld [vmem:[#allocation8_spill] sm:$0xff] }
 0x17c   : > { %v911_v53 = vadd.f32 %v910_v11, %v880_v52  ;;  %vm6593_vm4 = vcmp.eq.s32.totalorder %v6570_v34, %v4327_v44  ;;  %v1094_v10 = vsel %vm1062_vm10, %v428_v39, 0.0  ;;  %v1201_v30 = vsel %vm1169_vm5, %v428_v39, 0.0  ;;  %v6594_v11 = vld [vmem:[#allocation35_spill] sm:$0xff] }
 0x17d   : > { %v987_v19 = vsel %vm6593_vm4, %v428_v39, 0.0  ;;  %v1308_v20 = vsel %vm1276_vm14, %v428_v39, 0.0  ;;  %v5123_v15 = vadd.f32 %v1124_v4, %v1094_v10  ;;  %v5125_v18 = vadd.f32 %v1231_v46, %v1201_v30  ;;  %v6599_v46 = vld [vmem:[#allocation9_spill] sm:$0xff] }
 0x17e   : > { %v1018_v38 = vadd.f32 %v1017_v42, %v987_v19  ;;  %v1415_v21 = vsel %vm1383_vm8, %v428_v39, 0.0  ;;  %vm1490_vm1 = vcmp.eq.s32.totalorder %v6570_v34, %v4192_v3  ;;  %v5132_v5 = vadd.f32 %v1338_v51, %v1308_v20  ;;  %v6596_v42 = vld [vmem:[#allocation36_spill] sm:$0xff] }
 0x17f   : > { %v5134_v26 = vadd.f32 %v1445_v28, %v1415_v21  ;;  %v1552_v24 = vadd.f32 %v4970_v7, %v4800_v8  ;;  %vm1597_vm14 = vcmp.eq.s32.totalorder %v6570_v34, %v4197_v36  ;;  %v1659_v35 = vadd.f32 %v1658_v48, %v6594_v11  ;;  %v6597_v7 = vld [vmem:[#allocation37_spill] sm:$0xff] }
 0x180   : > { %vm1704_vm5 = vcmp.eq.s32.totalorder %v6570_v34, %v4224_v50  ;;  %v1766_v19 = vadd.f32 %v1765_v55, %v4814_v60  ;;  %v267_v59 = vadd.s32 152, %v6595_v17  ;;  %vm1811_vm10 = vcmp.eq.s32.totalorder %v6570_v34, %v4243_v13  ;;  %v6598_v60 = vld [vmem:[#allocation12_spill] sm:$0xff] }
 0x181   : > { %v1873_v14 = vadd.f32 %v1872_v33, %v6596_v42  ;;  %vm1918_vm8 = vcmp.eq.s32.totalorder %v6570_v34, %v4248_v56  ;;  %v1980_v8 = vadd.f32 %v1979_v37, %v4834_v1  ;;  %vm2025_vm3 = vcmp.eq.s32.totalorder %v6570_v34, %v4253_v57 }
 0x182   : > { %v2087_v48 = vadd.f32 %v2086_v6, %v6597_v7  ;;  %vm2132_vm13 = vcmp.eq.s32.totalorder %v6570_v34, %v4272_v54  ;;  %v2194_v55 = vadd.f32 %v2193_v62, %v6598_v60  ;;  %v1522_v47 = vsel %vm1490_vm1, %v428_v39, 0.0 }
 0x183   : > { %v1629_v33 = vsel %vm1597_vm14, %v428_v39, 0.0  ;;  %v1736_v4 = vsel %vm1704_vm5, %v428_v39, 0.0  ;;  %v300_v52 = vadd.s32 %v6599_v46, %v267_v59  ;;  %v5161_v51 = vadd.f32 %v1552_v24, %v1522_v47  ;;  %v443_v24 = vpop.permute.xlu1 %442 }
 0x184   : > { %v5163_v1 = vadd.f32 %v1659_v35, %v1629_v33  ;;  %v5165_v37 = vadd.f32 %v1766_v19, %v1736_v4  ;;  %v1843_v6 = vsel %vm1811_vm10, %v428_v39, 0.0  ;;  %v1950_v28 = vsel %vm1918_vm8, %v428_v39, 0.0 }
 0x185   : > { %v2057_v10 = vsel %vm2025_vm3, %v428_v39, 0.0  ;;  %v2164_v30 = vsel %vm2132_vm13, %v428_v39, 0.0  ;;  %v266_v62 = vadd.s32 144, %v6595_v17  ;;  %v5168_v20 = vadd.f32 %v1873_v14, %v1843_v6 }
 0x186   : > { %v5170_v34 = vadd.f32 %v1980_v8, %v1950_v28  ;;  %v5172_v21 = vadd.f32 %v2087_v48, %v2057_v10  ;;  %v5174_v11 = vadd.f32 %v2194_v55, %v2164_v30  ;;  %vm530_vm15 = vcmp.eq.s32.totalorder %v300_v52, %v4293_v63 }
 0x187   : > { %vm637_vm9 = vcmp.eq.s32.totalorder %v300_v52, %v4298_v9  ;;  %vm744_vm0 = vcmp.eq.s32.totalorder %v300_v52, %v4303_v61  ;;  %v591_v35 = vadd.f32 %v590_v29, %v5007_v32  ;;  %vm851_vm6 = vcmp.eq.s32.totalorder %v300_v52, %v4322_v27 }
 0x188   : > { %vm958_vm12 = vcmp.eq.s32.totalorder %v300_v52, %v4327_v44  ;;  %vm1065_vm7 = vcmp.eq.s32.totalorder %v300_v52, %v4332_v45  ;;  %v698_v39 = vadd.f32 %v697_v2, %v5012_v25  ;;  %vm1172_vm11 = vcmp.eq.s32.totalorder %v300_v52, %v4133_v23 }
 0x189   : > { %v5186_v19 = vadd.s32 %v6599_v46, %v266_v62  ;;  %v805_v59 = vadd.f32 %v804_v22, %v5017_v0  ;;  %v912_v42 = vadd.f32 %v911_v53, %v5022_v12  ;;  %v5190_v14 = vsel %vm530_vm15, %v443_v24, 0.0  ;;  %v5216_v12 = vpop.permute.xlu0 %437 }
 0x18a   : > { %v5192_v32 = vsel %vm637_vm9, %v443_v24, 0.0  ;;  %v5194_v29 = vsel %vm744_vm0, %v443_v24, 0.0  ;;  %v1019_v8 = vadd.f32 %v1018_v38, %v5027_v49  ;;  %v5197_v7 = vsel %vm851_vm6, %v443_v24, 0.0 }
 0x18b   : > { %v5199_v25 = vsel %vm958_vm12, %v443_v24, 0.0  ;;  %v5201_v2 = vsel %vm1065_vm7, %v443_v24, 0.0  ;;  %vm1279_vm2 = vcmp.eq.s32.totalorder %v300_v52, %v4148_v16  ;;  %v5204_v48 = vsel %vm1172_vm11, %v443_v24, 0.0 }
 0x18c   : > { %vm1386_vm4 = vcmp.eq.s32.totalorder %v300_v52, %v4153_v40  ;;  %vm1493_vm1 = vcmp.eq.s32.totalorder %v300_v52, %v4192_v3  ;;  %vm1600_vm14 = vcmp.eq.s32.totalorder %v300_v52, %v4197_v36  ;;  %vm1707_vm5 = vcmp.eq.s32.totalorder %v300_v52, %v4224_v50 }
 0x18d   : > { %vm1814_vm10 = vcmp.eq.s32.totalorder %v300_v52, %v4243_v13  ;;  %vm1921_vm8 = vcmp.eq.s32.totalorder %v300_v52, %v4248_v56  ;;  %vm2028_vm3 = vcmp.eq.s32.totalorder %v300_v52, %v4253_v57  ;;  %v5213_v0 = vsel %vm1279_vm2, %v443_v24, 0.0 }
 0x18e   : > { %vm2135_vm13 = vcmp.eq.s32.totalorder %v300_v52, %v4272_v54  ;;  %vm529_vm15 = vcmp.eq.s32.totalorder %v5186_v19, %v4293_v63  ;;  %vm636_vm9 = vcmp.eq.s32.totalorder %v5186_v19, %v4298_v9  ;;  %v5222_v49 = vsel %vm1386_vm4, %v443_v24, 0.0 }
 0x18f   : > { %v5224_v38 = vsel %vm1493_vm1, %v443_v24, 0.0  ;;  %v5226_v53 = vsel %vm1600_vm14, %v443_v24, 0.0  ;;  %vm743_vm0 = vcmp.eq.s32.totalorder %v5186_v19, %v4303_v61  ;;  %v5230_v22 = vsel %vm1707_vm5, %v443_v24, 0.0 }
 0x190   : > { %6600 = vst [vmem:[#allocation26_spill] sm:$0xff] %v5226_v53  ;;  %6601 = vst [vmem:[#allocation10_spill] sm:$0xff] %v5230_v22  ;;  %v5232_v60 = vsel %vm1814_vm10, %v443_v24, 0.0  ;;  %v5234_v55 = vsel %vm1921_vm8, %v443_v24, 0.0  ;;  %v5236_v47 = vsel %vm2028_vm3, %v443_v24, 0.0  ;;  %v5238_v33 = vsel %vm2135_vm13, %v443_v24, 0.0 }
 0x191   : > { %6602 = vst [vmem:[#allocation16_spill] sm:$0xff] %v5232_v60  ;;  %6603 = vst [vmem:[#allocation17_spill] sm:$0xff] %v5234_v55  ;;  %v561_v4 = vsel %vm529_vm15, %v5216_v12, 0.0  ;;  %v668_v52 = vsel %vm636_vm9, %v5216_v12, 0.0  ;;  %vm850_vm6 = vcmp.eq.s32.totalorder %v5186_v19, %v4322_v27  ;;  %v775_v6 = vsel %vm743_vm0, %v5216_v12, 0.0 }
 0x192   : > { %6604 = vst [vmem:[#allocation27_spill] sm:$0xff] %v5236_v47  ;;  %6605 = vst [vmem:[#allocation28_spill] sm:$0xff] %v5238_v33  ;;  %vm957_vm12 = vcmp.eq.s32.totalorder %v5186_v19, %v4327_v44  ;;  %vm1064_vm7 = vcmp.eq.s32.totalorder %v5186_v19, %v4332_v45  ;;  %v1126_v28 = vadd.f32 %v5123_v15, %v5032_v41  ;;  %v882_v24 = vsel %vm850_vm6, %v5216_v12, 0.0 }
 0x193   : > { %vm1171_vm11 = vcmp.eq.s32.totalorder %v5186_v19, %v4133_v23  ;;  %v1233_v10 = vadd.f32 %v5125_v18, %v5037_v58  ;;  %vm1278_vm2 = vcmp.eq.s32.totalorder %v5186_v19, %v4148_v16  ;;  %v1340_v30 = vadd.f32 %v5132_v5, %v5042_v31 }
 0x194   : > { %v592_v62 = vadd.f32 %v591_v35, %v561_v4  ;;  %vm1385_vm4 = vcmp.eq.s32.totalorder %v5186_v19, %v4153_v40  ;;  %v1447_v41 = vadd.f32 %v5134_v26, %v5047_v43  ;;  %v699_v15 = vadd.f32 %v698_v39, %v668_v52  ;;  %v6606_v43 = vld [vmem:[#allocation13_spill] sm:$0xff]  ;;  %v6607_v39 = vld [vmem:[#allocation14_spill] sm:$0xff]  ;;  %v6611_v52 = vld [vmem:[#allocation15_spill] sm:$0xff] }
 0x195   : > { %v806_v33 = vadd.f32 %v805_v59, %v775_v6  ;;  %v913_v47 = vadd.f32 %v912_v42, %v882_v24  ;;  %v989_v58 = vsel %vm957_vm12, %v5216_v12, 0.0  ;;  %v1096_v55 = vsel %vm1064_vm7, %v5216_v12, 0.0  ;;  %v6608_v42 = vld [vmem:[#allocation22_spill] sm:$0xff]  ;;  %v6612_v6 = vld [vmem:[#allocation25_spill] sm:$0xff] }
 0x196   : > { %v1020_v18 = vadd.f32 %v1019_v8, %v989_v58  ;;  %v1203_v60 = vsel %vm1171_vm11, %v5216_v12, 0.0  ;;  %v1310_v31 = vsel %vm1278_vm2, %v5216_v12, 0.0  ;;  %v1127_v5 = vadd.f32 %v1126_v28, %v1096_v55 }
 0x197   : > { %v1234_v35 = vadd.f32 %v1233_v10, %v1203_v60  ;;  %v1341_v4 = vadd.f32 %v1340_v30, %v1310_v31  ;;  %v1417_v22 = vsel %vm1385_vm4, %v5216_v12, 0.0  ;;  %vm1492_vm1 = vcmp.eq.s32.totalorder %v5186_v19, %v4192_v3 }
 0x198   : > { %v1448_v53 = vadd.f32 %v1447_v41, %v1417_v22  ;;  %v1554_v26 = vadd.f32 %v5161_v51, %v6606_v43  ;;  %vm1599_vm14 = vcmp.eq.s32.totalorder %v5186_v19, %v4197_v36  ;;  %v1661_v59 = vadd.f32 %v5163_v1, %v6607_v39  ;;  %v6609_v22 = vld [vmem:[#allocation23_spill] sm:$0xff]  ;;  %v6610_v51 = vld [vmem:[#allocation24_spill] sm:$0xff] }
 0x199   : > { %vm1706_vm5 = vcmp.eq.s32.totalorder %v5186_v19, %v4224_v50  ;;  %v1768_v8 = vadd.f32 %v5165_v37, %v6608_v42  ;;  %vm1813_vm10 = vcmp.eq.s32.totalorder %v5186_v19, %v4243_v13  ;;  %v1875_v60 = vadd.f32 %v5168_v20, %v6609_v22 }
 0x19a   : > { %vm1920_vm8 = vcmp.eq.s32.totalorder %v5186_v19, %v4248_v56  ;;  %v1982_v55 = vadd.f32 %v5170_v34, %v6610_v51  ;;  %v269_v1 = vadd.s32 168, %v6595_v17  ;;  %vm2027_vm3 = vcmp.eq.s32.totalorder %v5186_v19, %v4253_v57 }
 0x19b   : > { %v2089_v37 = vadd.f32 %v5172_v21, %v6611_v52  ;;  %vm2134_vm13 = vcmp.eq.s32.totalorder %v5186_v19, %v4272_v54  ;;  %v2196_v20 = vadd.f32 %v5174_v11, %v6612_v6  ;;  %v1524_v28 = vsel %vm1492_vm1, %v5216_v12, 0.0  ;;  %v453_v52 = vpop.permute.xlu1 %452 }
 0x19c   : > { %v1631_v10 = vsel %vm1599_vm14, %v5216_v12, 0.0  ;;  %v1738_v34 = vsel %vm1706_vm5, %v5216_v12, 0.0  ;;  %v268_v30 = vadd.s32 160, %v6595_v17  ;;  %v5302_v24 = vadd.f32 %v1554_v26, %v1524_v28 }
 0x19d   : > { %v5304_v41 = vadd.f32 %v1661_v59, %v1631_v10  ;;  %v5306_v58 = vadd.f32 %v1768_v8, %v1738_v34  ;;  %v302_v21 = vadd.s32 %v6599_v46, %v269_v1  ;;  %v1845_v11 = vsel %vm1813_vm10, %v5216_v12, 0.0 }
 0x19e   : > { %v1952_v31 = vsel %vm1920_vm8, %v5216_v12, 0.0  ;;  %v2059_v43 = vsel %vm2027_vm3, %v5216_v12, 0.0  ;;  %v2166_v26 = vsel %vm2134_vm13, %v5216_v12, 0.0  ;;  %v5319_v39 = vadd.f32 %v1875_v60, %v1845_v11 }
 0x19f   : > { %v5321_v59 = vadd.f32 %v1982_v55, %v1952_v31  ;;  %v5323_v42 = vadd.f32 %v2089_v37, %v2059_v43  ;;  %v5325_v8 = vadd.f32 %v2196_v20, %v2166_v26  ;;  %v5328_v22 = vadd.s32 %v6599_v46, %v268_v30  ;;  %v5423_v55 = vld [vmem:[%s2684_s29 + $0x9] ss:$0 sm:$0xff] }
 0x1a0   : > { %v593_v51 = vadd.f32 %v592_v62, %v5190_v14  ;;  %v700_v19 = vadd.f32 %v699_v15, %v5192_v32  ;;  %v807_v1 = vadd.f32 %v806_v33, %v5194_v29  ;;  %vm532_vm15 = vcmp.eq.s32.totalorder %v302_v21, %v4293_v63  ;;  %v6614_v43 = vld [vmem:[#allocation26_spill] sm:$0xff] }
 0x1a1   : > { %vm639_vm9 = vcmp.eq.s32.totalorder %v302_v21, %v4298_v9  ;;  %v914_v12 = vadd.f32 %v913_v47, %v5197_v7  ;;  %v1021_v60 = vadd.f32 %v1020_v18, %v5199_v25  ;;  %vm746_vm0 = vcmp.eq.s32.totalorder %v302_v21, %v4303_v61 }
 0x1a2   : > { %vm853_vm6 = vcmp.eq.s32.totalorder %v302_v21, %v4322_v27  ;;  %vm960_vm12 = vcmp.eq.s32.totalorder %v302_v21, %v4327_v44  ;;  %vm1067_vm7 = vcmp.eq.s32.totalorder %v302_v21, %v4332_v45  ;;  %v1128_v14 = vadd.f32 %v1127_v5, %v5201_v2 }
 0x1a3   : > { %v1235_v32 = vadd.f32 %v1234_v35, %v5204_v48  ;;  %v1342_v29 = vadd.f32 %v1341_v4, %v5213_v0  ;;  %v5345_v33 = vadd.f32 %v1448_v53, %v5222_v49  ;;  %v5347_v7 = vsel %vm532_vm15, %v453_v52, 0.0  ;;  %v5418_v4 = vld [vmem:[%s2684_s29 + $0x8] ss:$0 sm:$0xff] }
 0x1a4   : > { %v5349_v25 = vsel %vm639_vm9, %v453_v52, 0.0  ;;  %vm1174_vm11 = vcmp.eq.s32.totalorder %v302_v21, %v4133_v23  ;;  %vm1281_vm2 = vcmp.eq.s32.totalorder %v302_v21, %v4148_v16  ;;  %v5353_v47 = vsel %vm746_vm0, %v453_v52, 0.0  ;;  %v5373_v16 = vpop.permute.xlu0 %447 }
 0x1a5   : > { %v5355_v62 = vsel %vm853_vm6, %v453_v52, 0.0  ;;  %v5357_v2 = vsel %vm960_vm12, %v453_v52, 0.0  ;;  %v5359_v48 = vsel %vm1067_vm7, %v453_v52, 0.0  ;;  %vm1388_vm4 = vcmp.eq.s32.totalorder %v302_v21, %v4153_v40 }
 0x1a6   : > { %vm1495_vm1 = vcmp.eq.s32.totalorder %v302_v21, %v4192_v3  ;;  %vm1602_vm14 = vcmp.eq.s32.totalorder %v302_v21, %v4197_v36  ;;  %vm1709_vm5 = vcmp.eq.s32.totalorder %v302_v21, %v4224_v50  ;;  %v5365_v0 = vsel %vm1174_vm11, %v453_v52, 0.0 }
 0x1a7   : > { %v5367_v23 = vsel %vm1281_vm2, %v453_v52, 0.0  ;;  %vm1816_vm10 = vcmp.eq.s32.totalorder %v302_v21, %v4243_v13  ;;  %vm1923_vm8 = vcmp.eq.s32.totalorder %v302_v21, %v4248_v56  ;;  %vm2030_vm3 = vcmp.eq.s32.totalorder %v302_v21, %v4253_v57 }
 0x1a8   : > { %vm2137_vm13 = vcmp.eq.s32.totalorder %v302_v21, %v4272_v54  ;;  %vm531_vm15 = vcmp.eq.s32.totalorder %v5328_v22, %v4293_v63  ;;  %vm638_vm9 = vcmp.eq.s32.totalorder %v5328_v22, %v4298_v9  ;;  %v5379_v40 = vsel %vm1388_vm4, %v453_v52, 0.0 }
 0x1a9   : > { %v5381_v3 = vsel %vm1495_vm1, %v453_v52, 0.0  ;;  %v5383_v13 = vsel %vm1602_vm14, %v453_v52, 0.0  ;;  %v5385_v36 = vsel %vm1709_vm5, %v453_v52, 0.0  ;;  %v5387_v50 = vsel %vm1816_vm10, %v453_v52, 0.0 }
 0x1aa   : > { %v5389_v54 = vsel %vm1923_vm8, %v453_v52, 0.0  ;;  %vm745_vm0 = vcmp.eq.s32.totalorder %v5328_v22, %v4303_v61  ;;  %vm852_vm6 = vcmp.eq.s32.totalorder %v5328_v22, %v4322_v27  ;;  %v5395_v56 = vsel %vm2030_vm3, %v453_v52, 0.0  ;;  %v5406_v61 = vld [vmem:[%s2684_s29 + $0x6] ss:$0 sm:$0xff]  ;;  %v5411_v27 = vld [vmem:[%s2684_s29 + $0x7] ss:$0 sm:$0xff] }
 0x1ab   : > { %v5397_v57 = vsel %vm2137_vm13, %v453_v52, 0.0  ;;  %v563_v63 = vsel %vm531_vm15, %v5373_v16, 0.0  ;;  %v670_v9 = vsel %vm638_vm9, %v5373_v16, 0.0  ;;  %vm959_vm12 = vcmp.eq.s32.totalorder %v5328_v22, %v4327_v44  ;;  %v5456_v52 = vld [vmem:[%s2684_s29 + $0xc] ss:$0 sm:$0xff] }
 0x1ac   : > { %vm1066_vm7 = vcmp.eq.s32.totalorder %v5328_v22, %v4332_v45  ;;  %vm1173_vm11 = vcmp.eq.s32.totalorder %v5328_v22, %v5406_v61  ;;  %vm1280_vm2 = vcmp.eq.s32.totalorder %v5328_v22, %v5411_v27  ;;  %v594_v49 = vadd.f32 %v593_v51, %v563_v63  ;;  %v5442_v45 = vld [vmem:[%s2684_s29 + $0xa] ss:$0 sm:$0xff]  ;;  %v5449_v51 = vld [vmem:[%s2684_s29 + $0xb] ss:$0 sm:$0xff]  ;;  %v5478_v63 = vld [vmem:[%s2684_s29 + $0xf] ss:$0 sm:$0xff] }
 0x1ad   : > { %v701_v53 = vadd.f32 %v700_v19, %v670_v9  ;;  %v777_v15 = vsel %vm745_vm0, %v5373_v16, 0.0  ;;  %v884_v18 = vsel %vm852_vm6, %v5373_v16, 0.0  ;;  %vm1387_vm4 = vcmp.eq.s32.totalorder %v5328_v22, %v5418_v4  ;;  %6613 = vst [vmem:[#allocation18_spill] sm:$0xff] %v5442_v45  ;;  %v6615_v19 = vld [vmem:[#allocation10_spill] sm:$0xff] }
 0x1ae   : > { %v808_v5 = vadd.f32 %v807_v1, %v777_v15  ;;  %v915_v35 = vadd.f32 %v914_v12, %v884_v18  ;;  %vm1494_vm1 = vcmp.eq.s32.totalorder %v5328_v22, %v5423_v55  ;;  %v991_v37 = vsel %vm959_vm12, %v5373_v16, 0.0  ;;  %v5463_v12 = vld [vmem:[%s2684_s29 + $0xd] ss:$0 sm:$0xff] }
 0x1af   : > { %v1098_v6 = vsel %vm1066_vm7, %v5373_v16, 0.0  ;;  %v1205_v20 = vsel %vm1173_vm11, %v5373_v16, 0.0  ;;  %v1312_v28 = vsel %vm1280_vm2, %v5373_v16, 0.0  ;;  %v1022_v10 = vadd.f32 %v1021_v60, %v991_v37 }
 0x1b0   : > { %v1129_v34 = vadd.f32 %v1128_v14, %v1098_v6  ;;  %v1236_v30 = vadd.f32 %v1235_v32, %v1205_v20  ;;  %v1343_v21 = vadd.f32 %v1342_v29, %v1312_v28  ;;  %v1419_v11 = vsel %vm1387_vm4, %v5373_v16, 0.0  ;;  %v5471_v32 = vld [vmem:[%s2684_s29 + $0xe] ss:$0 sm:$0xff] }
 0x1b1   : > { %v1526_v44 = vsel %vm1494_vm1, %v5373_v16, 0.0  ;;  %v1556_v31 = vadd.f32 %v5302_v24, %v5224_v38  ;;  %vm1601_vm14 = vcmp.eq.s32.totalorder %v5328_v22, %v5442_v45  ;;  %v1663_v26 = vadd.f32 %v5304_v41, %v6614_v43  ;;  %v6616_v38 = vld [vmem:[#allocation16_spill] sm:$0xff]  ;;  %v6617_v41 = vld [vmem:[#allocation17_spill] sm:$0xff] }
 0x1b2   : > { %vm1708_vm5 = vcmp.eq.s32.totalorder %v5328_v22, %v5449_v51  ;;  %v1770_v1 = vadd.f32 %v5306_v58, %v6615_v19  ;;  %vm1815_vm10 = vcmp.eq.s32.totalorder %v5328_v22, %v5456_v52  ;;  %v1877_v24 = vadd.f32 %v5319_v39, %v6616_v38  ;;  %v6618_v58 = vld [vmem:[#allocation27_spill] sm:$0xff]  ;;  %v6619_v39 = vld [vmem:[#allocation28_spill] sm:$0xff] }
 0x1b3   : > { %vm1922_vm8 = vcmp.eq.s32.totalorder %v5328_v22, %v5463_v12  ;;  %v1984_v60 = vadd.f32 %v5321_v59, %v6617_v41  ;;  %v271_v14 = vadd.s32 184, %v6595_v17  ;;  %vm2029_vm3 = vcmp.eq.s32.totalorder %v5328_v22, %v5471_v32  ;;  %v5528_v41 = vld [vmem:[%s2684_s29] ss:$0 sm:$0xff] }
 0x1b4   : > { %v2091_v29 = vadd.f32 %v5323_v42, %v6618_v58  ;;  %vm2136_vm13 = vcmp.eq.s32.totalorder %v5328_v22, %v5478_v63  ;;  %v2198_v9 = vadd.f32 %v5325_v8, %v6619_v39  ;;  %v1450_v59 = vadd.f32 %v5345_v33, %v1419_v11 }
 0x1b5   : > { %v1633_v15 = vsel %vm1601_vm14, %v5373_v16, 0.0  ;;  %v1740_v42 = vsel %vm1708_vm5, %v5373_v16, 0.0  ;;  %v270_v18 = vadd.s32 176, %v6595_v17  ;;  %v5494_v37 = vadd.f32 %v1556_v31, %v1526_v44 }
 0x1b6   : > { %v5496_v6 = vadd.f32 %v1663_v26, %v1633_v15  ;;  %v5498_v8 = vadd.f32 %v1770_v1, %v1740_v42  ;;  %v5501_v33 = vadd.s32 %v6599_v46, %v271_v14  ;;  %v1847_v20 = vsel %vm1815_vm10, %v5373_v16, 0.0 }
 0x1b7   : > { %v1954_v28 = vsel %vm1922_vm8, %v5373_v16, 0.0  ;;  %v2061_v11 = vsel %vm2029_vm3, %v5373_v16, 0.0  ;;  %v2168_v44 = vsel %vm2136_vm13, %v5373_v16, 0.0  ;;  %v5513_v31 = vadd.f32 %v1877_v24, %v1847_v20  ;;  %v463_v24 = vpop.permute.xlu1 %462 }
 0x1b8   : > { %v5515_v43 = vadd.f32 %v1984_v60, %v1954_v28  ;;  %v5517_v26 = vadd.f32 %v2091_v29, %v2061_v11  ;;  %v5519_v19 = vadd.f32 %v2198_v9, %v2168_v44  ;;  %v5522_v1 = vadd.s32 %v6599_v46, %v270_v18  ;;  %v5533_v60 = vld [vmem:[%s2684_s29 + $0x1] ss:$0 sm:$0xff] }
 0x1b9   : > { %v595_v22 = vadd.f32 %v594_v49, %v5347_v7  ;;  %v702_v38 = vadd.f32 %v701_v53, %v5349_v25  ;;  %v809_v16 = vadd.f32 %v808_v5, %v5353_v47  ;;  %vm534_vm15 = vcmp.eq.s32.totalorder %v5501_v33, %v5528_v41  ;;  %v5540_v49 = vld [vmem:[%s2684_s29 + $0x2] ss:$0 sm:$0xff]  ;;  %v5545_v25 = vld [vmem:[%s2684_s29 + $0x3] ss:$0 sm:$0xff]  ;;  %v5550_v47 = vld [vmem:[%s2684_s29 + $0x4] ss:$0 sm:$0xff] }
 0x1ba   : > { %vm641_vm9 = vcmp.eq.s32.totalorder %v5501_v33, %v5533_v60  ;;  %v916_v14 = vadd.f32 %v915_v35, %v5355_v62  ;;  %v1023_v7 = vadd.f32 %v1022_v10, %v5357_v2  ;;  %vm748_vm0 = vcmp.eq.s32.totalorder %v5501_v33, %v5540_v49  ;;  %v5555_v53 = vld [vmem:[%s2684_s29 + $0x5] ss:$0 sm:$0xff] }
 0x1bb   : > { %vm855_vm6 = vcmp.eq.s32.totalorder %v5501_v33, %v5545_v25  ;;  %vm962_vm12 = vcmp.eq.s32.totalorder %v5501_v33, %v5550_v47  ;;  %vm1069_vm7 = vcmp.eq.s32.totalorder %v5501_v33, %v5555_v53  ;;  %v1130_v62 = vadd.f32 %v1129_v34, %v5359_v48 }
 0x1bc   : > { %v1237_v2 = vadd.f32 %v1236_v30, %v5365_v0  ;;  %v1344_v5 = vadd.f32 %v1343_v21, %v5367_v23  ;;  %v5563_v35 = vadd.f32 %v1450_v59, %v5379_v40  ;;  %v5568_v10 = vsel %vm534_vm15, %v463_v24, 0.0  ;;  %v458_v21 = vpop.permute.xlu0 %457 }
 0x1bd   : > { %v5573_v58 = vsel %vm641_vm9, %v463_v24, 0.0  ;;  %vm1176_vm11 = vcmp.eq.s32.totalorder %v5501_v33, %v5406_v61  ;;  %vm1283_vm2 = vcmp.eq.s32.totalorder %v5501_v33, %v5411_v27  ;;  %v5579_v48 = vsel %vm748_vm0, %v463_v24, 0.0 }
 0x1be   : > { %v5581_v0 = vsel %vm855_vm6, %v463_v24, 0.0  ;;  %v5583_v23 = vsel %vm962_vm12, %v463_v24, 0.0  ;;  %v5585_v40 = vsel %vm1069_vm7, %v463_v24, 0.0  ;;  %vm1390_vm4 = vcmp.eq.s32.totalorder %v5501_v33, %v5418_v4 }
 0x1bf   : > { %6620 = vst [vmem:[#allocation29_spill] sm:$0xff] %v5585_v40  ;;  %vm1497_vm1 = vcmp.eq.s32.totalorder %v5501_v33, %v5423_v55  ;;  %vm1604_vm14 = vcmp.eq.s32.totalorder %v5501_v33, %v5442_v45  ;;  %vm1711_vm5 = vcmp.eq.s32.totalorder %v5501_v33, %v5449_v51  ;;  %v5595_v34 = vsel %vm1176_vm11, %v463_v24, 0.0 }
 0x1c0   : > { %6621 = vst [vmem:[#allocation30_spill] sm:$0xff] %v5595_v34  ;;  %v5597_v30 = vsel %vm1283_vm2, %v463_v24, 0.0  ;;  %vm1818_vm10 = vcmp.eq.s32.totalorder %v5501_v33, %v5456_v52  ;;  %vm1925_vm8 = vcmp.eq.s32.totalorder %v5501_v33, %v5463_v12  ;;  %vm2032_vm3 = vcmp.eq.s32.totalorder %v5501_v33, %v5471_v32 }
 0x1c1   : > { %6622 = vst [vmem:[#allocation31_spill] sm:$0xff] %v5597_v30  ;;  %vm2139_vm13 = vcmp.eq.s32.totalorder %v5501_v33, %v5478_v63  ;;  %vm533_vm15 = vcmp.eq.s32.totalorder %v5522_v1, %v5528_v41  ;;  %vm640_vm9 = vcmp.eq.s32.totalorder %v5522_v1, %v5533_v60  ;;  %v5611_v29 = vsel %vm1390_vm4, %v463_v24, 0.0 }
 0x1c2   : > { %6623 = vst [vmem:[#allocation19_spill] sm:$0xff] %v5611_v29  ;;  %v5613_v39 = vsel %vm1497_vm1, %v463_v24, 0.0  ;;  %v5615_v9 = vsel %vm1604_vm14, %v463_v24, 0.0  ;;  %v5617_v59 = vsel %vm1711_vm5, %v463_v24, 0.0  ;;  %v5619_v15 = vsel %vm1818_vm10, %v463_v24, 0.0 }
 0x1c3   : > { %6624 = vst [vmem:[#allocation32_spill] sm:$0xff] %v5613_v39  ;;  %6625 = vst [vmem:[#allocation11_spill] sm:$0xff] %v5615_v9  ;;  %v5621_v42 = vsel %vm1925_vm8, %v463_v24, 0.0  ;;  %vm747_vm0 = vcmp.eq.s32.totalorder %v5522_v1, %v5540_v49  ;;  %vm854_vm6 = vcmp.eq.s32.totalorder %v5522_v1, %v5545_v25  ;;  %v5627_v18 = vsel %vm2032_vm3, %v463_v24, 0.0 }
 0x1c4   : > { %6626 = vst [vmem:[#allocation20_spill] sm:$0xff] %v5617_v59  ;;  %6627 = vst [vmem:[#allocation21_spill] sm:$0xff] %v5619_v15  ;;  %v5629_v33 = vsel %vm2139_vm13, %v463_v24, 0.0  ;;  %v565_v20 = vsel %vm533_vm15, %v458_v21, 0.0  ;;  %v672_v28 = vsel %vm640_vm9, %v458_v21, 0.0  ;;  %vm961_vm12 = vcmp.eq.s32.totalorder %v5522_v1, %v5550_v47 }
 0x1c5   : > { %6628 = vst [vmem:[#allocation33_spill] sm:$0xff] %v5621_v42  ;;  %6629 = vst [vmem:[#allocation34_spill] sm:$0xff] %v5627_v18  ;;  %vm1068_vm7 = vcmp.eq.s32.totalorder %v5522_v1, %v5555_v53  ;;  %vm1175_vm11 = vcmp.eq.s32.totalorder %v5522_v1, %v5406_v61  ;;  %vm1282_vm2 = vcmp.eq.s32.totalorder %v5522_v1, %v5411_v27  ;;  %v779_v42 = vsel %vm747_vm0, %v458_v21, 0.0 }
 0x1c6   : > { %6630 = vst [vmem:[#allocation35_spill] sm:$0xff] %v5629_v33  ;;  %v596_v11 = vadd.f32 %v595_v22, %v565_v20  ;;  %v703_v44 = vadd.f32 %v702_v38, %v672_v28  ;;  %v886_v18 = vsel %vm854_vm6, %v458_v21, 0.0  ;;  %v810_v24 = vadd.f32 %v809_v16, %v779_v42  ;;  %v473_v20 = vpop.permute.xlu1 %472 }
 0x1c7   : > { %v917_v33 = vadd.f32 %v916_v14, %v886_v18  ;;  %vm1389_vm4 = vcmp.eq.s32.totalorder %v5522_v1, %v5418_v4  ;;  %vm1496_vm1 = vcmp.eq.s32.totalorder %v5522_v1, %v5423_v55  ;;  %v993_v15 = vsel %vm961_vm12, %v458_v21, 0.0 }
 0x1c8   : > { %v1100_v59 = vsel %vm1068_vm7, %v458_v21, 0.0  ;;  %v1207_v9 = vsel %vm1175_vm11, %v458_v21, 0.0  ;;  %v1314_v39 = vsel %vm1282_vm2, %v458_v21, 0.0  ;;  %v1024_v29 = vadd.f32 %v1023_v7, %v993_v15 }
 0x1c9   : > { %v1131_v30 = vadd.f32 %v1130_v62, %v1100_v59  ;;  %v1238_v34 = vadd.f32 %v1237_v2, %v1207_v9  ;;  %v1345_v40 = vadd.f32 %v1344_v5, %v1314_v39  ;;  %v1421_v22 = vsel %vm1389_vm4, %v458_v21, 0.0 }
 0x1ca   : > { %v1528_v38 = vsel %vm1496_vm1, %v458_v21, 0.0  ;;  %v1558_v16 = vadd.f32 %v5494_v37, %v5381_v3  ;;  %vm1603_vm14 = vcmp.eq.s32.totalorder %v5522_v1, %v5442_v45  ;;  %v1665_v14 = vadd.f32 %v5496_v6, %v5383_v13 }
 0x1cb   : > { %vm1710_vm5 = vcmp.eq.s32.totalorder %v5522_v1, %v5449_v51  ;;  %v1772_v7 = vadd.f32 %v5498_v8, %v5385_v36  ;;  %vm1817_vm10 = vcmp.eq.s32.totalorder %v5522_v1, %v5456_v52  ;;  %v1879_v62 = vadd.f32 %v5513_v31, %v5387_v50 }
 0x1cc   : > { %vm1924_vm8 = vcmp.eq.s32.totalorder %v5522_v1, %v5463_v12  ;;  %v1986_v3 = vadd.f32 %v5515_v43, %v5389_v54  ;;  %v273_v13 = vadd.s32 200, %v6595_v17  ;;  %vm2031_vm3 = vcmp.eq.s32.totalorder %v5522_v1, %v5471_v32 }
 0x1cd   : > { %v2093_v36 = vadd.f32 %v5517_v26, %v5395_v56  ;;  %vm2138_vm13 = vcmp.eq.s32.totalorder %v5522_v1, %v5478_v63  ;;  %v2200_v50 = vadd.f32 %v5519_v19, %v5397_v57  ;;  %v1452_v37 = vadd.f32 %v5563_v35, %v1421_v22 }
 0x1ce   : > { %v1635_v6 = vsel %vm1603_vm14, %v458_v21, 0.0  ;;  %v1742_v8 = vsel %vm1710_vm5, %v458_v21, 0.0  ;;  %v272_v54 = vadd.s32 192, %v6595_v17  ;;  %v5672_v31 = vadd.f32 %v1558_v16, %v1528_v38 }
 0x1cf   : > { %v5674_v43 = vadd.f32 %v1665_v14, %v1635_v6  ;;  %v5676_v2 = vadd.f32 %v1772_v7, %v1742_v8  ;;  %v306_v56 = vadd.s32 %v6599_v46, %v273_v13  ;;  %v1849_v26 = vsel %vm1817_vm10, %v458_v21, 0.0 }
 0x1d0   : > { %v1956_v57 = vsel %vm1924_vm8, %v458_v21, 0.0  ;;  %v2063_v19 = vsel %vm2031_vm3, %v458_v21, 0.0  ;;  %v2170_v5 = vsel %vm2138_vm13, %v458_v21, 0.0  ;;  %v5685_v35 = vadd.f32 %v1879_v62, %v1849_v26 }
 0x1d1   : > { %v5687_v39 = vadd.f32 %v1986_v3, %v1956_v57  ;;  %v5689_v9 = vadd.f32 %v2093_v36, %v2063_v19  ;;  %v5691_v59 = vadd.f32 %v2200_v50, %v2170_v5  ;;  %v5694_v15 = vadd.s32 %v6599_v46, %v272_v54 }
 0x1d2   : > { %v597_v42 = vadd.f32 %v596_v11, %v5568_v10  ;;  %v704_v18 = vadd.f32 %v703_v44, %v5573_v58  ;;  %v811_v1 = vadd.f32 %v810_v24, %v5579_v48  ;;  %vm536_vm15 = vcmp.eq.s32.totalorder %v306_v56, %v5528_v41  ;;  %v6631_v10 = vld [vmem:[#allocation29_spill] sm:$0xff]  ;;  %v6632_v48 = vld [vmem:[#allocation30_spill] sm:$0xff] }
 0x1d3   : > { %vm643_vm9 = vcmp.eq.s32.totalorder %v306_v56, %v5533_v60  ;;  %v918_v21 = vadd.f32 %v917_v33, %v5581_v0  ;;  %v1025_v28 = vadd.f32 %v1024_v29, %v5583_v23  ;;  %vm750_vm0 = vcmp.eq.s32.totalorder %v306_v56, %v5540_v49  ;;  %v6633_v23 = vld [vmem:[#allocation31_spill] sm:$0xff] }
 0x1d4   : > { %vm857_vm6 = vcmp.eq.s32.totalorder %v306_v56, %v5545_v25  ;;  %vm964_vm12 = vcmp.eq.s32.totalorder %v306_v56, %v5550_v47  ;;  %vm1071_vm7 = vcmp.eq.s32.totalorder %v306_v56, %v5555_v53  ;;  %vm1178_vm11 = vcmp.eq.s32.totalorder %v306_v56, %v5406_v61  ;;  %v6634_v33 = vld [vmem:[#allocation19_spill] sm:$0xff] }
 0x1d5   : > { %vm1285_vm2 = vcmp.eq.s32.totalorder %v306_v56, %v5411_v27  ;;  %v1132_v58 = vadd.f32 %v1131_v30, %v6631_v10  ;;  %v1239_v11 = vadd.f32 %v1238_v34, %v6632_v48  ;;  %v5711_v44 = vsel %vm536_vm15, %v473_v20, 0.0 }
 0x1d6   : > { %v5713_v0 = vsel %vm643_vm9, %v473_v20, 0.0  ;;  %v1346_v29 = vadd.f32 %v1345_v40, %v6633_v23  ;;  %v1453_v24 = vadd.f32 %v1452_v37, %v6634_v33  ;;  %v5717_v22 = vsel %vm750_vm0, %v473_v20, 0.0  ;;  %v5737_v40 = vpop.permute.xlu0 %467 }
 0x1d7   : > { %v5719_v38 = vsel %vm857_vm6, %v473_v20, 0.0  ;;  %v5721_v16 = vsel %vm964_vm12, %v473_v20, 0.0  ;;  %v5723_v14 = vsel %vm1071_vm7, %v473_v20, 0.0  ;;  %v5725_v7 = vsel %vm1178_vm11, %v473_v20, 0.0 }
 0x1d8   : > { %v5727_v30 = vsel %vm1285_vm2, %v473_v20, 0.0  ;;  %vm1392_vm4 = vcmp.eq.s32.totalorder %v306_v56, %v5418_v4  ;;  %vm1499_vm1 = vcmp.eq.s32.totalorder %v306_v56, %v5423_v55  ;;  %vm1606_vm14 = vcmp.eq.s32.totalorder %v306_v56, %v5442_v45 }
 0x1d9   : > { %vm1713_vm5 = vcmp.eq.s32.totalorder %v306_v56, %v5449_v51  ;;  %vm1820_vm10 = vcmp.eq.s32.totalorder %v306_v56, %v5456_v52  ;;  %vm1927_vm8 = vcmp.eq.s32.totalorder %v306_v56, %v5463_v12  ;;  %vm2034_vm3 = vcmp.eq.s32.totalorder %v306_v56, %v5471_v32 }
 0x1da   : > { %vm2141_vm13 = vcmp.eq.s32.totalorder %v306_v56, %v5478_v63  ;;  %vm535_vm15 = vcmp.eq.s32.totalorder %v5694_v15, %v5528_v41  ;;  %vm642_vm9 = vcmp.eq.s32.totalorder %v5694_v15, %v5533_v60  ;;  %v5743_v34 = vsel %vm1392_vm4, %v473_v20, 0.0 }
 0x1db   : > { %v5745_v62 = vsel %vm1499_vm1, %v473_v20, 0.0  ;;  %vm749_vm0 = vcmp.eq.s32.totalorder %v5694_v15, %v5540_v49  ;;  %vm856_vm6 = vcmp.eq.s32.totalorder %v5694_v15, %v5545_v25  ;;  %v5751_v3 = vsel %vm1606_vm14, %v473_v20, 0.0 }
 0x1dc   : > { %6635 = vst [vmem:[#allocation8_spill] sm:$0xff] %v5751_v3  ;;  %v5753_v13 = vsel %vm1713_vm5, %v473_v20, 0.0  ;;  %v5755_v36 = vsel %vm1820_vm10, %v473_v20, 0.0  ;;  %v5757_v50 = vsel %vm1927_vm8, %v473_v20, 0.0  ;;  %v5759_v37 = vsel %vm2034_vm3, %v473_v20, 0.0 }
 0x1dd   : > { %6636 = vst [vmem:[#allocation36_spill] sm:$0xff] %v5753_v13  ;;  %6637 = vst [vmem:[#allocation37_spill] sm:$0xff] %v5755_v36  ;;  %v5761_v6 = vsel %vm2141_vm13, %v473_v20, 0.0  ;;  %v567_v8 = vsel %vm535_vm15, %v5737_v40, 0.0  ;;  %v674_v54 = vsel %vm642_vm9, %v5737_v40, 0.0  ;;  %v781_v56 = vsel %vm749_vm0, %v5737_v40, 0.0 }
 0x1de   : > { %6638 = vst [vmem:[#allocation12_spill] sm:$0xff] %v5757_v50  ;;  %6639 = vst [vmem:[#allocation9_spill] sm:$0xff] %v5759_v37  ;;  %v888_v26 = vsel %vm856_vm6, %v5737_v40, 0.0  ;;  %vm963_vm12 = vcmp.eq.s32.totalorder %v5694_v15, %v5550_v47  ;;  %vm1070_vm7 = vcmp.eq.s32.totalorder %v5694_v15, %v5555_v53  ;;  %v598_v57 = vadd.f32 %v597_v42, %v567_v8  ;;  %v6641_v20 = vld [vmem:[#allocation32_spill] sm:$0xff] }
 0x1df   : > { %6640 = vst [vmem:[#allocation13_spill] sm:$0xff] %v5761_v6  ;;  %v5771_v19 = vadd.f32 %v704_v18, %v674_v54  ;;  %vm1177_vm11 = vcmp.eq.s32.totalorder %v5694_v15, %v5406_v61  ;;  %vm1284_vm2 = vcmp.eq.s32.totalorder %v5694_v15, %v5411_v27  ;;  %v5777_v5 = vadd.f32 %v811_v1, %v781_v56 }
 0x1e0   : > { %vm1391_vm4 = vcmp.eq.s32.totalorder %v5694_v15, %v5418_v4  ;;  %vm1498_vm1 = vcmp.eq.s32.totalorder %v5694_v15, %v5423_v55  ;;  %v1560_v10 = vadd.f32 %v5672_v31, %v6641_v20  ;;  %v5785_v42 = vadd.f32 %v918_v21, %v888_v26 }
 0x1e1   : > { %v995_v18 = vsel %vm963_vm12, %v5737_v40, 0.0  ;;  %v1102_v48 = vsel %vm1070_vm7, %v5737_v40, 0.0  ;;  %vm1605_vm14 = vcmp.eq.s32.totalorder %v5694_v15, %v5442_v45  ;;  %v1209_v33 = vsel %vm1177_vm11, %v5737_v40, 0.0 }
 0x1e2   : > { %v5791_v1 = vadd.f32 %v1025_v28, %v995_v18  ;;  %v5793_v23 = vadd.f32 %v1132_v58, %v1102_v48  ;;  %v1316_v8 = vsel %vm1284_vm2, %v5737_v40, 0.0  ;;  %v5797_v54 = vadd.f32 %v1239_v11, %v1209_v33  ;;  %v6642_v58 = vld [vmem:[#allocation11_spill] sm:$0xff]  ;;  %v6643_v11 = vld [vmem:[#allocation20_spill] sm:$0xff]  ;;  %v6645_v33 = vld [vmem:[#allocation33_spill] sm:$0xff] }
 0x1e3   : > { %v5799_v31 = vadd.f32 %v1346_v29, %v1316_v8  ;;  %v1423_v21 = vsel %vm1391_vm4, %v5737_v40, 0.0  ;;  %v1530_v56 = vsel %vm1498_vm1, %v5737_v40, 0.0  ;;  %v1637_v28 = vsel %vm1605_vm14, %v5737_v40, 0.0  ;;  %v6646_v8 = vld [vmem:[#allocation34_spill] sm:$0xff] }
 0x1e4   : > { %v5803_v26 = vadd.f32 %v1453_v24, %v1423_v21  ;;  %v5805_v20 = vadd.f32 %v1560_v10, %v1530_v56  ;;  %v1667_v18 = vadd.f32 %v5674_v43, %v6642_v58  ;;  %vm1712_vm5 = vcmp.eq.s32.totalorder %v5694_v15, %v5449_v51  ;;  %v6644_v24 = vld [vmem:[#allocation21_spill] sm:$0xff]  ;;  %v6647_v21 = vld [vmem:[#allocation35_spill] sm:$0xff] }
 0x1e5   : > { %v1774_v29 = vadd.f32 %v5676_v2, %v6643_v11  ;;  %vm1819_vm10 = vcmp.eq.s32.totalorder %v5694_v15, %v5456_v52  ;;  %v274_v48 = vadd.s32 208, %v6595_v17  ;;  %v1881_v10 = vadd.f32 %v5685_v35, %v6644_v24  ;;  %v5835_v24 = vpop.permute.xlu1 %482 }
 0x1e6   : > { %vm1926_vm8 = vcmp.eq.s32.totalorder %v5694_v15, %v5463_v12  ;;  %v1988_v43 = vadd.f32 %v5687_v39, %v6645_v33  ;;  %vm2033_vm3 = vcmp.eq.s32.totalorder %v5694_v15, %v5471_v32  ;;  %v2095_v2 = vadd.f32 %v5689_v9, %v6646_v8 }
 0x1e7   : > { %vm2140_vm13 = vcmp.eq.s32.totalorder %v5694_v15, %v5478_v63  ;;  %v2202_v56 = vadd.f32 %v5691_v59, %v6647_v21  ;;  %v279_v35 = vadd.s32 248, %v6595_v17  ;;  %v5832_v58 = vadd.f32 %v1667_v18, %v1637_v28 }
 0x1e8   : > { %v1744_v11 = vsel %vm1712_vm5, %v5737_v40, 0.0  ;;  %v275_v39 = vadd.s32 216, %v6595_v17  ;;  %v276_v33 = vadd.s32 224, %v6595_v17  ;;  %v1851_v9 = vsel %vm1819_vm10, %v5737_v40, 0.0 }
 0x1e9   : > { %6648 = vst [vmem:[#allocation14_spill] sm:$0xff] %v5832_v58  ;;  %v5839_v6 = vadd.f32 %v1774_v29, %v1744_v11  ;;  %v307_v59 = vadd.s32 %v6599_v46, %v274_v48  ;;  %v277_v28 = vadd.s32 232, %v6595_v17  ;;  %v5847_v18 = vadd.f32 %v1881_v10, %v1851_v9 }
 0x1ea   : > { %v1958_v8 = vsel %vm1926_vm8, %v5737_v40, 0.0  ;;  %v2065_v29 = vsel %vm2033_vm3, %v5737_v40, 0.0  ;;  %v2172_v21 = vsel %vm2140_vm13, %v5737_v40, 0.0  ;;  %v5865_v10 = vadd.s32 %v6599_v46, %v279_v35  ;;  %v478_v40 = vpop.permute.xlu0 %477 }
 0x1eb   : > { %6649 = vst [vmem:[#allocation22_spill] sm:$0xff] %v5839_v6  ;;  %6650 = vst [vmem:[#allocation23_spill] sm:$0xff] %v5847_v18  ;;  %v5858_v11 = vadd.f32 %v1988_v43, %v1958_v8  ;;  %v5860_v37 = vadd.f32 %v2095_v2, %v2065_v29  ;;  %v5862_v48 = vadd.f32 %v2202_v56, %v2172_v21  ;;  %v278_v9 = vadd.s32 240, %v6595_v17  ;;  %v5885_v17 = vpop.permute.xlu1 %492 }
 0x1ec   : > { %v5869_v50 = vadd.s32 %v6599_v46, %v275_v39  ;;  %v5872_v18 = vadd.s32 %v6599_v46, %v276_v33  ;;  %v599_v15 = vadd.f32 %v598_v57, %v5711_v44  ;;  %vm537_vm15 = vcmp.eq.s32.totalorder %v307_v59, %v5528_v41 }
 0x1ed   : > { %6651 = vst [vmem:[#allocation24_spill] sm:$0xff] %v5858_v11  ;;  %6652 = vst [vmem:[#allocation15_spill] sm:$0xff] %v5860_v37  ;;  %vm644_vm9 = vcmp.eq.s32.totalorder %v307_v59, %v5533_v60  ;;  %vm751_vm0 = vcmp.eq.s32.totalorder %v307_v59, %v5540_v49  ;;  %v5879_v43 = vadd.s32 %v6599_v46, %v277_v28  ;;  %v569_v57 = vsel %vm537_vm15, %v478_v40, 0.0 }
 0x1ee   : > { %6653 = vst [vmem:[#allocation25_spill] sm:$0xff] %v5862_v48  ;;  %vm858_vm6 = vcmp.eq.s32.totalorder %v307_v59, %v5545_v25  ;;  %vm965_vm12 = vcmp.eq.s32.totalorder %v307_v59, %v5550_v47  ;;  %vm1072_vm7 = vcmp.eq.s32.totalorder %v307_v59, %v5555_v53  ;;  %vm1179_vm11 = vcmp.eq.s32.totalorder %v307_v59, %v5406_v61  ;;  %v5949_v6 = vpop.permute.xlu0 %487 }
 0x1ef   : > { %vm1286_vm2 = vcmp.eq.s32.totalorder %v307_v59, %v5411_v27  ;;  %vm1393_vm4 = vcmp.eq.s32.totalorder %v307_v59, %v5418_v4  ;;  %vm1500_vm1 = vcmp.eq.s32.totalorder %v307_v59, %v5423_v55  ;;  %v706_v44 = vadd.f32 %v5771_v19, %v5713_v0  ;;  %v5916_v19 = vpop.permute.xlu1 %502 }
 0x1f0   : > { %v676_v2 = vsel %vm644_vm9, %v478_v40, 0.0  ;;  %v5892_v56 = vsel %vm751_vm0, %v478_v40, 0.0  ;;  %vm1607_vm14 = vcmp.eq.s32.totalorder %v307_v59, %v5442_v45  ;;  %v5895_v35 = vsel %vm858_vm6, %v478_v40, 0.0 }
 0x1f1   : > { %v5897_v39 = vsel %vm965_vm12, %v478_v40, 0.0  ;;  %v5899_v33 = vsel %vm1072_vm7, %v478_v40, 0.0  ;;  %v5901_v28 = vsel %vm1179_vm11, %v478_v40, 0.0  ;;  %v5903_v8 = vsel %vm1286_vm2, %v478_v40, 0.0 }
 0x1f2   : > { %v5905_v29 = vsel %vm1393_vm4, %v478_v40, 0.0  ;;  %v5907_v21 = vsel %vm1500_vm1, %v478_v40, 0.0  ;;  %vm1714_vm5 = vcmp.eq.s32.totalorder %v307_v59, %v5449_v51  ;;  %v5910_v0 = vsel %vm1607_vm14, %v478_v40, 0.0 }
 0x1f3   : > { %6654 = vst [vmem:[#allocation26_spill] sm:$0xff] %v5907_v21  ;;  %6655 = vst [vmem:[#allocation10_spill] sm:$0xff] %v5910_v0  ;;  %vm1821_vm10 = vcmp.eq.s32.totalorder %v307_v59, %v5456_v52  ;;  %vm1928_vm8 = vcmp.eq.s32.totalorder %v307_v59, %v5463_v12  ;;  %vm2035_vm3 = vcmp.eq.s32.totalorder %v307_v59, %v5471_v32  ;;  %v5924_v48 = vsel %vm1714_vm5, %v478_v40, 0.0  ;;  %v6000_v21 = vpop.permute.xlu0 %497 }
 0x1f4   : > { %vm2142_vm13 = vcmp.eq.s32.totalorder %v307_v59, %v5478_v63  ;;  %vm542_vm15 = vcmp.eq.s32.totalorder %v5865_v10, %v5528_v41  ;;  %vm649_vm9 = vcmp.eq.s32.totalorder %v5865_v10, %v5533_v60  ;;  %vm756_vm0 = vcmp.eq.s32.totalorder %v5865_v10, %v5540_v49  ;;  %6656 = vst [vmem:[#allocation16_spill] sm:$0xff] %v5924_v48 }
 0x1f5   : > { %vm863_vm6 = vcmp.eq.s32.totalorder %v5865_v10, %v5545_v25  ;;  %vm970_vm12 = vcmp.eq.s32.totalorder %v5865_v10, %v5550_v47  ;;  %vm1077_vm7 = vcmp.eq.s32.totalorder %v5865_v10, %v5555_v53  ;;  %v5932_v32 = vsel %vm1821_vm10, %v478_v40, 0.0 }
 0x1f6   : > { %6657 = vst [vmem:[#allocation17_spill] sm:$0xff] %v5932_v32  ;;  %v5934_v63 = vsel %vm1928_vm8, %v478_v40, 0.0  ;;  %v5936_v59 = vsel %vm2035_vm3, %v478_v40, 0.0  ;;  %vm1184_vm11 = vcmp.eq.s32.totalorder %v5865_v10, %v5406_v61  ;;  %v5940_v37 = vsel %vm2142_vm13, %v478_v40, 0.0 }
 0x1f7   : > { %6658 = vst [vmem:[#allocation27_spill] sm:$0xff] %v5934_v63  ;;  %6659 = vst [vmem:[#allocation28_spill] sm:$0xff] %v5936_v59  ;;  %v574_v11 = vsel %vm542_vm15, %v5916_v19, 0.0  ;;  %v5944_v36 = vsel %vm649_vm9, %v5916_v19, 0.0  ;;  %v5947_v48 = vsel %vm756_vm0, %v5916_v19, 0.0  ;;  %v5952_v32 = vsel %vm863_vm6, %v5916_v19, 0.0 }
 0x1f8   : > { %6660 = vst [vmem:[#allocation29_spill] sm:$0xff] %v5940_v37  ;;  %v5955_v59 = vsel %vm970_vm12, %v5916_v19, 0.0  ;;  %v5958_v63 = vsel %vm1077_vm7, %v5916_v19, 0.0  ;;  %vm1291_vm2 = vcmp.eq.s32.totalorder %v5865_v10, %v5411_v27  ;;  %v5963_v40 = vsel %vm1184_vm11, %v5916_v19, 0.0 }
 0x1f9   : > { %vm1398_vm4 = vcmp.eq.s32.totalorder %v5865_v10, %v5418_v4  ;;  %vm1505_vm1 = vcmp.eq.s32.totalorder %v5865_v10, %v5423_v55  ;;  %vm538_vm14 = vcmp.eq.s32.totalorder %v5869_v50, %v5528_v41  ;;  %vm1612_vm5 = vcmp.eq.s32.totalorder %v5865_v10, %v5442_v45 }
 0x1fa   : > { %v5974_v37 = vadd.s32 %v6599_v46, %v278_v9  ;;  %vm539_vm10 = vcmp.eq.s32.totalorder %v5872_v18, %v5528_v41  ;;  %v600_v13 = vadd.f32 %v599_v15, %v569_v57  ;;  %v5979_v0 = vsel %vm1291_vm2, %v5916_v19, 0.0 }
 0x1fb   : > { %vm1719_vm8 = vcmp.eq.s32.totalorder %v5865_v10, %v5449_v51  ;;  %v570_v58 = vsel %vm538_vm14, %v5835_v24, 0.0  ;;  %vm645_vm3 = vcmp.eq.s32.totalorder %v5869_v50, %v5533_v60  ;;  %v5987_v3 = vsel %vm1398_vm4, %v5916_v19, 0.0 }
 0x1fc   : > { %6661 = vst [vmem:[#allocation30_spill] sm:$0xff] %v5987_v3  ;;  %vm540_vm13 = vcmp.eq.s32.totalorder %v5879_v43, %v5528_v41  ;;  %v601_v46 = vadd.f32 %v600_v13, %v570_v58  ;;  %vm646_vm15 = vcmp.eq.s32.totalorder %v5872_v18, %v5533_v60  ;;  %v5994_v9 = vsel %vm1505_vm1, %v5916_v19, 0.0 }
 0x1fd   : > { %6662 = vst [vmem:[#allocation31_spill] sm:$0xff] %v5994_v9  ;;  %v5997_v15 = vsel %vm1612_vm5, %v5916_v19, 0.0  ;;  %v571_v57 = vsel %vm539_vm10, %v5949_v6, 0.0  ;;  %v707_v45 = vadd.f32 %v706_v44, %v676_v2  ;;  %vm541_vm9 = vcmp.eq.s32.totalorder %v5974_v37, %v5528_v41 }
 0x1fe   : > { %6663 = vst [vmem:[#allocation19_spill] sm:$0xff] %v5997_v15  ;;  %v602_v3 = vadd.f32 %v601_v46, %v571_v57  ;;  %vm647_vm0 = vcmp.eq.s32.totalorder %v5879_v43, %v5533_v60  ;;  %v677_v13 = vsel %vm645_vm3, %v5835_v24, 0.0  ;;  %v572_v58 = vsel %vm540_vm13, %v5885_v17, 0.0 }
 0x1ff   : > { %vm648_vm6 = vcmp.eq.s32.totalorder %v5974_v37, %v5533_v60  ;;  %v678_v15 = vsel %vm646_vm15, %v5949_v6, 0.0  ;;  %v708_v9 = vadd.f32 %v707_v45, %v677_v13  ;;  %vm752_vm12 = vcmp.eq.s32.totalorder %v5869_v50, %v5540_v49 }
 0x200   : > { %v603_v44 = vadd.f32 %v602_v3, %v572_v58  ;;  %vm753_vm7 = vcmp.eq.s32.totalorder %v5872_v18, %v5540_v49  ;;  %v813_v41 = vadd.f32 %v5777_v5, %v5717_v22  ;;  %v6021_v2 = vsel %vm1719_vm8, %v5916_v19, 0.0 }
 0x201   : > { %6664 = vst [vmem:[#allocation32_spill] sm:$0xff] %v6021_v2  ;;  %v573_v60 = vsel %vm541_vm9, %v6000_v21, 0.0  ;;  %v679_v45 = vsel %vm647_vm0, %v5885_v17, 0.0  ;;  %v709_v3 = vadd.f32 %v708_v9, %v678_v15  ;;  %v680_v57 = vsel %vm648_vm6, %v6000_v21, 0.0 }
 0x202   : > { %v604_v46 = vadd.f32 %v603_v44, %v573_v60  ;;  %vm754_vm11 = vcmp.eq.s32.totalorder %v5879_v43, %v5540_v49  ;;  %v814_v13 = vadd.f32 %v813_v41, %v5892_v56  ;;  %vm755_vm2 = vcmp.eq.s32.totalorder %v5974_v37, %v5540_v49 }
 0x203   : > { %v710_v22 = vadd.f32 %v709_v3, %v679_v45  ;;  %v784_v51 = vsel %vm752_vm12, %v5835_v24, 0.0  ;;  %v785_v5 = vsel %vm753_vm7, %v5949_v6, 0.0  ;;  %vm859_vm4 = vcmp.eq.s32.totalorder %v5869_v50, %v5545_v25 }
 0x204   : > { %v605_v58 = vadd.f32 %v604_v46, %v574_v11  ;;  %v815_v2 = vadd.f32 %v814_v13, %v784_v51  ;;  %v920_v9 = vadd.f32 %v5785_v42, %v5719_v38  ;;  %v786_v44 = vsel %vm754_vm11, %v5885_v17, 0.0 }
 0x205   : > { %v711_v15 = vadd.f32 %v710_v22, %v680_v57  ;;  %vm860_vm1 = vcmp.eq.s32.totalorder %v5872_v18, %v5545_v25  ;;  %vm861_vm14 = vcmp.eq.s32.totalorder %v5879_v43, %v5545_v25  ;;  %vm862_vm5 = vcmp.eq.s32.totalorder %v5974_v37, %v5545_v25 }
 0x206   : > { %v606_v56 = vrot.slane %v605_v58, 4  ;;  %v816_v41 = vadd.f32 %v815_v2, %v785_v5  ;;  %v921_v11 = vadd.f32 %v920_v9, %v5895_v35  ;;  %v787_v38 = vsel %vm755_vm2, %v6000_v21, 0.0 }
 0x207   : > { %v712_v60 = vadd.f32 %v711_v15, %v5944_v36  ;;  %v891_v42 = vsel %vm859_vm4, %v5835_v24, 0.0  ;;  %vm966_vm10 = vcmp.eq.s32.totalorder %v5869_v50, %v5550_v47  ;;  %v1027_v25 = vadd.f32 %v5791_v1, %v5721_v16 }
 0x208   : > { %v607_v45 = vadd.f32 %v606_v56, %v605_v58  ;;  %v817_v3 = vadd.f32 %v816_v41, %v786_v44  ;;  %v922_v2 = vadd.f32 %v921_v11, %v891_v42  ;;  %v892_v35 = vsel %vm860_vm1, %v5949_v6, 0.0 }
 0x209   : > { %v713_v46 = vrot.slane %v712_v60, 4  ;;  %v893_v36 = vsel %vm861_vm14, %v5885_v17, 0.0  ;;  %v894_v57 = vsel %vm862_vm5, %v6000_v21, 0.0  ;;  %vm967_vm8 = vcmp.eq.s32.totalorder %v5872_v18, %v5550_v47 }
 0x20a   : > { %v818_v49 = vadd.f32 %v817_v3, %v787_v38  ;;  %v923_v13 = vadd.f32 %v922_v2, %v892_v35  ;;  %v1028_v22 = vadd.f32 %v1027_v25, %v5897_v39  ;;  %v608_v51 = vrot.slane %v607_v45, 2 }
 0x20b   : > { %v714_v5 = vadd.f32 %v713_v46, %v712_v60  ;;  %vm968_vm3 = vcmp.eq.s32.totalorder %v5879_v43, %v5550_v47  ;;  %v998_v16 = vsel %vm966_vm10, %v5835_v24, 0.0  ;;  %vm1073_vm13 = vcmp.eq.s32.totalorder %v5869_v50, %v5555_v53 }
 0x20c   : > { %v819_v1 = vadd.f32 %v818_v49, %v5947_v48  ;;  %v924_v58 = vadd.f32 %v923_v13, %v893_v36  ;;  %v1029_v9 = vadd.f32 %v1028_v22, %v998_v16  ;;  %vm969_vm15 = vcmp.eq.s32.totalorder %v5974_v37, %v5550_v47 }
 0x20d   : > { %v715_v15 = vrot.slane %v714_v5, 2  ;;  %v999_v39 = vsel %vm967_vm8, %v5949_v6, 0.0  ;;  %v1134_v44 = vadd.f32 %v5793_v23, %v5723_v14  ;;  %v1000_v11 = vsel %vm968_vm3, %v5885_v17, 0.0 }
 0x20e   : > { %v820_v56 = vrot.slane %v819_v1, 4  ;;  %v925_v41 = vadd.f32 %v924_v58, %v894_v57  ;;  %v1030_v60 = vadd.f32 %v1029_v9, %v999_v39  ;;  %v609_v48 = vadd.f32 %v608_v51, %v607_v45 }
 0x20f   : > { %vm1074_vm9 = vcmp.eq.s32.totalorder %v5872_v18, %v5555_v53  ;;  %v1105_v38 = vsel %vm1073_vm13, %v5835_v24, 0.0  ;;  %v1135_v42 = vadd.f32 %v1134_v44, %v5899_v33  ;;  %v716_v3 = vadd.f32 %v715_v15, %v714_v5 }
 0x210   : > { %v821_v2 = vadd.f32 %v820_v56, %v819_v1  ;;  %v926_v25 = vadd.f32 %v925_v41, %v5952_v32  ;;  %v1031_v46 = vadd.f32 %v1030_v60, %v1000_v11  ;;  %vm1826_vm0 = vcmp.eq.s32.totalorder %v5865_v10, %v5456_v52 }
 0x211   : > { %v1001_v14 = vsel %vm969_vm15, %v6000_v21, 0.0  ;;  %vm1075_vm6 = vcmp.eq.s32.totalorder %v5879_v43, %v5555_v53  ;;  %v1136_v23 = vadd.f32 %v1135_v42, %v1105_v38  ;;  %v1106_v36 = vsel %vm1074_vm9, %v5949_v6, 0.0 }
 0x212   : > { %v822_v45 = vrot.slane %v821_v2, 2  ;;  %v927_v35 = vrot.slane %v926_v25, 4  ;;  %v1032_v33 = vadd.f32 %v1031_v46, %v1001_v14  ;;  %vm1933_vm12 = vcmp.eq.s32.totalorder %v5865_v10, %v5463_v12 }
 0x213   : > { %v610_v32 = vrot.slane %v609_v48, 1  ;;  %vm1076_vm7 = vcmp.eq.s32.totalorder %v5974_v37, %v5555_v53  ;;  %v1137_v57 = vadd.f32 %v1136_v23, %v1106_v36  ;;  %v717_v49 = vrot.slane %v716_v3, 1 }
 0x214   : > { %v928_v47 = vadd.f32 %v927_v35, %v926_v25  ;;  %v1033_v13 = vadd.f32 %v1032_v33, %v5955_v59  ;;  %v1107_v22 = vsel %vm1075_vm6, %v5885_v17, 0.0  ;;  %v6100_v51 = vsel %vm1826_vm0, %v5916_v19, 0.0 }
 0x215   : > { %v1138_v5 = vadd.f32 %v1137_v57, %v1107_v22  ;;  %vm1180_vm11 = vcmp.eq.s32.totalorder %v5869_v50, %v5406_v61  ;;  %v1241_v53 = vadd.f32 %v5797_v54, %v5725_v7  ;;  %v823_v16 = vadd.f32 %v822_v45, %v821_v2 }
 0x216   : > { %v929_v1 = vrot.slane %v928_v47, 2  ;;  %v1034_v58 = vrot.slane %v1033_v13, 4  ;;  %v1108_v59 = vsel %vm1076_vm7, %v6000_v21, 0.0  ;;  %v611_v9 = vadd.f32 %v610_v32, %v609_v48 }
 0x217   : > { %v1139_v15 = vadd.f32 %v1138_v5, %v1108_v59  ;;  %vm1181_vm2 = vcmp.eq.s32.totalorder %v5872_v18, %v5406_v61  ;;  %v1242_v52 = vadd.f32 %v1241_v53, %v5901_v28  ;;  %v718_v39 = vadd.f32 %v717_v49, %v716_v3 }
 0x218   : > { %v1035_v44 = vadd.f32 %v1034_v58, %v1033_v13  ;;  %vm1182_vm4 = vcmp.eq.s32.totalorder %v5879_v43, %v5406_v61  ;;  %v1212_v56 = vsel %vm1180_vm11, %v5835_v24, 0.0  ;;  %v930_v7 = vadd.f32 %v929_v1, %v928_v47 }
 0x219   : > { %v1140_v54 = vadd.f32 %v1139_v15, %v5958_v63  ;;  %vm1183_vm1 = vcmp.eq.s32.totalorder %v5974_v37, %v5406_v61  ;;  %v1243_v41 = vadd.f32 %v1242_v52, %v1212_v56  ;;  %v6120_v11 = vsel %vm1933_vm12, %v5916_v19, 0.0 }
 0x21a   : > { %v824_v28 = vrot.slane %v823_v16, 1  ;;  %v1036_v60 = vrot.slane %v1035_v44, 2  ;;  %v1213_v48 = vsel %vm1181_vm2, %v5949_v6, 0.0  ;;  %vm1287_vm14 = vcmp.eq.s32.totalorder %v5869_v50, %v5411_v27 }
 0x21b   : > { %v1141_v38 = vrot.slane %v1140_v54, 4  ;;  %v1244_v42 = vadd.f32 %v1243_v41, %v1213_v48  ;;  %v1348_v63 = vadd.f32 %v5799_v31, %v5727_v30  ;;  %v719_v61 = vadd.f32 %v718_v39, %v611_v9 }
 0x21c   : > { %v1214_v3 = vsel %vm1182_vm4, %v5885_v17, 0.0  ;;  %v1215_v2 = vsel %vm1183_vm1, %v6000_v21, 0.0  ;;  %vm1288_vm5 = vcmp.eq.s32.totalorder %v5872_v18, %v5411_v27  ;;  %v931_v12 = vrot.slane %v930_v7, 1 }
 0x21d   : > { %v1245_v25 = vadd.f32 %v1244_v42, %v1214_v3  ;;  %vm1289_vm10 = vcmp.eq.s32.totalorder %v5879_v43, %v5411_v27  ;;  %v1349_v46 = vadd.f32 %v1348_v63, %v5903_v8  ;;  %v825_v14 = vadd.f32 %v824_v28, %v823_v16  ;;  %v6667_v42 = vld [vmem:[#allocation8_spill] sm:$0xff]  ;;  %v6668_v63 = vld [vmem:[#allocation14_spill] sm:$0xff] }
 0x21e   : > { %v1037_v23 = vadd.f32 %v1036_v60, %v1035_v44  ;;  %vm1290_vm8 = vcmp.eq.s32.totalorder %v5974_v37, %v5411_v27  ;;  %v1319_v30 = vsel %vm1287_vm14, %v5835_v24, 0.0  ;;  %v1142_v31 = vadd.f32 %v1141_v38, %v1140_v54  ;;  %v6666_v38 = vld [vmem:[#allocation18_spill] sm:$0xff] }
 0x21f   : > { %v1246_v45 = vadd.f32 %v1245_v25, %v1215_v2  ;;  %v1320_v35 = vsel %vm1288_vm5, %v5949_v6, 0.0  ;;  %v1350_v33 = vadd.f32 %v1349_v46, %v1319_v30  ;;  %v826_v36 = vadd.f32 %v825_v14, %v719_v61  ;;  %v6669_v14 = vld [vmem:[#allocation30_spill] sm:$0xff] }
 0x220   : > { %v1321_v32 = vsel %vm1289_vm10, %v5885_v17, 0.0  ;;  %vm1394_vm3 = vcmp.eq.s32.totalorder %v5869_v50, %v5418_v4  ;;  %v1455_v8 = vadd.f32 %v5803_v26, %v5743_v34  ;;  %v932_v57 = vadd.f32 %v931_v12, %v930_v7  ;;  %v6665_v7 = vld [vmem:[#allocation26_spill] sm:$0xff] }
 0x221   : > { %v1247_v49 = vadd.f32 %v1246_v45, %v5963_v40  ;;  %v1351_v47 = vadd.f32 %v1350_v33, %v1320_v35  ;;  %vm1395_vm13 = vcmp.eq.s32.totalorder %v5872_v18, %v5418_v4  ;;  %v1038_v13 = vrot.slane %v1037_v23, 1 }
 0x222   : > { %vm1396_vm15 = vcmp.eq.s32.totalorder %v5879_v43, %v5418_v4  ;;  %vm1397_vm9 = vcmp.eq.s32.totalorder %v5974_v37, %v5418_v4  ;;  %v1456_v22 = vadd.f32 %v1455_v8, %v5905_v29  ;;  %v1143_v5 = vrot.slane %v1142_v31, 2 }
 0x223   : > { %v1248_v53 = vrot.slane %v1247_v49, 4  ;;  %v1352_v16 = vadd.f32 %v1351_v47, %v1321_v32  ;;  %v1426_v34 = vsel %vm1394_vm3, %v5835_v24, 0.0  ;;  %v933_v26 = vadd.f32 %v932_v57, %v826_v36  ;;  %v2465_v47 = vld [vmem:[%s2684_s29 + $0xb] ss:$0 sm:$0xff] }
 0x224   : > { %v1322_v40 = vsel %vm1290_vm8, %v6000_v21, 0.0  ;;  %v1427_v1 = vsel %vm1395_vm13, %v5949_v6, 0.0  ;;  %v1457_v58 = vadd.f32 %v1456_v22, %v1426_v34  ;;  %vm1501_vm0 = vcmp.eq.s32.totalorder %v5869_v50, %v5423_v55 }
 0x225   : > { %v1249_v59 = vadd.f32 %v1248_v53, %v1247_v49  ;;  %v1353_v9 = vadd.f32 %v1352_v16, %v1322_v40  ;;  %v1562_v29 = vadd.f32 %v5805_v20, %v5745_v62  ;;  %v1039_v15 = vadd.f32 %v1038_v13, %v1037_v23  ;;  %v6671_v53 = vld [vmem:[#allocation36_spill] sm:$0xff]  ;;  %v6672_v16 = vld [vmem:[#allocation22_spill] sm:$0xff]  ;;  %v6673_v40 = vld [vmem:[#allocation31_spill] sm:$0xff] }
 0x226   : > { %v1428_v52 = vsel %vm1396_vm15, %v5885_v17, 0.0  ;;  %v1429_v27 = vsel %vm1397_vm9, %v6000_v21, 0.0  ;;  %v1458_v39 = vadd.f32 %v1457_v58, %v1427_v1  ;;  %v1144_v44 = vadd.f32 %v1143_v5, %v1142_v31 }
 0x227   : > { %v1354_v56 = vadd.f32 %v1353_v9, %v5979_v0  ;;  %vm1502_vm6 = vcmp.eq.s32.totalorder %v5872_v18, %v5423_v55  ;;  %v1563_v62 = vadd.f32 %v1562_v29, %v6665_v7  ;;  %v1250_v20 = vrot.slane %v1249_v59, 2 }
 0x228   : > { %v1459_v54 = vadd.f32 %v1458_v39, %v1428_v52  ;;  %vm1503_vm12 = vcmp.eq.s32.totalorder %v5879_v43, %v5423_v55  ;;  %v1533_v41 = vsel %vm1501_vm0, %v5835_v24, 0.0  ;;  %v1040_v28 = vadd.f32 %v1039_v15, %v933_v26  ;;  %v6674_v15 = vld [vmem:[#allocation16_spill] sm:$0xff] }
 0x229   : > { %v1355_v60 = vrot.slane %v1354_v56, 4  ;;  %vm1504_vm7 = vcmp.eq.s32.totalorder %v5974_v37, %v5423_v55  ;;  %v1564_v4 = vadd.f32 %v1563_v62, %v1533_v41  ;;  %v1534_v0 = vsel %vm1502_vm6, %v5949_v6, 0.0  ;;  %v6670_v55 = vld [vmem:[#allocation10_spill] sm:$0xff]  ;;  %v2466_v41 = vld [vmem:[%s2684_s29 + $0xc] ss:$0 sm:$0xff] }
 0x22a   : > { %v1460_v48 = vadd.f32 %v1459_v54, %v1429_v27  ;;  %vm1608_vm11 = vcmp.eq.s32.totalorder %v5869_v50, %v6666_v38  ;;  %v1669_v61 = vadd.f32 %v6668_v63, %v6667_v42  ;;  %v1145_v3 = vrot.slane %v1144_v44, 1 }
 0x22b   : > { %v1356_v2 = vadd.f32 %v1355_v60, %v1354_v56  ;;  %v1535_v12 = vsel %vm1503_vm12, %v5885_v17, 0.0  ;;  %v1565_v25 = vadd.f32 %v1564_v4, %v1534_v0  ;;  %v1251_v46 = vadd.f32 %v1250_v20, %v1249_v59  ;;  %v6676_v60 = vld [vmem:[#allocation23_spill] sm:$0xff] }
 0x22c   : > { %v1461_v23 = vadd.f32 %v1460_v48, %v6669_v14  ;;  %vm1609_vm2 = vcmp.eq.s32.totalorder %v5872_v18, %v6666_v38  ;;  %v1670_v30 = vadd.f32 %v1669_v61, %v6670_v55  ;;  %v1536_v31 = vsel %vm1504_vm7, %v6000_v21, 0.0  ;;  %v6677_v0 = vld [vmem:[#allocation19_spill] sm:$0xff] }
 0x22d   : > { %v1566_v45 = vadd.f32 %v1565_v25, %v1535_v12  ;;  %vm1610_vm4 = vcmp.eq.s32.totalorder %v5879_v43, %v6666_v38  ;;  %v1640_v35 = vsel %vm1608_vm11, %v5835_v24, 0.0  ;;  %v1357_v33 = vrot.slane %v1356_v2, 2 }
 0x22e   : > { %v1462_v36 = vrot.slane %v1461_v23, 4  ;;  %vm1611_vm1 = vcmp.eq.s32.totalorder %v5974_v37, %v6666_v38  ;;  %v1671_v32 = vadd.f32 %v1670_v30, %v1640_v35  ;;  %v1146_v8 = vadd.f32 %v1145_v3, %v1144_v44 }
 0x22f   : > { %v1567_v57 = vadd.f32 %v1566_v45, %v1536_v31  ;;  %v1641_v49 = vsel %vm1609_vm2, %v5949_v6, 0.0  ;;  %vm1715_vm14 = vcmp.eq.s32.totalorder %v5869_v50, %v2465_v47  ;;  %v1252_v13 = vrot.slane %v1251_v46, 1 }
 0x230   : > { %v1463_v22 = vadd.f32 %v1462_v36, %v1461_v23  ;;  %v1672_v5 = vadd.f32 %v1671_v32, %v1641_v49  ;;  %v1776_v34 = vadd.f32 %v6672_v16, %v6671_v53  ;;  %v1147_v26 = vadd.f32 %v1146_v8, %v1040_v28  ;;  %v6675_v28 = vld [vmem:[#allocation37_spill] sm:$0xff]  ;;  %v6680_v49 = vld [vmem:[#allocation24_spill] sm:$0xff] }
 0x231   : > { %v1568_v1 = vadd.f32 %v1567_v57, %v6673_v40  ;;  %v1642_v58 = vsel %vm1610_vm4, %v5885_v17, 0.0  ;;  %v1643_v59 = vsel %vm1611_vm1, %v6000_v21, 0.0  ;;  %v1358_v9 = vadd.f32 %v1357_v33, %v1356_v2  ;;  %v6678_v2 = vld [vmem:[#allocation17_spill] sm:$0xff]  ;;  %v6679_v57 = vld [vmem:[#allocation12_spill] sm:$0xff]  ;;  %v6682_v40 = vld [vmem:[#allocation27_spill] sm:$0xff] }
 0x232   : > { %v1673_v29 = vadd.f32 %v1672_v5, %v1642_v58  ;;  %vm1716_vm5 = vcmp.eq.s32.totalorder %v5872_v18, %v2465_v47  ;;  %v1777_v52 = vadd.f32 %v1776_v34, %v6674_v15  ;;  %v1464_v27 = vrot.slane %v1463_v22, 2  ;;  %v2467_v8 = vld [vmem:[%s2684_s29 + $0xd] ss:$0 sm:$0xff]  ;;  %v6681_v5 = vld [vmem:[#allocation32_spill] sm:$0xff] }
 0x233   : > { %v1569_v39 = vrot.slane %v1568_v1, 4  ;;  %vm1717_vm10 = vcmp.eq.s32.totalorder %v5879_v43, %v2465_v47  ;;  %v1747_v44 = vsel %vm1715_vm14, %v5835_v24, 0.0  ;;  %v1253_v56 = vadd.f32 %v1252_v13, %v1251_v46 }
 0x234   : > { %v1674_v7 = vadd.f32 %v1673_v29, %v1643_v59  ;;  %vm1718_vm8 = vcmp.eq.s32.totalorder %v5974_v37, %v2465_v47  ;;  %v1778_v62 = vadd.f32 %v1777_v52, %v1747_v44  ;;  %v1748_v54 = vsel %vm1716_vm5, %v5949_v6, 0.0 }
 0x235   : > { %v1570_v20 = vadd.f32 %v1569_v39, %v1568_v1  ;;  %vm1822_vm3 = vcmp.eq.s32.totalorder %v5869_v50, %v2466_v41  ;;  %v1883_v4 = vadd.f32 %v6676_v60, %v6675_v28  ;;  %v1359_v48 = vrot.slane %v1358_v9, 1 }
 0x236   : > { %v1675_v38 = vadd.f32 %v1674_v7, %v6677_v0  ;;  %v1749_v42 = vsel %vm1717_vm10, %v5885_v17, 0.0  ;;  %v1779_v63 = vadd.f32 %v1778_v62, %v1748_v54  ;;  %v1254_v61 = vadd.f32 %v1253_v56, %v1147_v26  ;;  %v2468_v56 = vld [vmem:[%s2684_s29 + $0xe] ss:$0 sm:$0xff] }
 0x237   : > { %v1465_v3 = vadd.f32 %v1464_v27, %v1463_v22  ;;  %vm1823_vm13 = vcmp.eq.s32.totalorder %v5872_v18, %v2466_v41  ;;  %v1884_v12 = vadd.f32 %v1883_v4, %v6678_v2  ;;  %v1571_v25 = vrot.slane %v1570_v20, 2  ;;  %v6683_v54 = vld [vmem:[#allocation9_spill] sm:$0xff] }
 0x238   : > { %v1676_v46 = vrot.slane %v1675_v38, 4  ;;  %v1780_v14 = vadd.f32 %v1779_v63, %v1749_v42  ;;  %v1854_v23 = vsel %vm1822_vm3, %v5835_v24, 0.0  ;;  %v1750_v55 = vsel %vm1718_vm8, %v6000_v21, 0.0  ;;  %v6685_v63 = vld [vmem:[#allocation28_spill] sm:$0xff] }
 0x239   : > { %vm1824_vm15 = vcmp.eq.s32.totalorder %v5879_v43, %v2466_v41  ;;  %vm1825_vm9 = vcmp.eq.s32.totalorder %v5974_v37, %v2466_v41  ;;  %v1885_v30 = vadd.f32 %v1884_v12, %v1854_v23  ;;  %v1360_v31 = vadd.f32 %v1359_v48, %v1358_v9  ;;  %v6684_v41 = vld [vmem:[#allocation15_spill] sm:$0xff] }
 0x23a   : > { %v1677_v45 = vadd.f32 %v1676_v46, %v1675_v38  ;;  %v1781_v35 = vadd.f32 %v1780_v14, %v1750_v55  ;;  %v1855_v33 = vsel %vm1823_vm13, %v5949_v6, 0.0  ;;  %v1466_v36 = vrot.slane %v1465_v3, 1  ;;  %v2469_v55 = vld [vmem:[%s2684_s29 + $0xf] ss:$0 sm:$0xff] }
 0x23b   : > { %v1886_v32 = vadd.f32 %v1885_v30, %v1855_v33  ;;  %vm1929_vm0 = vcmp.eq.s32.totalorder %v5869_v50, %v2467_v8  ;;  %v1990_v13 = vadd.f32 %v6680_v49, %v6679_v57  ;;  %v1361_v47 = vadd.f32 %v1360_v31, %v1254_v61  ;;  %v6686_v30 = vld [vmem:[#allocation13_spill] sm:$0xff] }
 0x23c   : > { %v1572_v22 = vadd.f32 %v1571_v25, %v1570_v20  ;;  %v1782_v53 = vadd.f32 %v1781_v35, %v6681_v5  ;;  %v1856_v16 = vsel %vm1824_vm15, %v5885_v17, 0.0  ;;  %v1678_v34 = vrot.slane %v1677_v45, 2  ;;  %v6687_v31 = vld [vmem:[#allocation25_spill] sm:$0xff] }
 0x23d   : > { %v1887_v26 = vadd.f32 %v1886_v32, %v1856_v16  ;;  %vm1930_vm6 = vcmp.eq.s32.totalorder %v5872_v18, %v2467_v8  ;;  %v1991_v1 = vadd.f32 %v1990_v13, %v6682_v40  ;;  %v1857_v59 = vsel %vm1825_vm9, %v6000_v21, 0.0  ;;  %v6688_v49 = vld [vmem:[#allocation29_spill] sm:$0xff] }
 0x23e   : > { %v1783_v58 = vrot.slane %v1782_v53, 4  ;;  %vm1931_vm12 = vcmp.eq.s32.totalorder %v5879_v43, %v2467_v8  ;;  %v1961_v9 = vsel %vm1929_vm0, %v5835_v24, 0.0  ;;  %v1467_v29 = vadd.f32 %v1466_v36, %v1465_v3 }
 0x23f   : > { %v1888_v15 = vadd.f32 %v1887_v26, %v1857_v59  ;;  %vm1932_vm7 = vcmp.eq.s32.totalorder %v5974_v37, %v2467_v8  ;;  %v1992_v52 = vadd.f32 %v1991_v1, %v1961_v9  ;;  %v1573_v27 = vrot.slane %v1572_v22, 1 }
 0x240   : > { %v1784_v39 = vadd.f32 %v1783_v58, %v1782_v53  ;;  %v1962_v44 = vsel %vm1930_vm6, %v5949_v6, 0.0  ;;  %vm2036_vm11 = vcmp.eq.s32.totalorder %v5869_v50, %v2468_v56  ;;  %vm2040_vm2 = vcmp.eq.s32.totalorder %v5865_v10, %v2468_v56 }
 0x241   : > { %v1679_v7 = vadd.f32 %v1678_v34, %v1677_v45  ;;  %v1889_v62 = vadd.f32 %v1888_v15, %v6100_v51  ;;  %v1993_v20 = vadd.f32 %v1992_v52, %v1962_v44  ;;  %v2097_v28 = vadd.f32 %v6684_v41, %v6683_v54 }
 0x242   : > { %v1468_v60 = vadd.f32 %v1467_v29, %v1361_v47  ;;  %v1785_v4 = vrot.slane %v1784_v39, 2  ;;  %v1963_v48 = vsel %vm1931_vm12, %v5885_v17, 0.0  ;;  %v1964_v0 = vsel %vm1932_vm7, %v6000_v21, 0.0 }
 0x243   : > { %v1890_v38 = vrot.slane %v1889_v62, 4  ;;  %v1994_v42 = vadd.f32 %v1993_v20, %v1963_v48  ;;  %vm2037_vm4 = vcmp.eq.s32.totalorder %v5872_v18, %v2468_v56  ;;  %v2098_v61 = vadd.f32 %v2097_v28, %v6685_v63 }
 0x244   : > { %v1574_v51 = vadd.f32 %v1573_v27, %v1572_v22  ;;  %vm2038_vm1 = vcmp.eq.s32.totalorder %v5879_v43, %v2468_v56  ;;  %vm2039_vm14 = vcmp.eq.s32.totalorder %v5974_v37, %v2468_v56  ;;  %v2068_v3 = vsel %vm2036_vm11, %v5835_v24, 0.0 }
 0x245   : > { %v1680_v2 = vrot.slane %v1679_v7, 1  ;;  %v1891_v12 = vadd.f32 %v1890_v38, %v1889_v62  ;;  %v1995_v25 = vadd.f32 %v1994_v42, %v1964_v0  ;;  %v2099_v46 = vadd.f32 %v2098_v61, %v2068_v3 }
 0x246   : > { %v1786_v14 = vadd.f32 %v1785_v4, %v1784_v39  ;;  %v2069_v23 = vsel %vm2037_vm4, %v5949_v6, 0.0  ;;  %vm2143_vm5 = vcmp.eq.s32.totalorder %v5869_v50, %v2469_v55  ;;  %v2204_v45 = vadd.f32 %v6687_v31, %v6686_v30 }
 0x247   : > { %v1575_v35 = vadd.f32 %v1574_v51, %v1468_v60  ;;  %v1892_v33 = vrot.slane %v1891_v12, 2  ;;  %v1996_v36 = vadd.f32 %v1995_v25, %v6120_v11  ;;  %v2100_v32 = vadd.f32 %v2099_v46, %v2069_v23  ;;  %v505_v51 = vld [vmem:[#allocation2] sm:$0x1] }
 0x248   : > { %v2070_v8 = vsel %vm2038_vm1, %v5885_v17, 0.0  ;;  %v2071_v57 = vsel %vm2039_vm14, %v6000_v21, 0.0  ;;  %vm2144_vm10 = vcmp.eq.s32.totalorder %v5872_v18, %v2469_v55  ;;  %v2205_v50 = vadd.f32 %v2204_v45, %v6688_v49 }
 0x249   : > { %v1681_v13 = vadd.f32 %v1680_v2, %v1679_v7  ;;  %v1997_v47 = vrot.slane %v1996_v36, 4  ;;  %v2101_v22 = vadd.f32 %v2100_v32, %v2070_v8  ;;  %v2175_v5 = vsel %vm2143_vm5, %v5835_v24, 0.0 }
 0x24a   : > { %v1787_v53 = vrot.slane %v1786_v14, 1  ;;  %v1893_v11 = vadd.f32 %v1892_v33, %v1891_v12  ;;  %vm2145_vm8 = vcmp.eq.s32.totalorder %v5879_v43, %v2469_v55  ;;  %v2206_v16 = vadd.f32 %v2205_v50, %v2175_v5 }
 0x24b   : > { %v1998_v34 = vadd.f32 %v1997_v47, %v1996_v36  ;;  %v2102_v26 = vadd.f32 %v2101_v22, %v2071_v57  ;;  %v2176_v40 = vsel %vm2144_vm10, %v5949_v6, 0.0  ;;  %v2072_v18 = vsel %vm2040_vm2, %v5916_v19, 0.0 }
 0x24c   : > { %v1682_v1 = vadd.f32 %v1681_v13, %v1575_v35  ;;  %vm2146_vm3 = vcmp.eq.s32.totalorder %v5974_v37, %v2469_v55  ;;  %v2207_v58 = vadd.f32 %v2206_v16, %v2176_v40  ;;  %v2177_v24 = vsel %vm2145_vm8, %v5885_v17, 0.0 }
 0x24d   : > { %v1999_v59 = vrot.slane %v1998_v34, 2  ;;  %v2103_v9 = vadd.f32 %v2102_v26, %v2072_v18  ;;  %vm2147_vm13 = vcmp.eq.s32.totalorder %v5865_v10, %v2469_v55  ;;  %v1788_v43 = vadd.f32 %v1787_v53, %v1786_v14 }
 0x24e   : > { %v1894_v29 = vrot.slane %v1893_v11, 1  ;;  %v2208_v15 = vadd.f32 %v2207_v58, %v2177_v24  ;;  %v2178_v6 = vsel %vm2146_vm3, %v6000_v21, 0.0  ;;  %v2179_v56 = vsel %vm2147_vm13, %v5916_v19, 0.0 }
 0x24f   : > { %v2000_v52 = vadd.f32 %v1999_v59, %v1998_v34  ;;  %v2104_v27 = vrot.slane %v2103_v9, 4  ;;  %v1789_v39 = vadd.f32 %v1788_v43, %v1682_v1  ;;  %v2226_v12 = vstv (!%p2354_p3), %s2225_s6 }
 0x250   : > { %v2209_v44 = vadd.f32 %v2208_v15, %v2178_v6  ;;  %v1895_v37 = vadd.f32 %v1894_v29, %v1893_v11 }
 0x251   : > { %v2105_v7 = vadd.f32 %v2104_v27, %v2103_v9  ;;  %v2001_v62 = vrot.slane %v2000_v52, 1 }
 0x252   : > { %v2210_v20 = vadd.f32 %v2209_v44, %v2179_v56  ;;  %v1896_v41 = vadd.f32 %v1895_v37, %v1789_v39 }
 0x253   : > { %v2106_v54 = vrot.slane %v2105_v7, 2  ;;  %v2002_v10 = vadd.f32 %v2001_v62, %v2000_v52 }
 0x254   : > { %v2211_v17 = vrot.slane %v2210_v20, 4 }
 0x255   : > { %v2107_v28 = vadd.f32 %v2106_v54, %v2105_v7  ;;  %v2003_v48 = vadd.f32 %v2002_v10, %v1896_v41 }
 0x256   : > { %v2212_v60 = vadd.f32 %v2211_v17, %v2210_v20 }
 0x257   : > { %v2108_v4 = vrot.slane %v2107_v28, 1 }
 0x258   : > { %v2213_v0 = vrot.slane %v2212_v60, 2 }
 0x259   : > { %v2109_v38 = vadd.f32 %v2108_v4, %v2107_v28 }
 0x25a   : > { %v2214_v42 = vadd.f32 %v2213_v0, %v2212_v60 }
 0x25b   : > { %v2110_v21 = vadd.f32 %v2109_v38, %v2003_v48 }
 0x25c   : > { %v2215_v63 = vrot.slane %v2214_v42, 1 }
 0x25e   : > { %v2216_v61 = vadd.f32 %v2215_v63, %v2214_v42  ;;  %2223 = sbr.rel (%p2354_p3) target bundleno = 623 (0x26f), region = 78 }
 0x260   : > { %v2217_v19 = vadd.f32 %v2216_v61, %v2110_v21 }
 0x262   : > { %v2218_v3 = vadd.f32 %v2217_v19, %v505_v51 }
 0x264   : > { %2219 = vst [vmem:[#allocation2] sm:$0x1] %v2218_v3 }
 0x26b   : > { %v2224_v2 = vld [vmem:[#allocation2] sm:$0x1] }
 0x26c   : > { %v2227_v25 = vadd.f32 %v2226_v12, %v2224_v2 }
 0x26e   : > { %2228 = vst [vmem:[%s234_s4] sm:$0x1] %v2227_v25 }
 0x26f PF: > { %s2355_s7 = sshll.u32 %s2552_s18, 4  ;;  %s2242_s17 = sshll.u32 %s234_s4, 4  ;;  %s2243_s17 = int_to_ptr.vmem [resolvable:$true] %s2242_s17 }
 0x270   : > { %s6292_s10 = scalar_lea.hbm %s6345_s3, %s2355_s7  ;;  %s2230_s12 = scalar_lea.sflag [#allocation6], %s2675_s11 }
 0x271   : > { %s2470_s13 = scalar_lea.vmem %s2243_s17, 16  ;;  %s2568_s2 = smov [#allocation5]  }
 0x272   : > { %p2471_p4 = scmp.ne.s32.totalorder %s2243_s17, %s2470_s13  ;;  %s2474_s22 = sshll.u32 %s2568_s2, 4  ;;  %s2475_s22 = int_to_ptr.vmem [resolvable:$false] %s2474_s22 }
 0x273   : > { %s2476_s25 = scalar_lea.vmem %s2475_s22, 32  ;;  %p2477_p8 = scmp.lt.s32.totalorder %s2243_s17, %s2475_s22 }
 0x274   : > { %p2472_p5 = pnand %p2471_p4, %p2648_p7  ;;  %p2478_p10 = scmp.lt.s32.totalorder %s2476_s25, %s2470_s13 }
 0x276   : > { %p2473_p6 = pneg %p2472_p5  ;;  %p2479_p11 = por %p2478_p10, %p2477_p8 }
 0x278   : > { %p2480_p12 = pnand %p2479_p11, %p2473_p6 }
 0x27a   : > { %2483 = shalt.err (!%p2480_p12)
}
 0x27b   : > { %s2484_s18 = scalar_lea.hbm %s6292_s10, 16  ;;  %s2488_s29 = scalar_lea.hbm %s6345_s3, 32 }
 0x27c   : > { %p2485_p13 = scmp.ne.s32.totalorder %s6292_s10, %s2484_s18  ;;  %p2489_p2 = scmp.lt.u32.totalorder %s6292_s10, %s6345_s3 }
 0x27d   : > { %p2490_p3 = scmp.lt.u32.totalorder %s2488_s29, %s2484_s18  ;;  %p2492_p5 = scmp.lt.u32.totalorder %s2484_s18, %s6292_s10 }
 0x27e   : > { %p2486_p0 = pnand %p2485_p13, %p2648_p7 }
 0x27f   : > { %p2491_p4 = por %p2490_p3, %p2489_p2 }
 0x280   : > { %p2487_p1 = pneg %p2486_p0 }
 0x281   : > { %p2493_p6 = por %p2492_p5, %p2491_p4 }
 0x283   : > { %p2494_p8 = pnand %p2493_p6, %p2487_p1 }
 0x285   : > { %2497 = shalt.err (!%p2494_p8)
}
 0x286   : > { %2358 = dma.vmem_to_hbm [thread:$0]  (%p2648_p7), %s2243_s17, 16, %s6292_s10, %s2230_s12  }
 0x287 PF: > { %p2364_p10 = scmp.ge.s32.totalorder %s2564_s21, 2  ;;  %s2254_s6 = sand.u32 1, %s2536_s14  }
 0x288   : > { %s2255_s7 = scalar_lea.sflag [#allocation6], %s2254_s6 }
 0x289   : > { %p2361_p11 = pnand %p2364_p10, %p2654_p9 }
 0x28b   : > { %2531 = dma.done.wait (!%p2361_p11), %s2255_s7, 16  }
 0x28c   : > { %2533 = vsyncadd (!%p2361_p11), %s2255_s7, 4294967280  ;;  %s17_s21 = sadd.s32 1, %s2564_s21   ;;  %s6689_s14 = smov %s2540_s15 }
 0x28d   : > { %p14_p12 = scmp.ge.s32.totalorder %s17_s21, 6   ;;  %s6690_s15 = smov %s2544_s16 }
 0x28e   : > { %s6691_s16 = smov %s2662_s30  ;;  %s6692_s17 = smov %s2556_s19 }
 0x28f   : > { %s6693_s18 = smov %s2560_s20  ;;  %s6694_s19 = smov %s6697_s23 }
 0x290   : > { %s6695_s20 = smov %s6701_s24  ;;  %16 = sbr.rel (!%p14_p12) target bundleno = 7 (0x7), region = 121 }
 0x297   :  { %2259 = vsyncpa [#allocation6], 1 }
 0x298   :  { %2261 = vsyncpa [#allocation6 + $0x1], 1 }

</bundles_post_ra>
